<compile_context>
chip_gen: v6e
topology: v6e:2x2x1
jax: 0.10.0
libtpu: 0.0.40
codegen_flags: <defaults>
</compile_context>

<pallas_src>
import functools
import numpy as np

import jax
import jax.numpy as jnp
from jax import lax
from jax.experimental import pallas as pl
from jax.experimental.pallas import tpu as pltpu

_NEG = -1e30      # "minus infinity" that stays finite in f32
_BIG = 1e9        # sort key for invalid entries (assumes rank * n_pad << 1e9)
_TINY = 1e-30
_OUT_W = 128      # lane-dense output width per grid step (>= rows per step)


def _wpl_kernel(scores_ref, rank_ref, mask_ref, loss_ref, cnt_ref, *,
                temperature, top_k, weight_decay, n_pad, tb, kc):
    f32 = jnp.float32
    inv_t = f32(1.0 / temperature)
    log_decay = f32(np.log(weight_decay))

    s = scores_ref[...] * inv_t                                  # (tb, N)
    r = rank_ref[...]                                            # (tb, N)
    msk = mask_ref[...]                                          # (tb, N)
    valid = (msk > f32(0.5)) & (r > f32(0.0))                    # mask & (rank > 0)

    # Stable-sort key: rank * n_pad + column index (valid), +BIG otherwise.
    lane = lax.broadcasted_iota(jnp.int32, (tb, n_pad), 1).astype(f32)
    key = jnp.where(valid, r * f32(n_pad) + lane, f32(_BIG))

    count = jnp.sum(valid.astype(f32), axis=1, keepdims=True)    # (tb, 1)
    if top_k is None:
        kcap = count
    else:
        kcap = jnp.minimum(f32(top_k), count)                    # (tb, 1)

    # Per-tile relayouts (once): column (sublane) views of key / scores.
    keyT = jnp.transpose(key)                                    # (N, tb)
    sT = jnp.transpose(s)                                        # (N, tb)

    out_iota = lax.broadcasted_iota(jnp.int32, (1, _OUT_W), 1)
    loss_vec = jnp.zeros((1, _OUT_W), f32)
    cnt_vec = jnp.zeros((1, _OUT_W), f32)

    for i in range(tb):                                          # static unroll
        key_row = key[i:i + 1, :]                                # (1, N)
        s_row = s[i:i + 1, :]                                    # (1, N)
        k_i = kcap[i:i + 1, :]                                   # (1, 1)

        # ---- Stage A: position of each element in the rank-sorted valid set.
        #      pos[j] = #{valid k : key[k] < key[j]}  (VPU sublane reduction).
        pos_row = jnp.zeros((1, n_pad), f32)
        for c in range(0, n_pad, kc):
            key_col = keyT[c:c + kc, i:i + 1]                    # (kc, 1)
            lt = (key_col < key_row).astype(f32)                 # (kc, N)
            pos_row = pos_row + jnp.sum(lt, axis=0, keepdims=True)

        in_set = pos_row < k_i                                   # kept after top-K
        s_m = jnp.where(in_set, s_row, f32(_NEG))
        m_i = jnp.max(s_m, axis=1, keepdims=True)                # (1, 1) in-set max
        thr = jnp.max(jnp.where(in_set, key_row, f32(-_BIG)),
                      axis=1, keepdims=True)                     # largest in-set key

        # ---- Stage C: suffix sums  sum_{k in set, pos[k] >= pos[j]} exp(s[k]-m).
        suf = jnp.zeros((1, n_pad), f32)
        for c in range(0, n_pad, kc):
            key_col = keyT[c:c + kc, i:i + 1]                    # (kc, 1)
            s_col = sT[c:c + kc, i:i + 1]                        # (kc, 1)
            e_col = jnp.where(key_col <= thr,
                              jnp.exp(jnp.minimum(s_col - m_i, f32(0.0))),
                              f32(0.0))                          # (kc, 1)
            contrib = jnp.where(key_col >= key_row, e_col, f32(0.0))  # (kc, N)
            suf = suf + jnp.sum(contrib, axis=0, keepdims=True)

        # ---- Stage D: weighted log-probs and per-row reduction.
        lse = m_i + jnp.log(jnp.maximum(suf, f32(_TINY)))
        include = pos_row < (k_i - f32(1.0))                     # positions 0..K-2
        wgt = jnp.exp(pos_row * log_decay)                       # decay ** pos
        term = jnp.where(include, wgt * (s_row - lse), f32(0.0))
        loss_i = -jnp.sum(term, axis=1, keepdims=True)           # (1, 1)
        cnt_i = (count[i:i + 1, :] >= f32(2.0)).astype(f32)      # row contributes?

        sel = out_iota == i                                      # lane-dense place
        loss_vec = jnp.where(sel, loss_i, loss_vec)
        cnt_vec = jnp.where(sel, cnt_i, cnt_vec)

    loss_ref[...] = loss_vec                                     # (1, 128) full store
    cnt_ref[...] = cnt_vec


def weighted_plackett_luce_loss(scores, rankings, mask, *, temperature=1.0,
                                top_k=None, weight_decay=0.8, reduction='mean'):
    if weight_decay <= 0.0:
        raise ValueError("weight_decay must be > 0 (decay**i computed as exp(i*log(decay)))")
    if reduction not in ('mean', 'sum'):
        # TODO(synk): reduction='none' returns a ragged per-contributing-batch vector.
        raise NotImplementedError("reduction='none' not supported in the Pallas kernel")

    B, N = scores.shape
    n_pad = ((N + 127) // 128) * 128

    # Rows per grid step: bigger tiles amortize per-step overhead; keep >= 2
    # grid blocks for large batches (v7x megacore), small unroll for tiny ones.
    tb = 32 if B >= 64 else (16 if B >= 16 else 8)
    if n_pad >= 512:
        tb = 8      # bound statically-unrolled code size at large N
    b_pad = ((B + tb - 1) // tb) * tb
    grid_len = b_pad // tb

    # k-chunk so per-chunk (kc, n_pad) temporaries stay ~16 vregs.
    kc = min(n_pad, max(8, 16384 // n_pad))

    s = jnp.pad(scores.astype(jnp.float32), ((0, b_pad - B), (0, n_pad - N)))
    r = jnp.pad(rankings.astype(jnp.float32), ((0, b_pad - B), (0, n_pad - N)))
    m = jnp.pad(mask.astype(jnp.float32), ((0, b_pad - B), (0, n_pad - N)))

    kernel = functools.partial(_wpl_kernel, temperature=float(temperature),
                               top_k=top_k, weight_decay=float(weight_decay),
                               n_pad=n_pad, tb=tb, kc=kc)

    row_spec = pl.BlockSpec((tb, n_pad), lambda g: (g, 0))
    out_spec = pl.BlockSpec((1, _OUT_W), lambda g: (0, g))

    cost = pl.CostEstimate(
        flops=int(6 * b_pad * n_pad * n_pad),
        transcendentals=int(2 * b_pad * n_pad),
        bytes_accessed=int(3 * 4 * b_pad * n_pad + 2 * 4 * grid_len * _OUT_W))

    loss_rows, cnt_rows = pl.pallas_call(
        kernel,
        out_shape=(jax.ShapeDtypeStruct((1, grid_len * _OUT_W), jnp.float32),
                   jax.ShapeDtypeStruct((1, grid_len * _OUT_W), jnp.float32)),
        grid=(grid_len,),
        in_specs=[row_spec, row_spec, row_spec],
        out_specs=(out_spec, out_spec),
        compiler_params=pltpu.CompilerParams(dimension_semantics=("parallel",)),
        cost_estimate=cost,
    )(s, r, m)

    # Padded rows / lanes produce exactly 0 loss and 0 count.
    total = jnp.sum(loss_rows)
    n_contrib = jnp.sum(cnt_rows)
    if reduction == 'mean':
        return total / jnp.maximum(n_contrib, 1.0)   # 0.0 when nothing contributes
    return total


# ---------------------------------------------------------------------------
# Pure numpy reference (mirrors the PyTorch forward exactly), for verification.
# ---------------------------------------------------------------------------
def _np_logsumexp(x):
    mx = np.max(x)
    return mx + np.log(np.sum(np.exp(x - mx)))


def _ref_loss(scores, rankings, mask, temperature=1.0, top_k=None,
              weight_decay=0.8, reduction='mean'):
    scores = np.asarray(scores, np.float64)
    rankings = np.asarray(rankings)
    mask = np.asarray(mask).astype(bool)
    B, _ = scores.shape
    losses = []
    for b in range(B):
        bs = scores[b] / temperature
        bm = mask[b]
        vh = np.where(bm)[0]
        if len(vh) == 0:
            continue
        vs, vr = bs[vh], rankings[b][vh]
        keep = vr > 0
        if not keep.any():
            continue
        fs, fr = vs[keep], vr[keep]
        if len(fs) <= 1:
            continue
        order = np.argsort(fr, kind='stable')
        ss = fs[order]
        if top_k is not None:
            ss = ss[:min(top_k, len(ss))]
        bl = 0.0
        for i in range(len(ss) - 1):
            w = weight_decay ** i
            bl -= w * (ss[i] - _np_logsumexp(ss[i:]))
        losses.append(bl)
    if not losses:
        return 0.0
    lt = np.array(losses)
    return float(lt.mean() if reduction == 'mean' else lt.sum())


if __name__ == "__main__":
    B, N = 4, 16
    key = jax.random.PRNGKey(0)
    k1, k2, k3, k4 = jax.random.split(key, 4)

    scores = jax.random.normal(k1, (B, N), dtype=jnp.float32)
    # distinct rankings 1..N per batch, some zeroed out
    perm = jnp.argsort(jax.random.uniform(k2, (B, N)), axis=1).astype(jnp.int32) + 1
    has_rank = (jax.random.uniform(k4, (B, N)) > 0.2).astype(jnp.int32)
    rankings = perm * has_rank
    mask = jax.random.uniform(k3, (B, N)) > 0.3

    # edge cases: batch 2 has a single valid horse; batch 3 has no ranked horses
    mask = mask.at[2].set(False).at[2, 3].set(True)
    rankings = rankings.at[3].set(0)

    configs = [
        dict(temperature=1.0, top_k=None, weight_decay=0.8, reduction='mean'),
        dict(temperature=1.7, top_k=3, weight_decay=0.5, reduction='mean'),
        dict(temperature=1.0, top_k=None, weight_decay=0.8, reduction='sum'),
    ]

    ok = True
    for cfg in configs:
        out = weighted_plackett_luce_loss(scores, rankings, mask, **cfg)
        out = jax.block_until_ready(out)
        ref = _ref_loss(np.array(scores), np.array(rankings), np.array(mask), **cfg)
        if not np.allclose(np.float64(out), ref, rtol=1e-4, atol=1e-5):
            ok = False
            print(f"MISMATCH cfg={cfg}: kernel={float(out)} ref={ref}")

    # Slightly larger batch: exercises tb=16 tiles and a 2-step grid.
    B2 = 20
    kk = jax.random.split(jax.random.PRNGKey(1), 4)
    scores2 = jax.random.normal(kk[0], (B2, N), dtype=jnp.float32)
    perm2 = jnp.argsort(jax.random.uniform(kk[1], (B2, N)), axis=1).astype(jnp.int32) + 1
    has2 = (jax.random.uniform(kk[2], (B2, N)) > 0.3).astype(jnp.int32)
    rank2 = perm2 * has2
    mask2 = jax.random.uniform(kk[3], (B2, N)) > 0.25
    out2 = weighted_plackett_luce_loss(scores2, rank2, mask2,
                                       temperature=1.3, top_k=4, weight_decay=0.7)
    out2 = jax.block_until_ready(out2)
    ref2 = _ref_loss(np.array(scores2), np.array(rank2), np.array(mask2),
                     temperature=1.3, top_k=4, weight_decay=0.7)
    if not np.allclose(np.float64(out2), ref2, rtol=1e-4, atol=1e-5):
        ok = False
        print(f"MISMATCH large-batch: kernel={float(out2)} ref={ref2}")

    if ok:
        print("KERNEL_OK")
</pallas_src>

<mosaic_0001>
module attributes {stable_mosaic.version = 11 : i64} {
  func.func @_wpl_kernel(%arg0: i32, %arg1: memref<8x128xf32, #tpu.memory_space<vmem>>, %arg2: memref<8x128xf32, #tpu.memory_space<vmem>>, %arg3: memref<8x128xf32, #tpu.memory_space<vmem>>, %arg4: memref<1x128xf32, #tpu.memory_space<vmem>>, %arg5: memref<1x128xf32, #tpu.memory_space<vmem>>) attributes {dimension_semantics = [#tpu.dimension_semantics<parallel>], iteration_bounds = array<i64: 1>, scalar_prefetch = 0 : i64, scratch_operands = 0 : i64, tpu.core_type = #tpu.core_type<tc>, window_params = [{transform_indices = @transform_0, window_bounds = array<i64: 8, 128>}, {transform_indices = @transform_1, window_bounds = array<i64: 8, 128>}, {transform_indices = @transform_2, window_bounds = array<i64: 8, 128>}, {transform_indices = @transform_3, window_bounds = array<i64: 1, 128>}, {transform_indices = @transform_4, window_bounds = array<i64: 1, 128>}]} {
    %c0 = arith.constant 0 : index
    %c0_0 = arith.constant 0 : index
    %0 = vector.load %arg1[%c0, %c0_0] : memref<8x128xf32, #tpu.memory_space<vmem>>, vector<8x128xf32>
    %cst = arith.constant 1.000000e+00 : f32
    %1 = vector.broadcast %cst : f32 to vector<8x128xf32>
    %2 = arith.mulf %0, %1 : vector<8x128xf32>
    %c0_1 = arith.constant 0 : index
    %c0_2 = arith.constant 0 : index
    %3 = vector.load %arg2[%c0_1, %c0_2] : memref<8x128xf32, #tpu.memory_space<vmem>>, vector<8x128xf32>
    %c0_3 = arith.constant 0 : index
    %c0_4 = arith.constant 0 : index
    %4 = vector.load %arg3[%c0_3, %c0_4] : memref<8x128xf32, #tpu.memory_space<vmem>>, vector<8x128xf32>
    %cst_5 = arith.constant 5.000000e-01 : f32
    %5 = vector.broadcast %cst_5 : f32 to vector<8x128xf32>
    %6 = arith.cmpf ogt, %4, %5 : vector<8x128xf32>
    %cst_6 = arith.constant 0.000000e+00 : f32
    %7 = vector.broadcast %cst_6 : f32 to vector<8x128xf32>
    %8 = arith.cmpf ogt, %3, %7 : vector<8x128xf32>
    %9 = arith.andi %6, %8 : vector<8x128xi1>
    %10 = tpu.iota {dimensions = array<i32: 1>} : vector<8x128xi32>
    %11 = arith.sitofp %10 : vector<8x128xi32> to vector<8x128xf32>
    %cst_7 = arith.constant 1.280000e+02 : f32
    %12 = vector.broadcast %cst_7 : f32 to vector<8x128xf32>
    %13 = arith.mulf %3, %12 : vector<8x128xf32>
    %14 = arith.addf %13, %11 : vector<8x128xf32>
    %cst_8 = arith.constant 1.000000e+09 : f32
    %15 = vector.broadcast %cst_8 : f32 to vector<8x128xf32>
    %16 = arith.select %9, %14, %15 : vector<8x128xi1>, vector<8x128xf32>
    %17 = arith.extui %9 : vector<8x128xi1> to vector<8x128xi32>
    %18 = arith.sitofp %17 : vector<8x128xi32> to vector<8x128xf32>
    %cst_9 = arith.constant dense<0.000000e+00> : vector<8xf32>
    %19 = vector.multi_reduction <add>, %18, %cst_9 [1] : vector<8x128xf32> to vector<8xf32>
    %20 = vector.shape_cast %19 : vector<8xf32> to vector<8x1xf32>
    %21 = tpu.transpose %16, [1, 0] : vector<8x128xf32> -> vector<128x8xf32>
    %22 = tpu.transpose %2, [1, 0] : vector<8x128xf32> -> vector<128x8xf32>
    %23 = tpu.iota {dimensions = array<i32: 1>} : vector<1x128xi32>
    %cst_10 = arith.constant 0.000000e+00 : f32
    %24 = vector.broadcast %cst_10 : f32 to vector<1x128xf32>
    %cst_11 = arith.constant 0.000000e+00 : f32
    %25 = vector.broadcast %cst_11 : f32 to vector<1x128xf32>
    %26 = vector.extract_strided_slice %16 {offsets = [0, 0], sizes = [1, 128], strides = [1, 1]} : vector<8x128xf32> to vector<1x128xf32>
    %27 = vector.extract_strided_slice %2 {offsets = [0, 0], sizes = [1, 128], strides = [1, 1]} : vector<8x128xf32> to vector<1x128xf32>
    %28 = vector.extract_strided_slice %20 {offsets = [0, 0], sizes = [1, 1], strides = [1, 1]} : vector<8x1xf32> to vector<1x1xf32>
    %cst_12 = arith.constant 0.000000e+00 : f32
    %29 = vector.broadcast %cst_12 : f32 to vector<1x128xf32>
    %30 = vector.extract_strided_slice %21 {offsets = [0, 0], sizes = [128, 1], strides = [1, 1]} : vector<128x8xf32> to vector<128x1xf32>
    %31 = vector.broadcast %30 : vector<128x1xf32> to vector<128x128xf32>
    %32 = vector.broadcast %26 : vector<1x128xf32> to vector<128x128xf32>
    %33 = arith.cmpf olt, %31, %32 : vector<128x128xf32>
    %34 = arith.extui %33 : vector<128x128xi1> to vector<128x128xi32>
    %35 = arith.sitofp %34 : vector<128x128xi32> to vector<128x128xf32>
    %cst_13 = arith.constant dense<0.000000e+00> : vector<128xf32>
    %36 = vector.multi_reduction <add>, %35, %cst_13 [0] : vector<128x128xf32> to vector<128xf32>
    %37 = vector.shape_cast %36 : vector<128xf32> to vector<1x128xf32>
    %38 = arith.addf %29, %37 : vector<1x128xf32>
    %39 = vector.broadcast %28 : vector<1x1xf32> to vector<1x128xf32>
    %40 = arith.cmpf olt, %38, %39 : vector<1x128xf32>
    %cst_14 = arith.constant -1.000000e+30 : f32
    %41 = vector.broadcast %cst_14 : f32 to vector<1x128xf32>
    %42 = arith.select %40, %27, %41 : vector<1x128xi1>, vector<1x128xf32>
    %cst_15 = arith.constant dense<0xFF800000> : vector<1xf32>
    %43 = vector.multi_reduction <maximumf>, %42, %cst_15 [1] : vector<1x128xf32> to vector<1xf32>
    %44 = vector.shape_cast %43 : vector<1xf32> to vector<1x1xf32>
    %cst_16 = arith.constant -1.000000e+09 : f32
    %45 = vector.broadcast %cst_16 : f32 to vector<1x128xf32>
    %46 = arith.select %40, %26, %45 : vector<1x128xi1>, vector<1x128xf32>
    %cst_17 = arith.constant dense<0xFF800000> : vector<1xf32>
    %47 = vector.multi_reduction <maximumf>, %46, %cst_17 [1] : vector<1x128xf32> to vector<1xf32>
    %48 = vector.shape_cast %47 : vector<1xf32> to vector<1x1xf32>
    %cst_18 = arith.constant 0.000000e+00 : f32
    %49 = vector.broadcast %cst_18 : f32 to vector<1x128xf32>
    %50 = vector.extract_strided_slice %21 {offsets = [0, 0], sizes = [128, 1], strides = [1, 1]} : vector<128x8xf32> to vector<128x1xf32>
    %51 = vector.extract_strided_slice %22 {offsets = [0, 0], sizes = [128, 1], strides = [1, 1]} : vector<128x8xf32> to vector<128x1xf32>
    %52 = vector.broadcast %48 : vector<1x1xf32> to vector<128x1xf32>
    %53 = arith.cmpf ole, %50, %52 : vector<128x1xf32>
    %54 = vector.broadcast %44 : vector<1x1xf32> to vector<128x1xf32>
    %55 = arith.subf %51, %54 : vector<128x1xf32>
    %cst_19 = arith.constant 0.000000e+00 : f32
    %56 = vector.broadcast %cst_19 : f32 to vector<128x1xf32>
    %57 = arith.minimumf %55, %56 : vector<128x1xf32>
    %58 = math.exp %57 : vector<128x1xf32>
    %cst_20 = arith.constant 0.000000e+00 : f32
    %59 = vector.broadcast %cst_20 : f32 to vector<128x1xf32>
    %60 = arith.select %53, %58, %59 : vector<128x1xi1>, vector<128x1xf32>
    %61 = vector.broadcast %50 : vector<128x1xf32> to vector<128x128xf32>
    %62 = vector.broadcast %26 : vector<1x128xf32> to vector<128x128xf32>
    %63 = arith.cmpf oge, %61, %62 : vector<128x128xf32>
    %cst_21 = arith.constant 0.000000e+00 : f32
    %64 = vector.shape_cast %60 : vector<128x1xf32> to vector<128x1xf32>
    %65 = vector.broadcast %64 : vector<128x1xf32> to vector<128x128xf32>
    %66 = vector.broadcast %cst_21 : f32 to vector<128x128xf32>
    %67 = arith.select %63, %65, %66 : vector<128x128xi1>, vector<128x128xf32>
    %cst_22 = arith.constant dense<0.000000e+00> : vector<128xf32>
    %68 = vector.multi_reduction <add>, %67, %cst_22 [0] : vector<128x128xf32> to vector<128xf32>
    %69 = vector.shape_cast %68 : vector<128xf32> to vector<1x128xf32>
    %70 = arith.addf %49, %69 : vector<1x128xf32>
    %cst_23 = arith.constant 1.000000e-30 : f32
    %71 = vector.broadcast %cst_23 : f32 to vector<1x128xf32>
    %72 = arith.maximumf %70, %71 : vector<1x128xf32>
    %73 = math.log %72 : vector<1x128xf32>
    %74 = vector.broadcast %44 : vector<1x1xf32> to vector<1x128xf32>
    %75 = arith.addf %74, %73 : vector<1x128xf32>
    %cst_24 = arith.constant 1.000000e+00 : f32
    %76 = vector.broadcast %cst_24 : f32 to vector<1x1xf32>
    %77 = arith.subf %28, %76 : vector<1x1xf32>
    %78 = vector.broadcast %77 : vector<1x1xf32> to vector<1x128xf32>
    %79 = arith.cmpf olt, %38, %78 : vector<1x128xf32>
    %cst_25 = arith.constant -0.223143548 : f32
    %80 = vector.broadcast %cst_25 : f32 to vector<1x128xf32>
    %81 = arith.mulf %38, %80 : vector<1x128xf32>
    %82 = math.exp %81 : vector<1x128xf32>
    %83 = arith.subf %27, %75 : vector<1x128xf32>
    %84 = arith.mulf %82, %83 : vector<1x128xf32>
    %cst_26 = arith.constant 0.000000e+00 : f32
    %85 = vector.broadcast %cst_26 : f32 to vector<1x128xf32>
    %86 = arith.select %79, %84, %85 : vector<1x128xi1>, vector<1x128xf32>
    %cst_27 = arith.constant dense<0.000000e+00> : vector<1xf32>
    %87 = vector.multi_reduction <add>, %86, %cst_27 [1] : vector<1x128xf32> to vector<1xf32>
    %88 = vector.shape_cast %87 : vector<1xf32> to vector<1x1xf32>
    %cst_28 = arith.constant 0.000000e+00 : f32
    %89 = vector.broadcast %cst_28 : f32 to vector<1x1xf32>
    %90 = arith.subf %89, %88 : vector<1x1xf32>
    %91 = vector.extract_strided_slice %20 {offsets = [0, 0], sizes = [1, 1], strides = [1, 1]} : vector<8x1xf32> to vector<1x1xf32>
    %cst_29 = arith.constant 2.000000e+00 : f32
    %92 = vector.broadcast %cst_29 : f32 to vector<1x1xf32>
    %93 = arith.cmpf oge, %91, %92 : vector<1x1xf32>
    %94 = arith.extui %93 : vector<1x1xi1> to vector<1x1xi32>
    %95 = arith.sitofp %94 : vector<1x1xi32> to vector<1x1xf32>
    %c0_i32 = arith.constant 0 : i32
    %96 = vector.broadcast %c0_i32 : i32 to vector<1x128xi32>
    %97 = arith.cmpi eq, %23, %96 : vector<1x128xi32>
    %98 = vector.shape_cast %90 : vector<1x1xf32> to vector<1x1xf32>
    %99 = vector.broadcast %98 : vector<1x1xf32> to vector<1x128xf32>
    %100 = arith.select %97, %99, %24 : vector<1x128xi1>, vector<1x128xf32>
    %101 = vector.shape_cast %95 : vector<1x1xf32> to vector<1x1xf32>
    %102 = vector.broadcast %101 : vector<1x1xf32> to vector<1x128xf32>
    %103 = arith.select %97, %102, %25 : vector<1x128xi1>, vector<1x128xf32>
    %104 = vector.extract_strided_slice %16 {offsets = [1, 0], sizes = [1, 128], strides = [1, 1]} : vector<8x128xf32> to vector<1x128xf32>
    %105 = vector.extract_strided_slice %2 {offsets = [1, 0], sizes = [1, 128], strides = [1, 1]} : vector<8x128xf32> to vector<1x128xf32>
    %106 = vector.extract_strided_slice %20 {offsets = [1, 0], sizes = [1, 1], strides = [1, 1]} : vector<8x1xf32> to vector<1x1xf32>
    %cst_30 = arith.constant 0.000000e+00 : f32
    %107 = vector.broadcast %cst_30 : f32 to vector<1x128xf32>
    %108 = vector.extract_strided_slice %21 {offsets = [0, 1], sizes = [128, 1], strides = [1, 1]} : vector<128x8xf32> to vector<128x1xf32>
    %109 = vector.broadcast %108 : vector<128x1xf32> to vector<128x128xf32>
    %110 = vector.broadcast %104 : vector<1x128xf32> to vector<128x128xf32>
    %111 = arith.cmpf olt, %109, %110 : vector<128x128xf32>
    %112 = arith.extui %111 : vector<128x128xi1> to vector<128x128xi32>
    %113 = arith.sitofp %112 : vector<128x128xi32> to vector<128x128xf32>
    %cst_31 = arith.constant dense<0.000000e+00> : vector<128xf32>
    %114 = vector.multi_reduction <add>, %113, %cst_31 [0] : vector<128x128xf32> to vector<128xf32>
    %115 = vector.shape_cast %114 : vector<128xf32> to vector<1x128xf32>
    %116 = arith.addf %107, %115 : vector<1x128xf32>
    %117 = vector.broadcast %106 : vector<1x1xf32> to vector<1x128xf32>
    %118 = arith.cmpf olt, %116, %117 : vector<1x128xf32>
    %cst_32 = arith.constant -1.000000e+30 : f32
    %119 = vector.broadcast %cst_32 : f32 to vector<1x128xf32>
    %120 = arith.select %118, %105, %119 : vector<1x128xi1>, vector<1x128xf32>
    %cst_33 = arith.constant dense<0xFF800000> : vector<1xf32>
    %121 = vector.multi_reduction <maximumf>, %120, %cst_33 [1] : vector<1x128xf32> to vector<1xf32>
    %122 = vector.shape_cast %121 : vector<1xf32> to vector<1x1xf32>
    %cst_34 = arith.constant -1.000000e+09 : f32
    %123 = vector.broadcast %cst_34 : f32 to vector<1x128xf32>
    %124 = arith.select %118, %104, %123 : vector<1x128xi1>, vector<1x128xf32>
    %cst_35 = arith.constant dense<0xFF800000> : vector<1xf32>
    %125 = vector.multi_reduction <maximumf>, %124, %cst_35 [1] : vector<1x128xf32> to vector<1xf32>
    %126 = vector.shape_cast %125 : vector<1xf32> to vector<1x1xf32>
    %cst_36 = arith.constant 0.000000e+00 : f32
    %127 = vector.broadcast %cst_36 : f32 to vector<1x128xf32>
    %128 = vector.extract_strided_slice %21 {offsets = [0, 1], sizes = [128, 1], strides = [1, 1]} : vector<128x8xf32> to vector<128x1xf32>
    %129 = vector.extract_strided_slice %22 {offsets = [0, 1], sizes = [128, 1], strides = [1, 1]} : vector<128x8xf32> to vector<128x1xf32>
    %130 = vector.broadcast %126 : vector<1x1xf32> to vector<128x1xf32>
    %131 = arith.cmpf ole, %128, %130 : vector<128x1xf32>
    %132 = vector.broadcast %122 : vector<1x1xf32> to vector<128x1xf32>
    %133 = arith.subf %129, %132 : vector<128x1xf32>
    %cst_37 = arith.constant 0.000000e+00 : f32
    %134 = vector.broadcast %cst_37 : f32 to vector<128x1xf32>
    %135 = arith.minimumf %133, %134 : vector<128x1xf32>
    %136 = math.exp %135 : vector<128x1xf32>
    %cst_38 = arith.constant 0.000000e+00 : f32
    %137 = vector.broadcast %cst_38 : f32 to vector<128x1xf32>
    %138 = arith.select %131, %136, %137 : vector<128x1xi1>, vector<128x1xf32>
    %139 = vector.broadcast %128 : vector<128x1xf32> to vector<128x128xf32>
    %140 = vector.broadcast %104 : vector<1x128xf32> to vector<128x128xf32>
    %141 = arith.cmpf oge, %139, %140 : vector<128x128xf32>
    %cst_39 = arith.constant 0.000000e+00 : f32
    %142 = vector.shape_cast %138 : vector<128x1xf32> to vector<128x1xf32>
    %143 = vector.broadcast %142 : vector<128x1xf32> to vector<128x128xf32>
    %144 = vector.broadcast %cst_39 : f32 to vector<128x128xf32>
    %145 = arith.select %141, %143, %144 : vector<128x128xi1>, vector<128x128xf32>
    %cst_40 = arith.constant dense<0.000000e+00> : vector<128xf32>
    %146 = vector.multi_reduction <add>, %145, %cst_40 [0] : vector<128x128xf32> to vector<128xf32>
    %147 = vector.shape_cast %146 : vector<128xf32> to vector<1x128xf32>
    %148 = arith.addf %127, %147 : vector<1x128xf32>
    %cst_41 = arith.constant 1.000000e-30 : f32
    %149 = vector.broadcast %cst_41 : f32 to vector<1x128xf32>
    %150 = arith.maximumf %148, %149 : vector<1x128xf32>
    %151 = math.log %150 : vector<1x128xf32>
    %152 = vector.broadcast %122 : vector<1x1xf32> to vector<1x128xf32>
    %153 = arith.addf %152, %151 : vector<1x128xf32>
    %cst_42 = arith.constant 1.000000e+00 : f32
    %154 = vector.broadcast %cst_42 : f32 to vector<1x1xf32>
    %155 = arith.subf %106, %154 : vector<1x1xf32>
    %156 = vector.broadcast %155 : vector<1x1xf32> to vector<1x128xf32>
    %157 = arith.cmpf olt, %116, %156 : vector<1x128xf32>
    %cst_43 = arith.constant -0.223143548 : f32
    %158 = vector.broadcast %cst_43 : f32 to vector<1x128xf32>
    %159 = arith.mulf %116, %158 : vector<1x128xf32>
    %160 = math.exp %159 : vector<1x128xf32>
    %161 = arith.subf %105, %153 : vector<1x128xf32>
    %162 = arith.mulf %160, %161 : vector<1x128xf32>
    %cst_44 = arith.constant 0.000000e+00 : f32
    %163 = vector.broadcast %cst_44 : f32 to vector<1x128xf32>
    %164 = arith.select %157, %162, %163 : vector<1x128xi1>, vector<1x128xf32>
    %cst_45 = arith.constant dense<0.000000e+00> : vector<1xf32>
    %165 = vector.multi_reduction <add>, %164, %cst_45 [1] : vector<1x128xf32> to vector<1xf32>
    %166 = vector.shape_cast %165 : vector<1xf32> to vector<1x1xf32>
    %cst_46 = arith.constant 0.000000e+00 : f32
    %167 = vector.broadcast %cst_46 : f32 to vector<1x1xf32>
    %168 = arith.subf %167, %166 : vector<1x1xf32>
    %169 = vector.extract_strided_slice %20 {offsets = [1, 0], sizes = [1, 1], strides = [1, 1]} : vector<8x1xf32> to vector<1x1xf32>
    %cst_47 = arith.constant 2.000000e+00 : f32
    %170 = vector.broadcast %cst_47 : f32 to vector<1x1xf32>
    %171 = arith.cmpf oge, %169, %170 : vector<1x1xf32>
    %172 = arith.extui %171 : vector<1x1xi1> to vector<1x1xi32>
    %173 = arith.sitofp %172 : vector<1x1xi32> to vector<1x1xf32>
    %c1_i32 = arith.constant 1 : i32
    %174 = vector.broadcast %c1_i32 : i32 to vector<1x128xi32>
    %175 = arith.cmpi eq, %23, %174 : vector<1x128xi32>
    %176 = vector.shape_cast %168 : vector<1x1xf32> to vector<1x1xf32>
    %177 = vector.broadcast %176 : vector<1x1xf32> to vector<1x128xf32>
    %178 = arith.select %175, %177, %100 : vector<1x128xi1>, vector<1x128xf32>
    %179 = vector.shape_cast %173 : vector<1x1xf32> to vector<1x1xf32>
    %180 = vector.broadcast %179 : vector<1x1xf32> to vector<1x128xf32>
    %181 = arith.select %175, %180, %103 : vector<1x128xi1>, vector<1x128xf32>
    %182 = vector.extract_strided_slice %16 {offsets = [2, 0], sizes = [1, 128], strides = [1, 1]} : vector<8x128xf32> to vector<1x128xf32>
    %183 = vector.extract_strided_slice %2 {offsets = [2, 0], sizes = [1, 128], strides = [1, 1]} : vector<8x128xf32> to vector<1x128xf32>
    %184 = vector.extract_strided_slice %20 {offsets = [2, 0], sizes = [1, 1], strides = [1, 1]} : vector<8x1xf32> to vector<1x1xf32>
    %cst_48 = arith.constant 0.000000e+00 : f32
    %185 = vector.broadcast %cst_48 : f32 to vector<1x128xf32>
    %186 = vector.extract_strided_slice %21 {offsets = [0, 2], sizes = [128, 1], strides = [1, 1]} : vector<128x8xf32> to vector<128x1xf32>
    %187 = vector.broadcast %186 : vector<128x1xf32> to vector<128x128xf32>
    %188 = vector.broadcast %182 : vector<1x128xf32> to vector<128x128xf32>
    %189 = arith.cmpf olt, %187, %188 : vector<128x128xf32>
    %190 = arith.extui %189 : vector<128x128xi1> to vector<128x128xi32>
    %191 = arith.sitofp %190 : vector<128x128xi32> to vector<128x128xf32>
    %cst_49 = arith.constant dense<0.000000e+00> : vector<128xf32>
    %192 = vector.multi_reduction <add>, %191, %cst_49 [0] : vector<128x128xf32> to vector<128xf32>
    %193 = vector.shape_cast %192 : vector<128xf32> to vector<1x128xf32>
    %194 = arith.addf %185, %193 : vector<1x128xf32>
    %195 = vector.broadcast %184 : vector<1x1xf32> to vector<1x128xf32>
    %196 = arith.cmpf olt, %194, %195 : vector<1x128xf32>
    %cst_50 = arith.constant -1.000000e+30 : f32
    %197 = vector.broadcast %cst_50 : f32 to vector<1x128xf32>
    %198 = arith.select %196, %183, %197 : vector<1x128xi1>, vector<1x128xf32>
    %cst_51 = arith.constant dense<0xFF800000> : vector<1xf32>
    %199 = vector.multi_reduction <maximumf>, %198, %cst_51 [1] : vector<1x128xf32> to vector<1xf32>
    %200 = vector.shape_cast %199 : vector<1xf32> to vector<1x1xf32>
    %cst_52 = arith.constant -1.000000e+09 : f32
    %201 = vector.broadcast %cst_52 : f32 to vector<1x128xf32>
    %202 = arith.select %196, %182, %201 : vector<1x128xi1>, vector<1x128xf32>
    %cst_53 = arith.constant dense<0xFF800000> : vector<1xf32>
    %203 = vector.multi_reduction <maximumf>, %202, %cst_53 [1] : vector<1x128xf32> to vector<1xf32>
    %204 = vector.shape_cast %203 : vector<1xf32> to vector<1x1xf32>
    %cst_54 = arith.constant 0.000000e+00 : f32
    %205 = vector.broadcast %cst_54 : f32 to vector<1x128xf32>
    %206 = vector.extract_strided_slice %21 {offsets = [0, 2], sizes = [128, 1], strides = [1, 1]} : vector<128x8xf32> to vector<128x1xf32>
    %207 = vector.extract_strided_slice %22 {offsets = [0, 2], sizes = [128, 1], strides = [1, 1]} : vector<128x8xf32> to vector<128x1xf32>
    %208 = vector.broadcast %204 : vector<1x1xf32> to vector<128x1xf32>
    %209 = arith.cmpf ole, %206, %208 : vector<128x1xf32>
    %210 = vector.broadcast %200 : vector<1x1xf32> to vector<128x1xf32>
    %211 = arith.subf %207, %210 : vector<128x1xf32>
    %cst_55 = arith.constant 0.000000e+00 : f32
    %212 = vector.broadcast %cst_55 : f32 to vector<128x1xf32>
    %213 = arith.minimumf %211, %212 : vector<128x1xf32>
    %214 = math.exp %213 : vector<128x1xf32>
    %cst_56 = arith.constant 0.000000e+00 : f32
    %215 = vector.broadcast %cst_56 : f32 to vector<128x1xf32>
    %216 = arith.select %209, %214, %215 : vector<128x1xi1>, vector<128x1xf32>
    %217 = vector.broadcast %206 : vector<128x1xf32> to vector<128x128xf32>
    %218 = vector.broadcast %182 : vector<1x128xf32> to vector<128x128xf32>
    %219 = arith.cmpf oge, %217, %218 : vector<128x128xf32>
    %cst_57 = arith.constant 0.000000e+00 : f32
    %220 = vector.shape_cast %216 : vector<128x1xf32> to vector<128x1xf32>
    %221 = vector.broadcast %220 : vector<128x1xf32> to vector<128x128xf32>
    %222 = vector.broadcast %cst_57 : f32 to vector<128x128xf32>
    %223 = arith.select %219, %221, %222 : vector<128x128xi1>, vector<128x128xf32>
    %cst_58 = arith.constant dense<0.000000e+00> : vector<128xf32>
    %224 = vector.multi_reduction <add>, %223, %cst_58 [0] : vector<128x128xf32> to vector<128xf32>
    %225 = vector.shape_cast %224 : vector<128xf32> to vector<1x128xf32>
    %226 = arith.addf %205, %225 : vector<1x128xf32>
    %cst_59 = arith.constant 1.000000e-30 : f32
    %227 = vector.broadcast %cst_59 : f32 to vector<1x128xf32>
    %228 = arith.maximumf %226, %227 : vector<1x128xf32>
    %229 = math.log %228 : vector<1x128xf32>
    %230 = vector.broadcast %200 : vector<1x1xf32> to vector<1x128xf32>
    %231 = arith.addf %230, %229 : vector<1x128xf32>
    %cst_60 = arith.constant 1.000000e+00 : f32
    %232 = vector.broadcast %cst_60 : f32 to vector<1x1xf32>
    %233 = arith.subf %184, %232 : vector<1x1xf32>
    %234 = vector.broadcast %233 : vector<1x1xf32> to vector<1x128xf32>
    %235 = arith.cmpf olt, %194, %234 : vector<1x128xf32>
    %cst_61 = arith.constant -0.223143548 : f32
    %236 = vector.broadcast %cst_61 : f32 to vector<1x128xf32>
    %237 = arith.mulf %194, %236 : vector<1x128xf32>
    %238 = math.exp %237 : vector<1x128xf32>
    %239 = arith.subf %183, %231 : vector<1x128xf32>
    %240 = arith.mulf %238, %239 : vector<1x128xf32>
    %cst_62 = arith.constant 0.000000e+00 : f32
    %241 = vector.broadcast %cst_62 : f32 to vector<1x128xf32>
    %242 = arith.select %235, %240, %241 : vector<1x128xi1>, vector<1x128xf32>
    %cst_63 = arith.constant dense<0.000000e+00> : vector<1xf32>
    %243 = vector.multi_reduction <add>, %242, %cst_63 [1] : vector<1x128xf32> to vector<1xf32>
    %244 = vector.shape_cast %243 : vector<1xf32> to vector<1x1xf32>
    %cst_64 = arith.constant 0.000000e+00 : f32
    %245 = vector.broadcast %cst_64 : f32 to vector<1x1xf32>
    %246 = arith.subf %245, %244 : vector<1x1xf32>
    %247 = vector.extract_strided_slice %20 {offsets = [2, 0], sizes = [1, 1], strides = [1, 1]} : vector<8x1xf32> to vector<1x1xf32>
    %cst_65 = arith.constant 2.000000e+00 : f32
    %248 = vector.broadcast %cst_65 : f32 to vector<1x1xf32>
    %249 = arith.cmpf oge, %247, %248 : vector<1x1xf32>
    %250 = arith.extui %249 : vector<1x1xi1> to vector<1x1xi32>
    %251 = arith.sitofp %250 : vector<1x1xi32> to vector<1x1xf32>
    %c2_i32 = arith.constant 2 : i32
    %252 = vector.broadcast %c2_i32 : i32 to vector<1x128xi32>
    %253 = arith.cmpi eq, %23, %252 : vector<1x128xi32>
    %254 = vector.shape_cast %246 : vector<1x1xf32> to vector<1x1xf32>
    %255 = vector.broadcast %254 : vector<1x1xf32> to vector<1x128xf32>
    %256 = arith.select %253, %255, %178 : vector<1x128xi1>, vector<1x128xf32>
    %257 = vector.shape_cast %251 : vector<1x1xf32> to vector<1x1xf32>
    %258 = vector.broadcast %257 : vector<1x1xf32> to vector<1x128xf32>
    %259 = arith.select %253, %258, %181 : vector<1x128xi1>, vector<1x128xf32>
    %260 = vector.extract_strided_slice %16 {offsets = [3, 0], sizes = [1, 128], strides = [1, 1]} : vector<8x128xf32> to vector<1x128xf32>
    %261 = vector.extract_strided_slice %2 {offsets = [3, 0], sizes = [1, 128], strides = [1, 1]} : vector<8x128xf32> to vector<1x128xf32>
    %262 = vector.extract_strided_slice %20 {offsets = [3, 0], sizes = [1, 1], strides = [1, 1]} : vector<8x1xf32> to vector<1x1xf32>
    %cst_66 = arith.constant 0.000000e+00 : f32
    %263 = vector.broadcast %cst_66 : f32 to vector<1x128xf32>
    %264 = vector.extract_strided_slice %21 {offsets = [0, 3], sizes = [128, 1], strides = [1, 1]} : vector<128x8xf32> to vector<128x1xf32>
    %265 = vector.broadcast %264 : vector<128x1xf32> to vector<128x128xf32>
    %266 = vector.broadcast %260 : vector<1x128xf32> to vector<128x128xf32>
    %267 = arith.cmpf olt, %265, %266 : vector<128x128xf32>
    %268 = arith.extui %267 : vector<128x128xi1> to vector<128x128xi32>
    %269 = arith.sitofp %268 : vector<128x128xi32> to vector<128x128xf32>
    %cst_67 = arith.constant dense<0.000000e+00> : vector<128xf32>
    %270 = vector.multi_reduction <add>, %269, %cst_67 [0] : vector<128x128xf32> to vector<128xf32>
    %271 = vector.shape_cast %270 : vector<128xf32> to vector<1x128xf32>
    %272 = arith.addf %263, %271 : vector<1x128xf32>
    %273 = vector.broadcast %262 : vector<1x1xf32> to vector<1x128xf32>
    %274 = arith.cmpf olt, %272, %273 : vector<1x128xf32>
    %cst_68 = arith.constant -1.000000e+30 : f32
    %275 = vector.broadcast %cst_68 : f32 to vector<1x128xf32>
    %276 = arith.select %274, %261, %275 : vector<1x128xi1>, vector<1x128xf32>
    %cst_69 = arith.constant dense<0xFF800000> : vector<1xf32>
    %277 = vector.multi_reduction <maximumf>, %276, %cst_69 [1] : vector<1x128xf32> to vector<1xf32>
    %278 = vector.shape_cast %277 : vector<1xf32> to vector<1x1xf32>
    %cst_70 = arith.constant -1.000000e+09 : f32
    %279 = vector.broadcast %cst_70 : f32 to vector<1x128xf32>
    %280 = arith.select %274, %260, %279 : vector<1x128xi1>, vector<1x128xf32>
    %cst_71 = arith.constant dense<0xFF800000> : vector<1xf32>
    %281 = vector.multi_reduction <maximumf>, %280, %cst_71 [1] : vector<1x128xf32> to vector<1xf32>
    %282 = vector.shape_cast %281 : vector<1xf32> to vector<1x1xf32>
    %cst_72 = arith.constant 0.000000e+00 : f32
    %283 = vector.broadcast %cst_72 : f32 to vector<1x128xf32>
    %284 = vector.extract_strided_slice %21 {offsets = [0, 3], sizes = [128, 1], strides = [1, 1]} : vector<128x8xf32> to vector<128x1xf32>
    %285 = vector.extract_strided_slice %22 {offsets = [0, 3], sizes = [128, 1], strides = [1, 1]} : vector<128x8xf32> to vector<128x1xf32>
    %286 = vector.broadcast %282 : vector<1x1xf32> to vector<128x1xf32>
    %287 = arith.cmpf ole, %284, %286 : vector<128x1xf32>
    %288 = vector.broadcast %278 : vector<1x1xf32> to vector<128x1xf32>
    %289 = arith.subf %285, %288 : vector<128x1xf32>
    %cst_73 = arith.constant 0.000000e+00 : f32
    %290 = vector.broadcast %cst_73 : f32 to vector<128x1xf32>
    %291 = arith.minimumf %289, %290 : vector<128x1xf32>
    %292 = math.exp %291 : vector<128x1xf32>
    %cst_74 = arith.constant 0.000000e+00 : f32
    %293 = vector.broadcast %cst_74 : f32 to vector<128x1xf32>
    %294 = arith.select %287, %292, %293 : vector<128x1xi1>, vector<128x1xf32>
    %295 = vector.broadcast %284 : vector<128x1xf32> to vector<128x128xf32>
    %296 = vector.broadcast %260 : vector<1x128xf32> to vector<128x128xf32>
    %297 = arith.cmpf oge, %295, %296 : vector<128x128xf32>
    %cst_75 = arith.constant 0.000000e+00 : f32
    %298 = vector.shape_cast %294 : vector<128x1xf32> to vector<128x1xf32>
    %299 = vector.broadcast %298 : vector<128x1xf32> to vector<128x128xf32>
    %300 = vector.broadcast %cst_75 : f32 to vector<128x128xf32>
    %301 = arith.select %297, %299, %300 : vector<128x128xi1>, vector<128x128xf32>
    %cst_76 = arith.constant dense<0.000000e+00> : vector<128xf32>
    %302 = vector.multi_reduction <add>, %301, %cst_76 [0] : vector<128x128xf32> to vector<128xf32>
    %303 = vector.shape_cast %302 : vector<128xf32> to vector<1x128xf32>
    %304 = arith.addf %283, %303 : vector<1x128xf32>
    %cst_77 = arith.constant 1.000000e-30 : f32
    %305 = vector.broadcast %cst_77 : f32 to vector<1x128xf32>
    %306 = arith.maximumf %304, %305 : vector<1x128xf32>
    %307 = math.log %306 : vector<1x128xf32>
    %308 = vector.broadcast %278 : vector<1x1xf32> to vector<1x128xf32>
    %309 = arith.addf %308, %307 : vector<1x128xf32>
    %cst_78 = arith.constant 1.000000e+00 : f32
    %310 = vector.broadcast %cst_78 : f32 to vector<1x1xf32>
    %311 = arith.subf %262, %310 : vector<1x1xf32>
    %312 = vector.broadcast %311 : vector<1x1xf32> to vector<1x128xf32>
    %313 = arith.cmpf olt, %272, %312 : vector<1x128xf32>
    %cst_79 = arith.constant -0.223143548 : f32
    %314 = vector.broadcast %cst_79 : f32 to vector<1x128xf32>
    %315 = arith.mulf %272, %314 : vector<1x128xf32>
    %316 = math.exp %315 : vector<1x128xf32>
    %317 = arith.subf %261, %309 : vector<1x128xf32>
    %318 = arith.mulf %316, %317 : vector<1x128xf32>
    %cst_80 = arith.constant 0.000000e+00 : f32
    %319 = vector.broadcast %cst_80 : f32 to vector<1x128xf32>
    %320 = arith.select %313, %318, %319 : vector<1x128xi1>, vector<1x128xf32>
    %cst_81 = arith.constant dense<0.000000e+00> : vector<1xf32>
    %321 = vector.multi_reduction <add>, %320, %cst_81 [1] : vector<1x128xf32> to vector<1xf32>
    %322 = vector.shape_cast %321 : vector<1xf32> to vector<1x1xf32>
    %cst_82 = arith.constant 0.000000e+00 : f32
    %323 = vector.broadcast %cst_82 : f32 to vector<1x1xf32>
    %324 = arith.subf %323, %322 : vector<1x1xf32>
    %325 = vector.extract_strided_slice %20 {offsets = [3, 0], sizes = [1, 1], strides = [1, 1]} : vector<8x1xf32> to vector<1x1xf32>
    %cst_83 = arith.constant 2.000000e+00 : f32
    %326 = vector.broadcast %cst_83 : f32 to vector<1x1xf32>
    %327 = arith.cmpf oge, %325, %326 : vector<1x1xf32>
    %328 = arith.extui %327 : vector<1x1xi1> to vector<1x1xi32>
    %329 = arith.sitofp %328 : vector<1x1xi32> to vector<1x1xf32>
    %c3_i32 = arith.constant 3 : i32
    %330 = vector.broadcast %c3_i32 : i32 to vector<1x128xi32>
    %331 = arith.cmpi eq, %23, %330 : vector<1x128xi32>
    %332 = vector.shape_cast %324 : vector<1x1xf32> to vector<1x1xf32>
    %333 = vector.broadcast %332 : vector<1x1xf32> to vector<1x128xf32>
    %334 = arith.select %331, %333, %256 : vector<1x128xi1>, vector<1x128xf32>
    %335 = vector.shape_cast %329 : vector<1x1xf32> to vector<1x1xf32>
    %336 = vector.broadcast %335 : vector<1x1xf32> to vector<1x128xf32>
    %337 = arith.select %331, %336, %259 : vector<1x128xi1>, vector<1x128xf32>
    %338 = vector.extract_strided_slice %16 {offsets = [4, 0], sizes = [1, 128], strides = [1, 1]} : vector<8x128xf32> to vector<1x128xf32>
    %339 = vector.extract_strided_slice %2 {offsets = [4, 0], sizes = [1, 128], strides = [1, 1]} : vector<8x128xf32> to vector<1x128xf32>
    %340 = vector.extract_strided_slice %20 {offsets = [4, 0], sizes = [1, 1], strides = [1, 1]} : vector<8x1xf32> to vector<1x1xf32>
    %cst_84 = arith.constant 0.000000e+00 : f32
    %341 = vector.broadcast %cst_84 : f32 to vector<1x128xf32>
    %342 = vector.extract_strided_slice %21 {offsets = [0, 4], sizes = [128, 1], strides = [1, 1]} : vector<128x8xf32> to vector<128x1xf32>
    %343 = vector.broadcast %342 : vector<128x1xf32> to vector<128x128xf32>
    %344 = vector.broadcast %338 : vector<1x128xf32> to vector<128x128xf32>
    %345 = arith.cmpf olt, %343, %344 : vector<128x128xf32>
    %346 = arith.extui %345 : vector<128x128xi1> to vector<128x128xi32>
    %347 = arith.sitofp %346 : vector<128x128xi32> to vector<128x128xf32>
    %cst_85 = arith.constant dense<0.000000e+00> : vector<128xf32>
    %348 = vector.multi_reduction <add>, %347, %cst_85 [0] : vector<128x128xf32> to vector<128xf32>
    %349 = vector.shape_cast %348 : vector<128xf32> to vector<1x128xf32>
    %350 = arith.addf %341, %349 : vector<1x128xf32>
    %351 = vector.broadcast %340 : vector<1x1xf32> to vector<1x128xf32>
    %352 = arith.cmpf olt, %350, %351 : vector<1x128xf32>
    %cst_86 = arith.constant -1.000000e+30 : f32
    %353 = vector.broadcast %cst_86 : f32 to vector<1x128xf32>
    %354 = arith.select %352, %339, %353 : vector<1x128xi1>, vector<1x128xf32>
    %cst_87 = arith.constant dense<0xFF800000> : vector<1xf32>
    %355 = vector.multi_reduction <maximumf>, %354, %cst_87 [1] : vector<1x128xf32> to vector<1xf32>
    %356 = vector.shape_cast %355 : vector<1xf32> to vector<1x1xf32>
    %cst_88 = arith.constant -1.000000e+09 : f32
    %357 = vector.broadcast %cst_88 : f32 to vector<1x128xf32>
    %358 = arith.select %352, %338, %357 : vector<1x128xi1>, vector<1x128xf32>
    %cst_89 = arith.constant dense<0xFF800000> : vector<1xf32>
    %359 = vector.multi_reduction <maximumf>, %358, %cst_89 [1] : vector<1x128xf32> to vector<1xf32>
    %360 = vector.shape_cast %359 : vector<1xf32> to vector<1x1xf32>
    %cst_90 = arith.constant 0.000000e+00 : f32
    %361 = vector.broadcast %cst_90 : f32 to vector<1x128xf32>
    %362 = vector.extract_strided_slice %21 {offsets = [0, 4], sizes = [128, 1], strides = [1, 1]} : vector<128x8xf32> to vector<128x1xf32>
    %363 = vector.extract_strided_slice %22 {offsets = [0, 4], sizes = [128, 1], strides = [1, 1]} : vector<128x8xf32> to vector<128x1xf32>
    %364 = vector.broadcast %360 : vector<1x1xf32> to vector<128x1xf32>
    %365 = arith.cmpf ole, %362, %364 : vector<128x1xf32>
    %366 = vector.broadcast %356 : vector<1x1xf32> to vector<128x1xf32>
    %367 = arith.subf %363, %366 : vector<128x1xf32>
    %cst_91 = arith.constant 0.000000e+00 : f32
    %368 = vector.broadcast %cst_91 : f32 to vector<128x1xf32>
    %369 = arith.minimumf %367, %368 : vector<128x1xf32>
    %370 = math.exp %369 : vector<128x1xf32>
    %cst_92 = arith.constant 0.000000e+00 : f32
    %371 = vector.broadcast %cst_92 : f32 to vector<128x1xf32>
    %372 = arith.select %365, %370, %371 : vector<128x1xi1>, vector<128x1xf32>
    %373 = vector.broadcast %362 : vector<128x1xf32> to vector<128x128xf32>
    %374 = vector.broadcast %338 : vector<1x128xf32> to vector<128x128xf32>
    %375 = arith.cmpf oge, %373, %374 : vector<128x128xf32>
    %cst_93 = arith.constant 0.000000e+00 : f32
    %376 = vector.shape_cast %372 : vector<128x1xf32> to vector<128x1xf32>
    %377 = vector.broadcast %376 : vector<128x1xf32> to vector<128x128xf32>
    %378 = vector.broadcast %cst_93 : f32 to vector<128x128xf32>
    %379 = arith.select %375, %377, %378 : vector<128x128xi1>, vector<128x128xf32>
    %cst_94 = arith.constant dense<0.000000e+00> : vector<128xf32>
    %380 = vector.multi_reduction <add>, %379, %cst_94 [0] : vector<128x128xf32> to vector<128xf32>
    %381 = vector.shape_cast %380 : vector<128xf32> to vector<1x128xf32>
    %382 = arith.addf %361, %381 : vector<1x128xf32>
    %cst_95 = arith.constant 1.000000e-30 : f32
    %383 = vector.broadcast %cst_95 : f32 to vector<1x128xf32>
    %384 = arith.maximumf %382, %383 : vector<1x128xf32>
    %385 = math.log %384 : vector<1x128xf32>
    %386 = vector.broadcast %356 : vector<1x1xf32> to vector<1x128xf32>
    %387 = arith.addf %386, %385 : vector<1x128xf32>
    %cst_96 = arith.constant 1.000000e+00 : f32
    %388 = vector.broadcast %cst_96 : f32 to vector<1x1xf32>
    %389 = arith.subf %340, %388 : vector<1x1xf32>
    %390 = vector.broadcast %389 : vector<1x1xf32> to vector<1x128xf32>
    %391 = arith.cmpf olt, %350, %390 : vector<1x128xf32>
    %cst_97 = arith.constant -0.223143548 : f32
    %392 = vector.broadcast %cst_97 : f32 to vector<1x128xf32>
    %393 = arith.mulf %350, %392 : vector<1x128xf32>
    %394 = math.exp %393 : vector<1x128xf32>
    %395 = arith.subf %339, %387 : vector<1x128xf32>
    %396 = arith.mulf %394, %395 : vector<1x128xf32>
    %cst_98 = arith.constant 0.000000e+00 : f32
    %397 = vector.broadcast %cst_98 : f32 to vector<1x128xf32>
    %398 = arith.select %391, %396, %397 : vector<1x128xi1>, vector<1x128xf32>
    %cst_99 = arith.constant dense<0.000000e+00> : vector<1xf32>
    %399 = vector.multi_reduction <add>, %398, %cst_99 [1] : vector<1x128xf32> to vector<1xf32>
    %400 = vector.shape_cast %399 : vector<1xf32> to vector<1x1xf32>
    %cst_100 = arith.constant 0.000000e+00 : f32
    %401 = vector.broadcast %cst_100 : f32 to vector<1x1xf32>
    %402 = arith.subf %401, %400 : vector<1x1xf32>
    %403 = vector.extract_strided_slice %20 {offsets = [4, 0], sizes = [1, 1], strides = [1, 1]} : vector<8x1xf32> to vector<1x1xf32>
    %cst_101 = arith.constant 2.000000e+00 : f32
    %404 = vector.broadcast %cst_101 : f32 to vector<1x1xf32>
    %405 = arith.cmpf oge, %403, %404 : vector<1x1xf32>
    %406 = arith.extui %405 : vector<1x1xi1> to vector<1x1xi32>
    %407 = arith.sitofp %406 : vector<1x1xi32> to vector<1x1xf32>
    %c4_i32 = arith.constant 4 : i32
    %408 = vector.broadcast %c4_i32 : i32 to vector<1x128xi32>
    %409 = arith.cmpi eq, %23, %408 : vector<1x128xi32>
    %410 = vector.shape_cast %402 : vector<1x1xf32> to vector<1x1xf32>
    %411 = vector.broadcast %410 : vector<1x1xf32> to vector<1x128xf32>
    %412 = arith.select %409, %411, %334 : vector<1x128xi1>, vector<1x128xf32>
    %413 = vector.shape_cast %407 : vector<1x1xf32> to vector<1x1xf32>
    %414 = vector.broadcast %413 : vector<1x1xf32> to vector<1x128xf32>
    %415 = arith.select %409, %414, %337 : vector<1x128xi1>, vector<1x128xf32>
    %416 = vector.extract_strided_slice %16 {offsets = [5, 0], sizes = [1, 128], strides = [1, 1]} : vector<8x128xf32> to vector<1x128xf32>
    %417 = vector.extract_strided_slice %2 {offsets = [5, 0], sizes = [1, 128], strides = [1, 1]} : vector<8x128xf32> to vector<1x128xf32>
    %418 = vector.extract_strided_slice %20 {offsets = [5, 0], sizes = [1, 1], strides = [1, 1]} : vector<8x1xf32> to vector<1x1xf32>
    %cst_102 = arith.constant 0.000000e+00 : f32
    %419 = vector.broadcast %cst_102 : f32 to vector<1x128xf32>
    %420 = vector.extract_strided_slice %21 {offsets = [0, 5], sizes = [128, 1], strides = [1, 1]} : vector<128x8xf32> to vector<128x1xf32>
    %421 = vector.broadcast %420 : vector<128x1xf32> to vector<128x128xf32>
    %422 = vector.broadcast %416 : vector<1x128xf32> to vector<128x128xf32>
    %423 = arith.cmpf olt, %421, %422 : vector<128x128xf32>
    %424 = arith.extui %423 : vector<128x128xi1> to vector<128x128xi32>
    %425 = arith.sitofp %424 : vector<128x128xi32> to vector<128x128xf32>
    %cst_103 = arith.constant dense<0.000000e+00> : vector<128xf32>
    %426 = vector.multi_reduction <add>, %425, %cst_103 [0] : vector<128x128xf32> to vector<128xf32>
    %427 = vector.shape_cast %426 : vector<128xf32> to vector<1x128xf32>
    %428 = arith.addf %419, %427 : vector<1x128xf32>
    %429 = vector.broadcast %418 : vector<1x1xf32> to vector<1x128xf32>
    %430 = arith.cmpf olt, %428, %429 : vector<1x128xf32>
    %cst_104 = arith.constant -1.000000e+30 : f32
    %431 = vector.broadcast %cst_104 : f32 to vector<1x128xf32>
    %432 = arith.select %430, %417, %431 : vector<1x128xi1>, vector<1x128xf32>
    %cst_105 = arith.constant dense<0xFF800000> : vector<1xf32>
    %433 = vector.multi_reduction <maximumf>, %432, %cst_105 [1] : vector<1x128xf32> to vector<1xf32>
    %434 = vector.shape_cast %433 : vector<1xf32> to vector<1x1xf32>
    %cst_106 = arith.constant -1.000000e+09 : f32
    %435 = vector.broadcast %cst_106 : f32 to vector<1x128xf32>
    %436 = arith.select %430, %416, %435 : vector<1x128xi1>, vector<1x128xf32>
    %cst_107 = arith.constant dense<0xFF800000> : vector<1xf32>
    %437 = vector.multi_reduction <maximumf>, %436, %cst_107 [1] : vector<1x128xf32> to vector<1xf32>
    %438 = vector.shape_cast %437 : vector<1xf32> to vector<1x1xf32>
    %cst_108 = arith.constant 0.000000e+00 : f32
    %439 = vector.broadcast %cst_108 : f32 to vector<1x128xf32>
    %440 = vector.extract_strided_slice %21 {offsets = [0, 5], sizes = [128, 1], strides = [1, 1]} : vector<128x8xf32> to vector<128x1xf32>
    %441 = vector.extract_strided_slice %22 {offsets = [0, 5], sizes = [128, 1], strides = [1, 1]} : vector<128x8xf32> to vector<128x1xf32>
    %442 = vector.broadcast %438 : vector<1x1xf32> to vector<128x1xf32>
    %443 = arith.cmpf ole, %440, %442 : vector<128x1xf32>
    %444 = vector.broadcast %434 : vector<1x1xf32> to vector<128x1xf32>
    %445 = arith.subf %441, %444 : vector<128x1xf32>
    %cst_109 = arith.constant 0.000000e+00 : f32
    %446 = vector.broadcast %cst_109 : f32 to vector<128x1xf32>
    %447 = arith.minimumf %445, %446 : vector<128x1xf32>
    %448 = math.exp %447 : vector<128x1xf32>
    %cst_110 = arith.constant 0.000000e+00 : f32
    %449 = vector.broadcast %cst_110 : f32 to vector<128x1xf32>
    %450 = arith.select %443, %448, %449 : vector<128x1xi1>, vector<128x1xf32>
    %451 = vector.broadcast %440 : vector<128x1xf32> to vector<128x128xf32>
    %452 = vector.broadcast %416 : vector<1x128xf32> to vector<128x128xf32>
    %453 = arith.cmpf oge, %451, %452 : vector<128x128xf32>
    %cst_111 = arith.constant 0.000000e+00 : f32
    %454 = vector.shape_cast %450 : vector<128x1xf32> to vector<128x1xf32>
    %455 = vector.broadcast %454 : vector<128x1xf32> to vector<128x128xf32>
    %456 = vector.broadcast %cst_111 : f32 to vector<128x128xf32>
    %457 = arith.select %453, %455, %456 : vector<128x128xi1>, vector<128x128xf32>
    %cst_112 = arith.constant dense<0.000000e+00> : vector<128xf32>
    %458 = vector.multi_reduction <add>, %457, %cst_112 [0] : vector<128x128xf32> to vector<128xf32>
    %459 = vector.shape_cast %458 : vector<128xf32> to vector<1x128xf32>
    %460 = arith.addf %439, %459 : vector<1x128xf32>
    %cst_113 = arith.constant 1.000000e-30 : f32
    %461 = vector.broadcast %cst_113 : f32 to vector<1x128xf32>
    %462 = arith.maximumf %460, %461 : vector<1x128xf32>
    %463 = math.log %462 : vector<1x128xf32>
    %464 = vector.broadcast %434 : vector<1x1xf32> to vector<1x128xf32>
    %465 = arith.addf %464, %463 : vector<1x128xf32>
    %cst_114 = arith.constant 1.000000e+00 : f32
    %466 = vector.broadcast %cst_114 : f32 to vector<1x1xf32>
    %467 = arith.subf %418, %466 : vector<1x1xf32>
    %468 = vector.broadcast %467 : vector<1x1xf32> to vector<1x128xf32>
    %469 = arith.cmpf olt, %428, %468 : vector<1x128xf32>
    %cst_115 = arith.constant -0.223143548 : f32
    %470 = vector.broadcast %cst_115 : f32 to vector<1x128xf32>
    %471 = arith.mulf %428, %470 : vector<1x128xf32>
    %472 = math.exp %471 : vector<1x128xf32>
    %473 = arith.subf %417, %465 : vector<1x128xf32>
    %474 = arith.mulf %472, %473 : vector<1x128xf32>
    %cst_116 = arith.constant 0.000000e+00 : f32
    %475 = vector.broadcast %cst_116 : f32 to vector<1x128xf32>
    %476 = arith.select %469, %474, %475 : vector<1x128xi1>, vector<1x128xf32>
    %cst_117 = arith.constant dense<0.000000e+00> : vector<1xf32>
    %477 = vector.multi_reduction <add>, %476, %cst_117 [1] : vector<1x128xf32> to vector<1xf32>
    %478 = vector.shape_cast %477 : vector<1xf32> to vector<1x1xf32>
    %cst_118 = arith.constant 0.000000e+00 : f32
    %479 = vector.broadcast %cst_118 : f32 to vector<1x1xf32>
    %480 = arith.subf %479, %478 : vector<1x1xf32>
    %481 = vector.extract_strided_slice %20 {offsets = [5, 0], sizes = [1, 1], strides = [1, 1]} : vector<8x1xf32> to vector<1x1xf32>
    %cst_119 = arith.constant 2.000000e+00 : f32
    %482 = vector.broadcast %cst_119 : f32 to vector<1x1xf32>
    %483 = arith.cmpf oge, %481, %482 : vector<1x1xf32>
    %484 = arith.extui %483 : vector<1x1xi1> to vector<1x1xi32>
    %485 = arith.sitofp %484 : vector<1x1xi32> to vector<1x1xf32>
    %c5_i32 = arith.constant 5 : i32
    %486 = vector.broadcast %c5_i32 : i32 to vector<1x128xi32>
    %487 = arith.cmpi eq, %23, %486 : vector<1x128xi32>
    %488 = vector.shape_cast %480 : vector<1x1xf32> to vector<1x1xf32>
    %489 = vector.broadcast %488 : vector<1x1xf32> to vector<1x128xf32>
    %490 = arith.select %487, %489, %412 : vector<1x128xi1>, vector<1x128xf32>
    %491 = vector.shape_cast %485 : vector<1x1xf32> to vector<1x1xf32>
    %492 = vector.broadcast %491 : vector<1x1xf32> to vector<1x128xf32>
    %493 = arith.select %487, %492, %415 : vector<1x128xi1>, vector<1x128xf32>
    %494 = vector.extract_strided_slice %16 {offsets = [6, 0], sizes = [1, 128], strides = [1, 1]} : vector<8x128xf32> to vector<1x128xf32>
    %495 = vector.extract_strided_slice %2 {offsets = [6, 0], sizes = [1, 128], strides = [1, 1]} : vector<8x128xf32> to vector<1x128xf32>
    %496 = vector.extract_strided_slice %20 {offsets = [6, 0], sizes = [1, 1], strides = [1, 1]} : vector<8x1xf32> to vector<1x1xf32>
    %cst_120 = arith.constant 0.000000e+00 : f32
    %497 = vector.broadcast %cst_120 : f32 to vector<1x128xf32>
    %498 = vector.extract_strided_slice %21 {offsets = [0, 6], sizes = [128, 1], strides = [1, 1]} : vector<128x8xf32> to vector<128x1xf32>
    %499 = vector.broadcast %498 : vector<128x1xf32> to vector<128x128xf32>
    %500 = vector.broadcast %494 : vector<1x128xf32> to vector<128x128xf32>
    %501 = arith.cmpf olt, %499, %500 : vector<128x128xf32>
    %502 = arith.extui %501 : vector<128x128xi1> to vector<128x128xi32>
    %503 = arith.sitofp %502 : vector<128x128xi32> to vector<128x128xf32>
    %cst_121 = arith.constant dense<0.000000e+00> : vector<128xf32>
    %504 = vector.multi_reduction <add>, %503, %cst_121 [0] : vector<128x128xf32> to vector<128xf32>
    %505 = vector.shape_cast %504 : vector<128xf32> to vector<1x128xf32>
    %506 = arith.addf %497, %505 : vector<1x128xf32>
    %507 = vector.broadcast %496 : vector<1x1xf32> to vector<1x128xf32>
    %508 = arith.cmpf olt, %506, %507 : vector<1x128xf32>
    %cst_122 = arith.constant -1.000000e+30 : f32
    %509 = vector.broadcast %cst_122 : f32 to vector<1x128xf32>
    %510 = arith.select %508, %495, %509 : vector<1x128xi1>, vector<1x128xf32>
    %cst_123 = arith.constant dense<0xFF800000> : vector<1xf32>
    %511 = vector.multi_reduction <maximumf>, %510, %cst_123 [1] : vector<1x128xf32> to vector<1xf32>
    %512 = vector.shape_cast %511 : vector<1xf32> to vector<1x1xf32>
    %cst_124 = arith.constant -1.000000e+09 : f32
    %513 = vector.broadcast %cst_124 : f32 to vector<1x128xf32>
    %514 = arith.select %508, %494, %513 : vector<1x128xi1>, vector<1x128xf32>
    %cst_125 = arith.constant dense<0xFF800000> : vector<1xf32>
    %515 = vector.multi_reduction <maximumf>, %514, %cst_125 [1] : vector<1x128xf32> to vector<1xf32>
    %516 = vector.shape_cast %515 : vector<1xf32> to vector<1x1xf32>
    %cst_126 = arith.constant 0.000000e+00 : f32
    %517 = vector.broadcast %cst_126 : f32 to vector<1x128xf32>
    %518 = vector.extract_strided_slice %21 {offsets = [0, 6], sizes = [128, 1], strides = [1, 1]} : vector<128x8xf32> to vector<128x1xf32>
    %519 = vector.extract_strided_slice %22 {offsets = [0, 6], sizes = [128, 1], strides = [1, 1]} : vector<128x8xf32> to vector<128x1xf32>
    %520 = vector.broadcast %516 : vector<1x1xf32> to vector<128x1xf32>
    %521 = arith.cmpf ole, %518, %520 : vector<128x1xf32>
    %522 = vector.broadcast %512 : vector<1x1xf32> to vector<128x1xf32>
    %523 = arith.subf %519, %522 : vector<128x1xf32>
    %cst_127 = arith.constant 0.000000e+00 : f32
    %524 = vector.broadcast %cst_127 : f32 to vector<128x1xf32>
    %525 = arith.minimumf %523, %524 : vector<128x1xf32>
    %526 = math.exp %525 : vector<128x1xf32>
    %cst_128 = arith.constant 0.000000e+00 : f32
    %527 = vector.broadcast %cst_128 : f32 to vector<128x1xf32>
    %528 = arith.select %521, %526, %527 : vector<128x1xi1>, vector<128x1xf32>
    %529 = vector.broadcast %518 : vector<128x1xf32> to vector<128x128xf32>
    %530 = vector.broadcast %494 : vector<1x128xf32> to vector<128x128xf32>
    %531 = arith.cmpf oge, %529, %530 : vector<128x128xf32>
    %cst_129 = arith.constant 0.000000e+00 : f32
    %532 = vector.shape_cast %528 : vector<128x1xf32> to vector<128x1xf32>
    %533 = vector.broadcast %532 : vector<128x1xf32> to vector<128x128xf32>
    %534 = vector.broadcast %cst_129 : f32 to vector<128x128xf32>
    %535 = arith.select %531, %533, %534 : vector<128x128xi1>, vector<128x128xf32>
    %cst_130 = arith.constant dense<0.000000e+00> : vector<128xf32>
    %536 = vector.multi_reduction <add>, %535, %cst_130 [0] : vector<128x128xf32> to vector<128xf32>
    %537 = vector.shape_cast %536 : vector<128xf32> to vector<1x128xf32>
    %538 = arith.addf %517, %537 : vector<1x128xf32>
    %cst_131 = arith.constant 1.000000e-30 : f32
    %539 = vector.broadcast %cst_131 : f32 to vector<1x128xf32>
    %540 = arith.maximumf %538, %539 : vector<1x128xf32>
    %541 = math.log %540 : vector<1x128xf32>
    %542 = vector.broadcast %512 : vector<1x1xf32> to vector<1x128xf32>
    %543 = arith.addf %542, %541 : vector<1x128xf32>
    %cst_132 = arith.constant 1.000000e+00 : f32
    %544 = vector.broadcast %cst_132 : f32 to vector<1x1xf32>
    %545 = arith.subf %496, %544 : vector<1x1xf32>
    %546 = vector.broadcast %545 : vector<1x1xf32> to vector<1x128xf32>
    %547 = arith.cmpf olt, %506, %546 : vector<1x128xf32>
    %cst_133 = arith.constant -0.223143548 : f32
    %548 = vector.broadcast %cst_133 : f32 to vector<1x128xf32>
    %549 = arith.mulf %506, %548 : vector<1x128xf32>
    %550 = math.exp %549 : vector<1x128xf32>
    %551 = arith.subf %495, %543 : vector<1x128xf32>
    %552 = arith.mulf %550, %551 : vector<1x128xf32>
    %cst_134 = arith.constant 0.000000e+00 : f32
    %553 = vector.broadcast %cst_134 : f32 to vector<1x128xf32>
    %554 = arith.select %547, %552, %553 : vector<1x128xi1>, vector<1x128xf32>
    %cst_135 = arith.constant dense<0.000000e+00> : vector<1xf32>
    %555 = vector.multi_reduction <add>, %554, %cst_135 [1] : vector<1x128xf32> to vector<1xf32>
    %556 = vector.shape_cast %555 : vector<1xf32> to vector<1x1xf32>
    %cst_136 = arith.constant 0.000000e+00 : f32
    %557 = vector.broadcast %cst_136 : f32 to vector<1x1xf32>
    %558 = arith.subf %557, %556 : vector<1x1xf32>
    %559 = vector.extract_strided_slice %20 {offsets = [6, 0], sizes = [1, 1], strides = [1, 1]} : vector<8x1xf32> to vector<1x1xf32>
    %cst_137 = arith.constant 2.000000e+00 : f32
    %560 = vector.broadcast %cst_137 : f32 to vector<1x1xf32>
    %561 = arith.cmpf oge, %559, %560 : vector<1x1xf32>
    %562 = arith.extui %561 : vector<1x1xi1> to vector<1x1xi32>
    %563 = arith.sitofp %562 : vector<1x1xi32> to vector<1x1xf32>
    %c6_i32 = arith.constant 6 : i32
    %564 = vector.broadcast %c6_i32 : i32 to vector<1x128xi32>
    %565 = arith.cmpi eq, %23, %564 : vector<1x128xi32>
    %566 = vector.shape_cast %558 : vector<1x1xf32> to vector<1x1xf32>
    %567 = vector.broadcast %566 : vector<1x1xf32> to vector<1x128xf32>
    %568 = arith.select %565, %567, %490 : vector<1x128xi1>, vector<1x128xf32>
    %569 = vector.shape_cast %563 : vector<1x1xf32> to vector<1x1xf32>
    %570 = vector.broadcast %569 : vector<1x1xf32> to vector<1x128xf32>
    %571 = arith.select %565, %570, %493 : vector<1x128xi1>, vector<1x128xf32>
    %572 = vector.extract_strided_slice %16 {offsets = [7, 0], sizes = [1, 128], strides = [1, 1]} : vector<8x128xf32> to vector<1x128xf32>
    %573 = vector.extract_strided_slice %2 {offsets = [7, 0], sizes = [1, 128], strides = [1, 1]} : vector<8x128xf32> to vector<1x128xf32>
    %574 = vector.extract_strided_slice %20 {offsets = [7, 0], sizes = [1, 1], strides = [1, 1]} : vector<8x1xf32> to vector<1x1xf32>
    %cst_138 = arith.constant 0.000000e+00 : f32
    %575 = vector.broadcast %cst_138 : f32 to vector<1x128xf32>
    %576 = vector.extract_strided_slice %21 {offsets = [0, 7], sizes = [128, 1], strides = [1, 1]} : vector<128x8xf32> to vector<128x1xf32>
    %577 = vector.broadcast %576 : vector<128x1xf32> to vector<128x128xf32>
    %578 = vector.broadcast %572 : vector<1x128xf32> to vector<128x128xf32>
    %579 = arith.cmpf olt, %577, %578 : vector<128x128xf32>
    %580 = arith.extui %579 : vector<128x128xi1> to vector<128x128xi32>
    %581 = arith.sitofp %580 : vector<128x128xi32> to vector<128x128xf32>
    %cst_139 = arith.constant dense<0.000000e+00> : vector<128xf32>
    %582 = vector.multi_reduction <add>, %581, %cst_139 [0] : vector<128x128xf32> to vector<128xf32>
    %583 = vector.shape_cast %582 : vector<128xf32> to vector<1x128xf32>
    %584 = arith.addf %575, %583 : vector<1x128xf32>
    %585 = vector.broadcast %574 : vector<1x1xf32> to vector<1x128xf32>
    %586 = arith.cmpf olt, %584, %585 : vector<1x128xf32>
    %cst_140 = arith.constant -1.000000e+30 : f32
    %587 = vector.broadcast %cst_140 : f32 to vector<1x128xf32>
    %588 = arith.select %586, %573, %587 : vector<1x128xi1>, vector<1x128xf32>
    %cst_141 = arith.constant dense<0xFF800000> : vector<1xf32>
    %589 = vector.multi_reduction <maximumf>, %588, %cst_141 [1] : vector<1x128xf32> to vector<1xf32>
    %590 = vector.shape_cast %589 : vector<1xf32> to vector<1x1xf32>
    %cst_142 = arith.constant -1.000000e+09 : f32
    %591 = vector.broadcast %cst_142 : f32 to vector<1x128xf32>
    %592 = arith.select %586, %572, %591 : vector<1x128xi1>, vector<1x128xf32>
    %cst_143 = arith.constant dense<0xFF800000> : vector<1xf32>
    %593 = vector.multi_reduction <maximumf>, %592, %cst_143 [1] : vector<1x128xf32> to vector<1xf32>
    %594 = vector.shape_cast %593 : vector<1xf32> to vector<1x1xf32>
    %cst_144 = arith.constant 0.000000e+00 : f32
    %595 = vector.broadcast %cst_144 : f32 to vector<1x128xf32>
    %596 = vector.extract_strided_slice %21 {offsets = [0, 7], sizes = [128, 1], strides = [1, 1]} : vector<128x8xf32> to vector<128x1xf32>
    %597 = vector.extract_strided_slice %22 {offsets = [0, 7], sizes = [128, 1], strides = [1, 1]} : vector<128x8xf32> to vector<128x1xf32>
    %598 = vector.broadcast %594 : vector<1x1xf32> to vector<128x1xf32>
    %599 = arith.cmpf ole, %596, %598 : vector<128x1xf32>
    %600 = vector.broadcast %590 : vector<1x1xf32> to vector<128x1xf32>
    %601 = arith.subf %597, %600 : vector<128x1xf32>
    %cst_145 = arith.constant 0.000000e+00 : f32
    %602 = vector.broadcast %cst_145 : f32 to vector<128x1xf32>
    %603 = arith.minimumf %601, %602 : vector<128x1xf32>
    %604 = math.exp %603 : vector<128x1xf32>
    %cst_146 = arith.constant 0.000000e+00 : f32
    %605 = vector.broadcast %cst_146 : f32 to vector<128x1xf32>
    %606 = arith.select %599, %604, %605 : vector<128x1xi1>, vector<128x1xf32>
    %607 = vector.broadcast %596 : vector<128x1xf32> to vector<128x128xf32>
    %608 = vector.broadcast %572 : vector<1x128xf32> to vector<128x128xf32>
    %609 = arith.cmpf oge, %607, %608 : vector<128x128xf32>
    %cst_147 = arith.constant 0.000000e+00 : f32
    %610 = vector.shape_cast %606 : vector<128x1xf32> to vector<128x1xf32>
    %611 = vector.broadcast %610 : vector<128x1xf32> to vector<128x128xf32>
    %612 = vector.broadcast %cst_147 : f32 to vector<128x128xf32>
    %613 = arith.select %609, %611, %612 : vector<128x128xi1>, vector<128x128xf32>
    %cst_148 = arith.constant dense<0.000000e+00> : vector<128xf32>
    %614 = vector.multi_reduction <add>, %613, %cst_148 [0] : vector<128x128xf32> to vector<128xf32>
    %615 = vector.shape_cast %614 : vector<128xf32> to vector<1x128xf32>
    %616 = arith.addf %595, %615 : vector<1x128xf32>
    %cst_149 = arith.constant 1.000000e-30 : f32
    %617 = vector.broadcast %cst_149 : f32 to vector<1x128xf32>
    %618 = arith.maximumf %616, %617 : vector<1x128xf32>
    %619 = math.log %618 : vector<1x128xf32>
    %620 = vector.broadcast %590 : vector<1x1xf32> to vector<1x128xf32>
    %621 = arith.addf %620, %619 : vector<1x128xf32>
    %cst_150 = arith.constant 1.000000e+00 : f32
    %622 = vector.broadcast %cst_150 : f32 to vector<1x1xf32>
    %623 = arith.subf %574, %622 : vector<1x1xf32>
    %624 = vector.broadcast %623 : vector<1x1xf32> to vector<1x128xf32>
    %625 = arith.cmpf olt, %584, %624 : vector<1x128xf32>
    %cst_151 = arith.constant -0.223143548 : f32
    %626 = vector.broadcast %cst_151 : f32 to vector<1x128xf32>
    %627 = arith.mulf %584, %626 : vector<1x128xf32>
    %628 = math.exp %627 : vector<1x128xf32>
    %629 = arith.subf %573, %621 : vector<1x128xf32>
    %630 = arith.mulf %628, %629 : vector<1x128xf32>
    %cst_152 = arith.constant 0.000000e+00 : f32
    %631 = vector.broadcast %cst_152 : f32 to vector<1x128xf32>
    %632 = arith.select %625, %630, %631 : vector<1x128xi1>, vector<1x128xf32>
    %cst_153 = arith.constant dense<0.000000e+00> : vector<1xf32>
    %633 = vector.multi_reduction <add>, %632, %cst_153 [1] : vector<1x128xf32> to vector<1xf32>
    %634 = vector.shape_cast %633 : vector<1xf32> to vector<1x1xf32>
    %cst_154 = arith.constant 0.000000e+00 : f32
    %635 = vector.broadcast %cst_154 : f32 to vector<1x1xf32>
    %636 = arith.subf %635, %634 : vector<1x1xf32>
    %637 = vector.extract_strided_slice %20 {offsets = [7, 0], sizes = [1, 1], strides = [1, 1]} : vector<8x1xf32> to vector<1x1xf32>
    %cst_155 = arith.constant 2.000000e+00 : f32
    %638 = vector.broadcast %cst_155 : f32 to vector<1x1xf32>
    %639 = arith.cmpf oge, %637, %638 : vector<1x1xf32>
    %640 = arith.extui %639 : vector<1x1xi1> to vector<1x1xi32>
    %641 = arith.sitofp %640 : vector<1x1xi32> to vector<1x1xf32>
    %c7_i32 = arith.constant 7 : i32
    %642 = vector.broadcast %c7_i32 : i32 to vector<1x128xi32>
    %643 = arith.cmpi eq, %23, %642 : vector<1x128xi32>
    %644 = vector.shape_cast %636 : vector<1x1xf32> to vector<1x1xf32>
    %645 = vector.broadcast %644 : vector<1x1xf32> to vector<1x128xf32>
    %646 = arith.select %643, %645, %568 : vector<1x128xi1>, vector<1x128xf32>
    %647 = vector.shape_cast %641 : vector<1x1xf32> to vector<1x1xf32>
    %648 = vector.broadcast %647 : vector<1x1xf32> to vector<1x128xf32>
    %649 = arith.select %643, %648, %571 : vector<1x128xi1>, vector<1x128xf32>
    %c0_156 = arith.constant 0 : index
    %c0_157 = arith.constant 0 : index
    %650 = vector.load %arg4[%c0_156, %c0_157] : memref<1x128xf32, #tpu.memory_space<vmem>>, vector<1x128xf32>
    tpu.vector_store %arg4[%c0_156, %c0_157], %646 {strides = array<i32>} : memref<1x128xf32, #tpu.memory_space<vmem>>, vector<1x128xf32>,
    %c0_158 = arith.constant 0 : index
    %c0_159 = arith.constant 0 : index
    %651 = vector.load %arg5[%c0_158, %c0_159] : memref<1x128xf32, #tpu.memory_space<vmem>>, vector<1x128xf32>
    tpu.vector_store %arg5[%c0_158, %c0_159], %649 {strides = array<i32>} : memref<1x128xf32, #tpu.memory_space<vmem>>, vector<1x128xf32>,
    return
  }
  func.func @transform_0(%arg0: i32) -> (i32, i32) {
    %c0_i32 = arith.constant 0 : i32
    %c0_i32_0 = arith.constant 0 : i32
    return %arg0, %c0_i32 : i32, i32
  }
  func.func @transform_1(%arg0: i32) -> (i32, i32) {
    %c0_i32 = arith.constant 0 : i32
    %c0_i32_0 = arith.constant 0 : i32
    return %arg0, %c0_i32 : i32, i32
  }
  func.func @transform_2(%arg0: i32) -> (i32, i32) {
    %c0_i32 = arith.constant 0 : i32
    %c0_i32_0 = arith.constant 0 : i32
    return %arg0, %c0_i32 : i32, i32
  }
  func.func @transform_3(%arg0: i32) -> (i32, i32) {
    %c0_i32 = arith.constant 0 : i32
    %c0_i32_0 = arith.constant 0 : i32
    return %c0_i32, %arg0 : i32, i32
  }
  func.func @transform_4(%arg0: i32) -> (i32, i32) {
    %c0_i32 = arith.constant 0 : i32
    %c0_i32_0 = arith.constant 0 : i32
    return %c0_i32, %arg0 : i32, i32
  }
}

</mosaic_0001>

<bundles_post_ra>
// kernel: tpu_custom_call.1
= control target key start
LH: loop header
LB: loop body
LE: loop exit
PB: predicated region body
PF: predicated region fallthrough
CT: control target
= control target key end

     0   :  { %10 = vsyncpa [#allocation3], 0  ;;  %s6206_s0 = inlined_call_operand.hbm [shape: f32[8,128], index: 0, kind: input, shape index: {}]   ;;  %s6207_s1 = inlined_call_operand.hbm [shape: f32[8,128], index: 1, kind: input, shape index: {}]   ;;  %s6208_s2 = inlined_call_operand.hbm [shape: f32[8,128], index: 2, kind: input, shape index: {}]   ;;  %s6209_s3 = inlined_call_operand.hbm [shape: f32[1,128], index: 3, kind: output, shape index: {0}]   ;;  %s6210_s4 = inlined_call_operand.hbm [shape: f32[1,128], index: 4, kind: output, shape index: {1}]  }
   0x1   :  { %11 = vsyncpa [#allocation6], 0 }
   0x2   :  { %12 = vsyncpa [#allocation4], 0 }
   0x3   :  { %13 = vsyncpa [#allocation10], 0  ;;  %s4034_s15 = smov [#allocation5]   ;;  %s4035_s17 = smov [#allocation2]  }
   0x4   :  { %s30_s16 = sshll.u32 %s4034_s15, 4  ;;  %s20_s18 = sshll.u32 %s4035_s17, 4  ;;  %s31_s16 = int_to_ptr.vmem [resolvable:$true] %s30_s16  ;;  %s21_s18 = int_to_ptr.vmem [resolvable:$true] %s20_s18 }
   0x5   :  { %s3934_s19 = scalar_lea.vmem %s31_s16, 128  ;;  %p3939_p1 = scmp.lt.s32.totalorder %s31_s16, %s31_s16 }
   0x6   :  { %p3935_p0 = scmp.ne.s32.totalorder %s31_s16, %s3934_s19  ;;  %p3940_p2 = scmp.lt.s32.totalorder %s3934_s19, %s3934_s19 }
   0x8   :  { %p3941_p3 = por %p3940_p2, %p3939_p1 }
   0xa   :  { %p3942_p4 = pnand %p3941_p3, %p3935_p0 }
   0xc   :  { %3945 = shalt.err (!%p3942_p4)
}
   0xd   :  { %33 = dma.hbm_to_vmem [thread:$0]  %s6207_s1, 128, %s31_s16, [#allocation6]  }
   0xe   :  { %s3954_s22 = scalar_lea.vmem %s21_s18, 128  ;;  %p3959_p6 = scmp.lt.s32.totalorder %s21_s18, %s21_s18 }
   0xf   :  { %p3955_p5 = scmp.ne.s32.totalorder %s21_s18, %s3954_s22  ;;  %p3960_p7 = scmp.lt.s32.totalorder %s3954_s22, %s3954_s22 }
  0x11   :  { %p3961_p8 = por %p3960_p7, %p3959_p6 }
  0x13   :  { %p3962_p9 = pnand %p3961_p8, %p3955_p5 }
  0x15   :  { %3965 = shalt.err (!%p3962_p9)
}
  0x16   :  { %23 = dma.hbm_to_vmem [thread:$0]  %s6206_s0, 128, %s21_s18, [#allocation3]  }
  0x17   :  { %s4036_s25 = smov [#allocation7]  }
  0x18   :  { %s40_s26 = sshll.u32 %s4036_s25, 4  ;;  %s41_s26 = int_to_ptr.vmem [resolvable:$true] %s40_s26 }
  0x19   :  { %s3974_s27 = scalar_lea.vmem %s41_s26, 128  ;;  %p3979_p11 = scmp.lt.s32.totalorder %s41_s26, %s41_s26 }
  0x1a   :  { %p3975_p10 = scmp.ne.s32.totalorder %s41_s26, %s3974_s27  ;;  %p3980_p12 = scmp.lt.s32.totalorder %s3974_s27, %s3974_s27 }
  0x1c   :  { %p3981_p13 = por %p3980_p12, %p3979_p11 }
  0x1e   :  { %p3982_p0 = pnand %p3981_p13, %p3975_p10 }
  0x20   :  { %3985 = shalt.err (!%p3982_p0)
}
  0x21   :  { %43 = dma.hbm_to_vmem [thread:$0]  %s6208_s2, 128, %s41_s26, [#allocation6]  }
  0x22   :  { %4026 = dma.done.wait [#allocation3], 128  }
  0x23   :  { %4027 = vsyncadd [#allocation3], 4294967168 }
  0x24   :  { %4028 = dma.done.wait [#allocation6], 256  }
  0x25   :  { %4029 = vsyncadd [#allocation6], 4294967040  ;;  %v59_v0 = vlaneseq  ;;  %v54_v3 = vld [vmem:[#allocation5] sm:$0xff]  ;;  %v55_v4 = vld [vmem:[#allocation7] sm:$0xff]  ;;  %v6215_v9 = vmov 0   ;;  %v6243_v10 = vmov 0.0  }
  0x26   :  { %v4086_v5 = vld [vmem:[#allocation2] sm:$0xff]  ;;  %vm56_vm0 = vcmp.gt.f32.partialorder %v55_v4, 0.5  ;;  %vm57_vm1 = vcmp.gt.f32.partialorder %v54_v3, 0.0  ;;  %v62_v6 = vmul.f32 128.0, %v54_v3  ;;  %v6213_v15 = vmov 1   ;;  %s4046_s0 = smov [#allocation9]  }
  0x27   :  { %v4083_v1 = vand.u32 127, %v59_v0  ;;  %101 = vxpose.xlu1.b32.start.end [1/1] (short) %v4086_v5, 128  ;;  %vm58_vm2 = vmand %vm56_vm0, %vm57_vm1  ;;  %v6211_v62 = vmov 2   ;;  %s3445_s2 = sshll.u32 %s4046_s0, 4  ;;  %s3446_s2 = int_to_ptr.vmem [resolvable:$true] %s3445_s2 }
  0x28   :  { %v3459_v11 = vsel %vm58_vm2, 1.0, %v6243_v10  ;;  %s3986_s29 = scalar_lea.vmem %s3446_s2, 16  ;;  %s3990_s30 = scalar_lea.vmem %s3446_s2, 32 }
  0x29   :  { %6360 = vst [vmem:[#allocation15_spill] sm:$0xff] %v4083_v1  ;;  %v61_v2 = vcvt.s32.f32 %v4083_v1  ;;  %vm6327_vm3 = vcmp.eq.s32.totalorder %v4083_v1, 0  ;;  %vm6326_vm5 = vcmp.eq.s32.totalorder %v4083_v1, 1  ;;  %vm6325_vm6 = vcmp.eq.s32.totalorder %v4083_v1, 2  ;;  %p3987_p1 = scmp.ne.s32.totalorder %s3446_s2, %s3986_s29  ;;  %p3991_p2 = scmp.lt.s32.totalorder %s3446_s2, %s3446_s2 }
  0x2a   :  { %vm6324_vm7 = vcmp.eq.s32.totalorder %v4083_v1, 3  ;;  %vm6323_vm8 = vcmp.eq.s32.totalorder %v4083_v1, 4  ;;  %vm6322_vm9 = vcmp.eq.s32.totalorder %v4083_v1, 5  ;;  %vm6321_vm10 = vcmp.eq.s32.totalorder %v4083_v1, 6  ;;  %p3992_p3 = scmp.lt.s32.totalorder %s3990_s30, %s3986_s29 }
  0x2b   :  { %v63_v7 = vadd.f32 %v62_v6, %v61_v2  ;;  %vm6300_vm11 = vcmp.eq.s32.totalorder %v4083_v1, 7  ;;  %v4232_v6 = vshrl.u32 %v59_v0, 7 }
  0x2c   :  { %p3993_p4 = por %p3992_p3, %p3991_p2 }
  0x2d   :  { %v4089_v8 = vsel %vm58_vm2, %v63_v7, 1e+09  ;;  %6379 = vst [vmem:[#allocation34_spill] sm:$0xff] %v4232_v6 }
  0x2e   :  { %6361 = vst [vmem:[#allocation16_spill] sm:$0xff] %v4089_v8  ;;  %69 = vxpose.xlu0.b32.start.end [1/1] (short) %v4089_v8, 128  ;;  %p3994_p5 = pnand %p3993_p4, %p3987_p1 }
  0x45   :  { %3604 = vset.pattern.permute.xlu1 %v6215_v9 }
  0x57   :  { %3605 = vset.pattern.permute.xlu0 %v6215_v9 }
  0x97   :  { %67 = vadd.xlane.f32.xlu0 %v3459_v11  ;;  %v4237_v11 = vsub.s32 0, %v4232_v6 }
  0xa3   :  { %v4122_v22 = vpop.trf.xlu1 }
  0xa4   :  { %6363 = vst [vmem:[#allocation18_spill] sm:$0xff] %v4122_v22 }
  0xa7   :  { %v4129_v24 = vpop.trf.xlu1 }
  0xa8   :  { %6364 = vst [vmem:[#allocation19_spill] sm:$0xff] %v4129_v24 }
  0xaa   :  { %v4095_v12 = vpop.trf.xlu0 }
  0xab   :  { %135 = vperm.xlu1 %3604, %v4095_v12   ;;  %v4136_v27 = vpop.trf.xlu1 }
  0xac   :  { %6365 = vst [vmem:[#allocation20_spill] sm:$0xff] %v4136_v27 }
  0xae   :  { %v4098_v13 = vpop.trf.xlu0 }
  0xaf   :  { %140 = vperm.xlu0 %3605, %v4098_v13   ;;  %v4142_v29 = vpop.trf.xlu1 }
  0xb0   :  { %6366 = vst [vmem:[#allocation21_spill] sm:$0xff] %v4142_v29 }
  0xb2   :  { %v4101_v14 = vpop.trf.xlu0 }
  0xb3   :  { %6362 = vst [vmem:[#allocation17_spill] sm:$0xff] %v4101_v14  ;;  %145 = vperm.xlu1 %3604, %v4101_v14   ;;  %3607 = vset.pattern.permute.xlu0 %v6213_v15  ;;  %v4149_v32 = vpop.trf.xlu1 }
  0xb4   :  { %6367 = vst [vmem:[#allocation22_spill] sm:$0xff] %v4149_v32 }
  0xb6   :  { %v4105_v16 = vpop.trf.xlu0 }
  0xb7   :  { %150 = vperm.xlu1 %3604, %v4105_v16   ;;  %v4155_v34 = vpop.trf.xlu1 }
  0xb8   :  { %6368 = vst [vmem:[#allocation23_spill] sm:$0xff] %v4155_v34 }
  0xba   :  { %v4108_v17 = vpop.trf.xlu0 }
  0xbb   :  { %155 = vperm.xlu1 %3604, %v4108_v17   ;;  %v4159_v35 = vpop.trf.xlu1 }
  0xbc   :  { %6369 = vst [vmem:[#allocation24_spill] sm:$0xff] %v4159_v35 }
  0xbe   :  { %v4111_v18 = vpop.trf.xlu0 }
  0xbf   :  { %160 = vperm.xlu1 %3604, %v4111_v18   ;;  %v4163_v36 = vpop.trf.xlu1 }
  0xc0   :  { %6370 = vst [vmem:[#allocation25_spill] sm:$0xff] %v4163_v36 }
  0xc2   :  { %v4114_v19 = vpop.trf.xlu0 }
  0xc3   :  { %165 = vperm.xlu1 %3604, %v4114_v19   ;;  %v4166_v37 = vpop.trf.xlu1 }
  0xc4   :  { %6371 = vst [vmem:[#allocation26_spill] sm:$0xff] %v4166_v37 }
  0xc6   :  { %v4117_v20 = vpop.trf.xlu0 }
  0xc7   :  { %170 = vperm.xlu1 %3604, %v4117_v20   ;;  %v4170_v38 = vpop.trf.xlu1 }
  0xc8   :  { %6372 = vst [vmem:[#allocation27_spill] sm:$0xff] %v4170_v38 }
  0xca   :  { %v4120_v21 = vpop.trf.xlu0 }
  0xcb   :  { %590 = vperm.xlu0 %3607, %v4120_v21   ;;  %175 = vperm.xlu1 %3604, %v4120_v21   ;;  %v4173_v39 = vpop.trf.xlu1 }
  0xcc   :  { %6373 = vst [vmem:[#allocation28_spill] sm:$0xff] %v4173_v39 }
  0xce   :  { %v4126_v23 = vpop.trf.xlu0 }
  0xcf   :  { %180 = vperm.xlu1 %3604, %v4126_v23   ;;  %v4177_v40 = vpop.trf.xlu1  ;;  %3609 = vset.pattern.permute.xlu0 %v6211_v62 }
  0xd0   :  { %6374 = vst [vmem:[#allocation29_spill] sm:$0xff] %v4177_v40 }
  0xd2   :  { %v4131_v25 = vpop.trf.xlu0 }
  0xd3   :  { %185 = vperm.xlu1 %3604, %v4131_v25   ;;  %v4180_v41 = vpop.trf.xlu1 }
  0xd4   :  { %6375 = vst [vmem:[#allocation30_spill] sm:$0xff] %v4180_v41 }
  0xd6   :  { %v4134_v26 = vpop.trf.xlu0 }
  0xd7   :  { %190 = vperm.xlu1 %3604, %v4134_v26   ;;  %v4184_v42 = vpop.trf.xlu1 }
  0xd8   :  { %6376 = vst [vmem:[#allocation31_spill] sm:$0xff] %v4184_v42 }
  0xda   :  { %v4139_v28 = vpop.trf.xlu0 }
  0xdb   :  { %195 = vperm.xlu1 %3604, %v4139_v28   ;;  %v4187_v43 = vpop.trf.xlu1 }
  0xdc   :  { %6377 = vst [vmem:[#allocation32_spill] sm:$0xff] %v4187_v43 }
  0xde   :  { %v4144_v30 = vpop.trf.xlu0 }
  0xdf   :  { %200 = vperm.xlu1 %3604, %v4144_v30   ;;  %v4198_v47 = vpop.trf.xlu1 }
  0xe2   :  { %v4147_v31 = vpop.trf.xlu0 }
  0xe3   :  { %205 = vperm.xlu1 %3604, %v4147_v31  }
  0xe6   :  { %v4152_v33 = vpop.trf.xlu0 }
  0xe7   :  { %210 = vperm.xlu1 %3604, %v4152_v33  }
  0xeb   :  { %3606 = vset.pattern.permute.xlu1 %v6213_v15 }
  0xec   :  { %558 = vperm.xlu1 %3606, %v4095_v12  }
  0xf0   :  { %562 = vperm.xlu1 %3606, %v4098_v13  }
  0xf4   :  { %566 = vperm.xlu1 %3606, %v4101_v14  }
  0xf8   :  { %570 = vperm.xlu1 %3606, %v4105_v16  }
  0xfc   :  { %574 = vperm.xlu1 %3606, %v4108_v17  }
 0x100   :  { %578 = vperm.xlu1 %3606, %v4111_v18  }
 0x104   :  { %582 = vperm.xlu1 %3606, %v4114_v19  }
 0x108   :  { %586 = vperm.xlu1 %3606, %v4117_v20  }
 0x10c   :  { %594 = vperm.xlu1 %3606, %v4126_v23  }
 0x110   :  { %598 = vperm.xlu1 %3606, %v4131_v25  }
 0x114   :  { %602 = vperm.xlu1 %3606, %v4134_v26  }
 0x118   :  { %606 = vperm.xlu1 %3606, %v4139_v28  }
 0x11c   :  { %610 = vperm.xlu1 %3606, %v4144_v30  }
 0x120   :  { %614 = vperm.xlu1 %3606, %v4147_v31   ;;  %v4190_v44 = vpop.xlane.xlu0 %67 }
 0x121   :  { %6378 = vst [vmem:[#allocation33_spill] sm:$0xff] %v4190_v44  ;;  %vm551_vm4 = vcmp.ge.f32.partialorder %v4190_v44, 2.0 }
 0x122   :  { %v3477_v45 = vsel %vm551_vm4, 1.0, %v6243_v10 }
 0x123   :  { %v556_v46 = vsel %vm6327_vm3, %v3477_v45, 0.0 }
 0x124   :  { %618 = vperm.xlu1 %3606, %v4152_v33   ;;  %v964_v48 = vrot.slane %v556_v46, 7 }
 0x126   :  { %v966_v49 = vsel %vm6326_vm5, %v3477_v45, %v964_v48  ;;  %v4207_v52 = vpop.permute.xlu1 %135 }
 0x127   :  { %v1374_v50 = vrot.slane %v966_v49, 7  ;;  %v4245_v49 = vrot.slane %v4089_v8, %v4237_v11 }
 0x128   :  { %3608 = vset.pattern.permute.xlu1 %v6211_v62 }
 0x129   :  { %v1376_v51 = vsel %vm6325_vm6, %v3477_v45, %v1374_v50  ;;  %vm217_vm13 = vcmp.lt.f32.partialorder %v4207_v52, %v4245_v49 }
 0x12a   :  { %v1784_v53 = vrot.slane %v1376_v51, 7  ;;  %v4241_v48 = vpop.permute.xlu0 %140  ;;  %v3460_v51 = vsel %vm217_vm13, 1.0, %v6243_v10 }
 0x12b   :  { %vm218_vm12 = vcmp.lt.f32.partialorder %v4241_v48, %v4245_v49 }
 0x12c   :  { %v1786_v54 = vsel %vm6324_vm7, %v3477_v45, %v1784_v53  ;;  %v3461_v0 = vsel %vm218_vm12, 1.0, %v6243_v10 }
 0x12d   :  { %v2194_v55 = vrot.slane %v1786_v54, 7  ;;  %v265_v54 = vadd.f32 %v3461_v0, %v3460_v51 }
 0x12e   :  { %v4212_v56 = vpop.permute.xlu1 %145 }
 0x12f   :  { %v2196_v57 = vsel %vm6323_vm8, %v3477_v45, %v2194_v55  ;;  %vm219_vm14 = vcmp.lt.f32.partialorder %v4212_v56, %v4245_v49 }
 0x130   :  { %v2604_v58 = vrot.slane %v2196_v57, 7  ;;  %v3462_v53 = vsel %vm219_vm14, 1.0, %v6243_v10 }
 0x132   :  { %v4217_v59 = vpop.permute.xlu1 %150  ;;  %v2606_v60 = vsel %vm6322_vm9, %v3477_v45, %v2604_v58  ;;  %v266_v58 = vadd.f32 %v3462_v53, %v265_v54 }
 0x133   :  { %v3014_v61 = vrot.slane %v2606_v60, 7  ;;  %vm220_vm15 = vcmp.lt.f32.partialorder %v4217_v59, %v4245_v49 }
 0x134   :  { %v3463_v55 = vsel %vm220_vm15, 1.0, %v6243_v10 }
 0x135   :  { %v3016_v63 = vsel %vm6321_vm10, %v3477_v45, %v3014_v61  ;;  %v267_v61 = vadd.f32 %v3463_v55, %v266_v58 }
 0x136   :  { %v4227_v2 = vpop.permute.xlu1 %155  ;;  %v3424_v3 = vrot.slane %v3016_v63, 7 }
 0x137   :  { %vm221_vm0 = vcmp.lt.f32.partialorder %v4227_v2, %v4245_v49 }
 0x138   :  { %v3426_v4 = vsel %vm6300_vm11, %v3477_v45, %v3424_v3  ;;  %v3464_v60 = vsel %vm221_vm0, 1.0, %v6243_v10 }
 0x139   :  { %3428 = vst [vmem:[#allocation9 - $0x7] sm:$0x80] %v3426_v4  ;;  %v268_v4 = vadd.f32 %v3464_v60, %v267_v61 }
 0x13a   :  { %v4234_v7 = vpop.permute.xlu1 %160 }
 0x13b   :  { %vm222_vm1 = vcmp.lt.f32.partialorder %v4234_v7, %v4245_v49 }
 0x13c   :  { %v3465_v63 = vsel %vm222_vm1, 1.0, %v6243_v10 }
 0x13d   :  { %v269_v51 = vadd.f32 %v3465_v63, %v268_v4 }
 0x13e   :  { %v4239_v46 = vpop.permute.xlu1 %165 }
 0x13f   :  { %vm223_vm2 = vcmp.lt.f32.partialorder %v4239_v46, %v4245_v49 }
 0x140   :  { %v3466_v0 = vsel %vm223_vm2, 1.0, %v6243_v10 }
 0x141   :  { %v270_v55 = vadd.f32 %v3466_v0, %v269_v51 }
 0x142   :  { %v4247_v50 = vpop.permute.xlu1 %170 }
 0x143   :  { %6380 = vst [vmem:[#allocation35_spill] sm:$0xff] %v4247_v50  ;;  %vm224_vm4 = vcmp.lt.f32.partialorder %v4247_v50, %v4245_v49 }
 0x144   :  { %v3467_v53 = vsel %vm224_vm4, 1.0, %v6243_v10 }
 0x145   :  { %v271_v60 = vadd.f32 %v3467_v53, %v270_v55 }
 0x146   :  { %v4256_v45 = vpop.permute.xlu1 %175 }
 0x147   :  { %6381 = vst [vmem:[#allocation36_spill] sm:$0xff] %v4256_v45  ;;  %vm225_vm12 = vcmp.lt.f32.partialorder %v4256_v45, %v4245_v49 }
 0x148   :  { %v3468_v58 = vsel %vm225_vm12, 1.0, %v6243_v10  ;;  %vm289_vm12 = vcmask 1040384  }
 0x149   :  { %v272_v4 = vadd.f32 %v3468_v58, %v271_v60 }
 0x14a   :  { %v4265_v57 = vpop.permute.xlu1 %180 }
 0x14b   :  { %6382 = vst [vmem:[#allocation37_spill] sm:$0xff] %v4265_v57  ;;  %vm226_vm13 = vcmp.lt.f32.partialorder %v4265_v57, %v4245_v49 }
 0x14c   :  { %v3469_v61 = vsel %vm226_vm13, 1.0, %v6243_v10 }
 0x14d   :  { %v273_v0 = vadd.f32 %v3469_v61, %v272_v4 }
 0x14e   :  { %v4273_v3 = vpop.permute.xlu1 %185 }
 0x14f   :  { %6383 = vst [vmem:[#allocation38_spill] sm:$0xff] %v4273_v3  ;;  %vm227_vm14 = vcmp.lt.f32.partialorder %v4273_v3, %v4245_v49 }
 0x150   :  { %v3470_v62 = vsel %vm227_vm14, 1.0, %v6243_v10 }
 0x151   :  { %v274_v55 = vadd.f32 %v3470_v62, %v273_v0 }
 0x152   :  { %v4281_v54 = vpop.permute.xlu1 %190 }
 0x153   :  { %6384 = vst [vmem:[#allocation39_spill] sm:$0xff] %v4281_v54  ;;  %vm228_vm15 = vcmp.lt.f32.partialorder %v4281_v54, %v4245_v49 }
 0x154   :  { %v3471_v51 = vsel %vm228_vm15, 1.0, %v6243_v10 }
 0x155   :  { %v275_v58 = vadd.f32 %v3471_v51, %v274_v55 }
 0x156   :  { %v4289_v63 = vpop.permute.xlu1 %195 }
 0x157   :  { %6385 = vst [vmem:[#allocation40_spill] sm:$0xff] %v4289_v63  ;;  %vm229_vm0 = vcmp.lt.f32.partialorder %v4289_v63, %v4245_v49 }
 0x158   :  { %v3472_v15 = vsel %vm229_vm0, 1.0, %v6243_v10 }
 0x159   :  { %v276_v1 = vadd.f32 %v3472_v15, %v275_v58 }
 0x15a   :  { %v4297_v53 = vpop.permute.xlu1 %200 }
 0x15b   :  { %6386 = vst [vmem:[#allocation41_spill] sm:$0xff] %v4297_v53  ;;  %vm230_vm1 = vcmp.lt.f32.partialorder %v4297_v53, %v4245_v49 }
 0x15c   :  { %v3473_v60 = vsel %vm230_vm1, 1.0, %v6243_v10 }
 0x15d   :  { %v277_v4 = vadd.f32 %v3473_v60, %v276_v1 }
 0x15e   :  { %v4303_v9 = vpop.permute.xlu1 %205 }
 0x15f   :  { %6387 = vst [vmem:[#allocation42_spill] sm:$0xff] %v4303_v9  ;;  %vm231_vm2 = vcmp.lt.f32.partialorder %v4303_v9, %v4245_v49 }
 0x160   :  { %v3474_v61 = vsel %vm231_vm2, 1.0, %v6243_v10 }
 0x161   :  { %v278_v62 = vadd.f32 %v3474_v61, %v277_v4 }
 0x162   :  { %v4308_v63 = vpop.permute.xlu1 %210 }
 0x163   :  { %6388 = vst [vmem:[#allocation43_spill] sm:$0xff] %v4308_v63  ;;  %vm232_vm4 = vcmp.lt.f32.partialorder %v4308_v63, %v4245_v49 }
 0x164   :  { %v3475_v0 = vsel %vm232_vm4, 1.0, %v6243_v10 }
 0x165   :  { %v279_v51 = vadd.f32 %v3475_v0, %v278_v62 }
 0x167   :  { %v280_v55 = vrot.slane %v279_v51, 4  ;;  %v4313_v53 = vpop.permute.xlu1 %558 }
 0x168   :  { %6389 = vst [vmem:[#allocation44_spill] sm:$0xff] %v4313_v53 }
 0x169   :  { %v281_v54 = vadd.f32 %v280_v55, %v279_v51 }
 0x16b   :  { %v282_v15 = vrot.slane %v281_v54, 2  ;;  %v4315_v58 = vpop.permute.xlu1 %562 }
 0x16c   :  { %6390 = vst [vmem:[#allocation45_spill] sm:$0xff] %v4315_v58 }
 0x16d   :  { %v283_v9 = vadd.f32 %v282_v15, %v281_v54  ;;  %v4330_v54 = vsub.s32 1, %v4232_v6 }
 0x16f   :  { %v4317_v3 = vpop.permute.xlu1 %566  ;;  %v284_v1 = vrot.slane %v283_v9, 1  ;;  %v4336_v55 = vrot.slane %v4089_v8, %v4330_v54 }
 0x170   :  { %6391 = vst [vmem:[#allocation46_spill] sm:$0xff] %v4317_v3 }
 0x171   :  { %v4319_v60 = vadd.f32 %v284_v1, %v283_v9  ;;  %6395 = vst [vmem:[#allocation50_spill] sm:$0xff] %v4336_v55  ;;  %vm626_vm14 = vcmp.lt.f32.partialorder %v4315_v58, %v4336_v55  ;;  %vm625_vm15 = vcmp.lt.f32.partialorder %v4313_v53, %v4336_v55  ;;  %vm627_vm0 = vcmp.lt.f32.partialorder %v4317_v3, %v4336_v55 }
 0x172   :  { %v3479_v1 = vsel %vm626_vm14, 1.0, %v6243_v10 }
 0x173   :  { %6392 = vst [vmem:[#allocation47_spill] sm:$0xff] %v4319_v60  ;;  %v4321_v61 = vpop.permute.xlu1 %570  ;;  %vm287_vm13 = vcmp.lt.f32.partialorder %v4319_v60, %v4190_v44 }
 0x174   :  { %6393 = vst [vmem:[#allocation48_spill] sm:$0xff] %v4321_v61  ;;  %v293_v4 = vsel %vm287_vm13, %v4089_v8, -1e+09  ;;  %v288_v62 = vsel %vm287_vm13, %v4086_v5, -1e+30  ;;  %vm628_vm1 = vcmp.lt.f32.partialorder %v4321_v61, %v4336_v55 }
 0x175   :  { %v294_v0 = vsel %vm289_vm12, %v293_v4, -inf  ;;  %v290_v51 = vsel %vm289_vm12, %v288_v62, -inf  ;;  %v3478_v62 = vsel %vm625_vm15, 1.0, %v6243_v10  ;;  %v3481_v53 = vsel %vm628_vm1, 1.0, %v6243_v10 }
 0x176   :  { %295 = vmax.xlane.f32.xlu1 %v294_v0  ;;  %291 = vmax.xlane.f32.xlu0 %v290_v51  ;;  %v3480_v0 = vsel %vm627_vm0, 1.0, %v6243_v10  ;;  %v673_v51 = vadd.f32 %v3479_v1, %v3478_v62 }
 0x177   :  { %v4332_v9 = vpop.permute.xlu1 %574 }
 0x178   :  { %6394 = vst [vmem:[#allocation49_spill] sm:$0xff] %v4332_v9  ;;  %vm629_vm2 = vcmp.lt.f32.partialorder %v4332_v9, %v4336_v55  ;;  %v674_v3 = vadd.f32 %v3480_v0, %v673_v51  ;;  %v4369_v51 = vpop.permute.xlu0 %590 }
 0x179   :  { %v3482_v60 = vsel %vm629_vm2, 1.0, %v6243_v10  ;;  %6400 = vst [vmem:[#allocation55_spill] sm:$0xff] %v4369_v51  ;;  %vm633_vm15 = vcmp.lt.f32.partialorder %v4369_v51, %v4336_v55 }
 0x17a   :  { %v675_v63 = vadd.f32 %v3481_v53, %v674_v3 }
 0x17b   :  { %v4338_v15 = vpop.permute.xlu1 %578 }
 0x17c   :  { %6396 = vst [vmem:[#allocation51_spill] sm:$0xff] %v4338_v15  ;;  %vm630_vm4 = vcmp.lt.f32.partialorder %v4338_v15, %v4336_v55  ;;  %v676_v62 = vadd.f32 %v3482_v60, %v675_v63  ;;  %v3486_v63 = vsel %vm633_vm15, 1.0, %v6243_v10 }
 0x17d   :  { %v3483_v61 = vsel %vm630_vm4, 1.0, %v6243_v10 }
 0x17e   :  { %v677_v0 = vadd.f32 %v3483_v61, %v676_v62 }
 0x17f   :  { %v4347_v4 = vpop.permute.xlu1 %582 }
 0x180   :  { %6397 = vst [vmem:[#allocation52_spill] sm:$0xff] %v4347_v4  ;;  %vm631_vm13 = vcmp.lt.f32.partialorder %v4347_v4, %v4336_v55 }
 0x181   :  { %v3484_v9 = vsel %vm631_vm13, 1.0, %v6243_v10 }
 0x182   :  { %v678_v3 = vadd.f32 %v3484_v9, %v677_v0 }
 0x183   :  { %v4356_v58 = vpop.permute.xlu1 %586 }
 0x184   :  { %6398 = vst [vmem:[#allocation53_spill] sm:$0xff] %v4356_v58  ;;  %vm632_vm14 = vcmp.lt.f32.partialorder %v4356_v58, %v4336_v55 }
 0x185   :  { %v3485_v15 = vsel %vm632_vm14, 1.0, %v6243_v10 }
 0x186   :  { %v679_v53 = vadd.f32 %v3485_v15, %v678_v3 }
 0x187   :  { %v4364_v1 = vpop.permute.xlu1 %594 }
 0x188   :  { %6399 = vst [vmem:[#allocation54_spill] sm:$0xff] %v4364_v1  ;;  %vm634_vm0 = vcmp.lt.f32.partialorder %v4364_v1, %v4336_v55  ;;  %v680_v60 = vadd.f32 %v3486_v63, %v679_v53 }
 0x189   :  { %v3487_v61 = vsel %vm634_vm0, 1.0, %v6243_v10  ;;  %vm697_vm0 = vcmask 1041409  }
 0x18a   :  { %v681_v15 = vadd.f32 %v3487_v61, %v680_v60 }
 0x18b   :  { %v4372_v57 = vpop.permute.xlu1 %598 }
 0x18c   :  { %6401 = vst [vmem:[#allocation56_spill] sm:$0xff] %v4372_v57  ;;  %vm635_vm1 = vcmp.lt.f32.partialorder %v4372_v57, %v4336_v55 }
 0x18d   :  { %v3488_v9 = vsel %vm635_vm1, 1.0, %v6243_v10 }
 0x18e   :  { %v682_v53 = vadd.f32 %v3488_v9, %v681_v15 }
 0x18f   :  { %v4376_v4 = vpop.permute.xlu1 %602 }
 0x190   :  { %6402 = vst [vmem:[#allocation57_spill] sm:$0xff] %v4376_v4  ;;  %vm636_vm2 = vcmp.lt.f32.partialorder %v4376_v4, %v4336_v55 }
 0x191   :  { %v3489_v0 = vsel %vm636_vm2, 1.0, %v6243_v10 }
 0x192   :  { %v683_v57 = vadd.f32 %v3489_v0, %v682_v53 }
 0x193   :  { %v4384_v62 = vpop.permute.xlu1 %606 }
 0x194   :  { %6403 = vst [vmem:[#allocation58_spill] sm:$0xff] %v4384_v62  ;;  %vm637_vm4 = vcmp.lt.f32.partialorder %v4384_v62, %v4336_v55 }
 0x195   :  { %v3490_v63 = vsel %vm637_vm4, 1.0, %v6243_v10 }
 0x196   :  { %v684_v51 = vadd.f32 %v3490_v63, %v683_v57 }
 0x197   :  { %v4392_v3 = vpop.permute.xlu1 %610 }
 0x198   :  { %6404 = vst [vmem:[#allocation59_spill] sm:$0xff] %v4392_v3  ;;  %vm638_vm13 = vcmp.lt.f32.partialorder %v4392_v3, %v4336_v55 }
 0x199   :  { %v3491_v1 = vsel %vm638_vm13, 1.0, %v6243_v10 }
 0x19a   :  { %v685_v61 = vadd.f32 %v3491_v1, %v684_v51 }
 0x19b   :  { %v4398_v4 = vpop.permute.xlu1 %614 }
 0x19c   :  { %6405 = vst [vmem:[#allocation60_spill] sm:$0xff] %v4398_v4  ;;  %vm639_vm14 = vcmp.lt.f32.partialorder %v4398_v4, %v4336_v55 }
 0x19d   :  { %v3492_v60 = vsel %vm639_vm14, 1.0, %v6243_v10 }
 0x19e   :  { %v686_v9 = vadd.f32 %v3492_v60, %v685_v61 }
 0x19f   :  { %v4403_v62 = vpop.permute.xlu1 %618 }
 0x1a0   :  { %6406 = vst [vmem:[#allocation61_spill] sm:$0xff] %v4403_v62  ;;  %vm640_vm15 = vcmp.lt.f32.partialorder %v4403_v62, %v4336_v55 }
 0x1a1   :  { %v3493_v15 = vsel %vm640_vm15, 1.0, %v6243_v10 }
 0x1a2   :  { %v687_v0 = vadd.f32 %v3493_v15, %v686_v9 }
 0x1a4   :  { %v688_v53 = vrot.slane %v687_v0, 4 }
 0x1a6   :  { %v689_v3 = vadd.f32 %v688_v53, %v687_v0 }
 0x1a8   :  { %v690_v58 = vrot.slane %v689_v3, 2 }
 0x1aa   :  { %v691_v45 = vadd.f32 %v690_v58, %v689_v3 }
 0x1ac   :  { %v692_v57 = vrot.slane %v691_v45, 1 }
 0x1ae   :  { %v4408_v63 = vadd.f32 %v692_v57, %v691_v45  ;;  %v6408_v45 = vmov 0  }
 0x1b0   :  { %6407 = vst [vmem:[#allocation62_spill] sm:$0xff] %v4408_v63  ;;  %vm695_vm1 = vcmp.lt.f32.partialorder %v4408_v63, %v4190_v44 }
 0x1b1   :  { %v701_v1 = vsel %vm695_vm1, %v4089_v8, -1e+09  ;;  %v696_v51 = vsel %vm695_vm1, %v4086_v5, -1e+30 }
 0x1b2   :  { %v702_v60 = vsel %vm697_vm0, %v701_v1, -inf  ;;  %v698_v61 = vsel %vm697_vm0, %v696_v51, -inf }
 0x1b3   :  { %703 = vmax.xlane.f32.xlu0 %v702_v60  ;;  %699 = vmax.xlane.f32.xlu1 %v698_v61 }
 0x1c4   :  { %968 = vperm.xlu1 %3608, %v4095_v12  }
 0x1c8   :  { %972 = vperm.xlu1 %3608, %v4098_v13  }
 0x1c9   :  { %1000 = vperm.xlu0 %3609, %v4120_v21  }
 0x1cc   :  { %976 = vperm.xlu1 %3608, %v4101_v14  }
 0x1cd   :  { %3610 = vset.pattern.permute.xlu0 %v6408_v45 }
 0x1d0   :  { %980 = vperm.xlu1 %3608, %v4105_v16  }
 0x1d4   :  { %984 = vperm.xlu1 %3608, %v4108_v17  }
 0x1d8   :  { %988 = vperm.xlu1 %3608, %v4111_v18  }
 0x1dc   :  { %992 = vperm.xlu1 %3608, %v4114_v19  }
 0x1e0   :  { %996 = vperm.xlu1 %3608, %v4117_v20  }
 0x1e4   :  { %1004 = vperm.xlu1 %3608, %v4126_v23  }
 0x1e8   :  { %1008 = vperm.xlu1 %3608, %v4131_v25  }
 0x1ec   :  { %1012 = vperm.xlu1 %3608, %v4134_v26  }
 0x1f0   :  { %1016 = vperm.xlu1 %3608, %v4139_v28  }
 0x1f4   :  { %1020 = vperm.xlu1 %3608, %v4144_v30  }
 0x1f8   :  { %1024 = vperm.xlu1 %3608, %v4147_v31  }
 0x1fc   :  { %1028 = vperm.xlu1 %3608, %v4152_v33  }
 0x1ff   :  { %v4433_v5 = vpop.xlane.xlu0 %291 }
 0x200   :  { %6409 = vst [vmem:[#allocation63_spill] sm:$0xff] %v4433_v5  ;;  %v4437_v58 = vrot.slane %v4433_v5, %v4237_v11  ;;  %3611 = vset.pattern.permute.xlu1 %v6408_v45 }
 0x202   :  { %v322_v3 = vsub.f32 %v4129_v24, %v4437_v58  ;;  %v321_v9 = vsub.f32 %v4122_v22, %v4437_v58  ;;  %v324_v15 = vsub.f32 %v4142_v29, %v4437_v58  ;;  %v323_v0 = vsub.f32 %v4136_v27, %v4437_v58 }
 0x203   :  { %v326_v1 = vsub.f32 %v4155_v34, %v4437_v58  ;;  %v325_v61 = vsub.f32 %v4149_v32, %v4437_v58  ;;  %v328_v5 = vsub.f32 %v4163_v36, %v4437_v58 }
 0x204   :  { %v338_v53 = vmin.f32 %v322_v3, 0.0  ;;  %v337_v57 = vmin.f32 %v321_v9, 0.0  ;;  %v340_v51 = vmin.f32 %v324_v15, 0.0  ;;  %v339_v60 = vmin.f32 %v323_v0, 0.0 }
 0x205   :  { %v342_v63 = vmin.f32 %v326_v1, 0.0  ;;  %v341_v55 = vmin.f32 %v325_v61, 0.0  ;;  %v327_v3 = vsub.f32 %v4159_v35, %v4437_v58  ;;  %v344_v15 = vmin.f32 %v328_v5, 0.0  ;;  %v296_v61 = vpop.xlane.xlu1 %295 }
 0x206   :  { %v355_v45 = vmul.f32 1.442695, %v338_v53  ;;  %v353_v10 = vmul.f32 1.442695, %v337_v57  ;;  %v359_v62 = vmul.f32 1.442695, %v340_v51  ;;  %v330_v0 = vsub.f32 %v4170_v38, %v4437_v58 }
 0x207   :  { %v357_v4 = vmul.f32 1.442695, %v339_v60  ;;  %v363_v9 = vmul.f32 1.442695, %v342_v63  ;;  %v361_v53 = vmul.f32 1.442695, %v341_v55  ;;  %v329_v1 = vsub.f32 %v4166_v37, %v4437_v58 }
 0x208   :  { %3634 = vpow2.f32 %v355_v45  ;;  %v343_v57 = vmin.f32 %v327_v3, 0.0  ;;  %v346_v51 = vmin.f32 %v330_v0, 0.0  ;;  %v332_v60 = vsub.f32 %v4177_v40, %v4437_v58 }
 0x209   :  { %3636 = vpow2.f32 %v353_v10  ;;  %v367_v45 = vmul.f32 1.442695, %v344_v15  ;;  %v345_v10 = vmin.f32 %v329_v1, 0.0  ;;  %v331_v63 = vsub.f32 %v4173_v39, %v4437_v58 }
 0x20a   :  { %3638 = vpow2.f32 %v359_v62  ;;  %v365_v62 = vmul.f32 1.442695, %v343_v57  ;;  %v371_v55 = vmul.f32 1.442695, %v346_v51  ;;  %v348_v5 = vmin.f32 %v332_v60, 0.0 }
 0x20b   :  { %3640 = vpow2.f32 %v357_v4  ;;  %v4465_v4 = vrot.slane %v296_v61, %v4237_v11  ;;  %v369_v3 = vmul.f32 1.442695, %v345_v10  ;;  %v334_v0 = vsub.f32 %v4184_v42, %v4437_v58 }
 0x20c   :  { %3642 = vpow2.f32 %v363_v9  ;;  %v347_v50 = vmin.f32 %v331_v63, 0.0  ;;  %v333_v9 = vsub.f32 %v4180_v41, %v4437_v58  ;;  %v375_v11 = vmul.f32 1.442695, %v348_v5 }
 0x20d   :  { %3644 = vpow2.f32 %v361_v53  ;;  %vm302_vm2 = vcmp.le.f32.partialorder %v4098_v13, %v4465_v4  ;;  %vm301_vm4 = vcmp.le.f32.partialorder %v4095_v12, %v4465_v4  ;;  %v350_v1 = vmin.f32 %v334_v0, 0.0 }
 0x20e   :  { %3646 = vpow2.f32 %v367_v45  ;;  %v336_v51 = vsub.f32 %v4198_v47, %v4437_v58  ;;  %v373_v45 = vmul.f32 1.442695, %v347_v50  ;;  %v349_v10 = vmin.f32 %v333_v9, 0.0 }
 0x20f   :  { %3648 = vpow2.f32 %v365_v62  ;;  %v335_v62 = vsub.f32 %v4187_v43, %v4437_v58  ;;  %vm304_vm13 = vcmp.le.f32.partialorder %v4105_v16, %v4465_v4  ;;  %vm303_vm14 = vcmp.le.f32.partialorder %v4101_v14, %v4465_v4 }
 0x210   :  { %3650 = vpow2.f32 %v371_v55  ;;  %v379_v5 = vmul.f32 1.442695, %v350_v1  ;;  %v377_v50 = vmul.f32 1.442695, %v349_v10  ;;  %vm306_vm15 = vcmp.le.f32.partialorder %v4111_v18, %v4465_v4 }
 0x211   :  { %3652 = vpow2.f32 %v369_v3  ;;  %v352_v3 = vmin.f32 %v336_v51, 0.0  ;;  %v351_v9 = vmin.f32 %v335_v62, 0.0  ;;  %vm305_vm1 = vcmp.le.f32.partialorder %v4108_v17, %v4465_v4 }
 0x212   :  { %3654 = vpow2.f32 %v375_v11 }
 0x213   :  { %3656 = vpow2.f32 %v373_v45  ;;  %v381_v51 = vmul.f32 1.442695, %v351_v9 }
 0x214   :  { %3658 = vpow2.f32 %v379_v5 }
 0x215   :  { %v3635_v15 = vpop.eup %3634  ;;  %3660 = vpow2.f32 %v377_v50 }
 0x216   :  { %v3637_v53 = vpop.eup %3636  ;;  %v386_v57 = vsel %vm302_vm2, %v3635_v15, 0.0  ;;  %vm308_vm2 = vcmp.le.f32.partialorder %v4117_v20, %v4465_v4 }
 0x217   :  { %v3639_v60 = vpop.eup %3638  ;;  %424 = vperm.xlu1 %3611, %v386_v57   ;;  %v385_v61 = vsel %vm301_vm4, %v3637_v53, 0.0  ;;  %v383_v57 = vmul.f32 1.442695, %v352_v3  ;;  %vm307_vm4 = vcmp.le.f32.partialorder %v4114_v19, %v4465_v4 }
 0x218   :  { %v3641_v63 = vpop.eup %3640  ;;  %419 = vperm.xlu0 %3610, %v385_v61   ;;  %v388_v55 = vsel %vm304_vm13, %v3639_v60, 0.0  ;;  %vm310_vm13 = vcmp.le.f32.partialorder %v4126_v23, %v4465_v4 }
 0x219   :  { %v3643_v0 = vpop.eup %3642  ;;  %v387_v15 = vsel %vm303_vm14, %v3641_v63, 0.0  ;;  %3662 = vpow2.f32 %v383_v57  ;;  %vm309_vm14 = vcmp.le.f32.partialorder %v4120_v21, %v4465_v4 }
 0x21a   :  { %v3645_v53 = vpop.eup %3644  ;;  %v390_v58 = vsel %vm306_vm15, %v3643_v0, 0.0  ;;  %3664 = vpow2.f32 %v381_v51  ;;  %vm312_vm15 = vcmp.le.f32.partialorder %v4134_v26, %v4465_v4 }
 0x21b   :  { %434 = vperm.xlu1 %3611, %v388_v55   ;;  %v3647_v11 = vpop.eup %3646  ;;  %v389_v1 = vsel %vm305_vm1, %v3645_v53, 0.0  ;;  %vm311_vm1 = vcmp.le.f32.partialorder %v4131_v25, %v4465_v4 }
 0x21c   :  { %429 = vperm.xlu0 %3610, %v387_v15   ;;  %v3649_v60 = vpop.eup %3648  ;;  %v392_v45 = vsel %vm308_vm2, %v3647_v11, 0.0  ;;  %vm314_vm2 = vcmp.le.f32.partialorder %v4144_v30, %v4465_v4 }
 0x21d   :  { %v3651_v61 = vpop.eup %3650  ;;  %v391_v62 = vsel %vm307_vm4, %v3649_v60, 0.0  ;;  %vm313_vm4 = vcmp.le.f32.partialorder %v4139_v28, %v4465_v4  ;;  %v6410_v60 = vmov 1  }
 0x21e   :  { %v3653_v10 = vpop.eup %3652  ;;  %v394_v63 = vsel %vm310_vm13, %v3651_v61, 0.0  ;;  %vm316_vm13 = vcmp.le.f32.partialorder %v4152_v33, %v4465_v4 }
 0x21f   :  { %444 = vperm.xlu1 %3611, %v390_v58   ;;  %v3655_v55 = vpop.eup %3654  ;;  %v393_v5 = vsel %vm309_vm14, %v3653_v10, 0.0  ;;  %vm315_vm14 = vcmp.le.f32.partialorder %v4147_v31, %v4465_v4 }
 0x220   :  { %439 = vperm.xlu0 %3610, %v389_v1   ;;  %v3657_v3 = vpop.eup %3656  ;;  %v396_v0 = vsel %vm312_vm15, %v3655_v55, 0.0 }
 0x221   :  { %v3659_v15 = vpop.eup %3658  ;;  %v395_v50 = vsel %vm311_vm1, %v3657_v3, 0.0 }
 0x222   :  { %v3661_v9 = vpop.eup %3660  ;;  %v398_v53 = vsel %vm314_vm2, %v3659_v15, 0.0 }
 0x223   :  { %454 = vperm.xlu1 %3611, %v392_v45   ;;  %v397_v57 = vsel %vm313_vm4, %v3661_v9, 0.0 }
 0x224   :  { %449 = vperm.xlu0 %3610, %v391_v62  }
 0x226   :  { %v3663_v58 = vpop.eup %3662 }
 0x227   :  { %464 = vperm.xlu1 %3611, %v394_v63   ;;  %v3665_v11 = vpop.eup %3664  ;;  %v400_v1 = vsel %vm316_vm13, %v3663_v58, 0.0 }
 0x228   :  { %459 = vperm.xlu0 %3610, %v393_v5   ;;  %v399_v51 = vsel %vm315_vm14, %v3665_v11, 0.0 }
 0x22b   :  { %474 = vperm.xlu1 %3611, %v396_v0  }
 0x22c   :  { %469 = vperm.xlu0 %3610, %v395_v50  }
 0x22f   :  { %484 = vperm.xlu1 %3611, %v398_v53  }
 0x230   :  { %479 = vperm.xlu0 %3610, %v397_v57  }
 0x233   :  { %494 = vperm.xlu1 %3611, %v400_v1  }
 0x234   :  { %489 = vperm.xlu0 %3610, %v399_v51  }
 0x237   :  { %3612 = vset.pattern.permute.xlu1 %v6410_v60 }
 0x238   :  { %3613 = vset.pattern.permute.xlu0 %v6410_v60 }
 0x23c   :  { %v4509_v61 = vpop.xlane.xlu1 %699 }
 0x23d   :  { %6411 = vst [vmem:[#allocation64_spill] sm:$0xff] %v4509_v61  ;;  %v4513_v45 = vrot.slane %v4509_v61, %v4330_v54 }
 0x23f   :  { %v730_v10 = vsub.f32 %v4129_v24, %v4513_v45  ;;  %v729_v62 = vsub.f32 %v4122_v22, %v4513_v45  ;;  %v735_v63 = vsub.f32 %v4159_v35, %v4513_v45  ;;  %v731_v55 = vsub.f32 %v4136_v27, %v4513_v45 }
 0x240   :  { %v4519_v4 = vpop.permute.xlu1 %968  ;;  %v737_v50 = vsub.f32 %v4166_v37, %v4513_v45  ;;  %v732_v58 = vsub.f32 %v4142_v29, %v4513_v45 }
 0x241   :  { %v746_v5 = vmin.f32 %v730_v10, 0.0  ;;  %v745_v3 = vmin.f32 %v729_v62, 0.0  ;;  %v751_v0 = vmin.f32 %v735_v63, 0.0  ;;  %v747_v15 = vmin.f32 %v731_v55, 0.0 }
 0x242   :  { %v753_v51 = vmin.f32 %v737_v50, 0.0  ;;  %v748_v60 = vmin.f32 %v732_v58, 0.0  ;;  %v739_v62 = vsub.f32 %v4173_v39, %v4513_v45 }
 0x243   :  { %v763_v9 = vmul.f32 1.442695, %v746_v5  ;;  %v761_v53 = vmul.f32 1.442695, %v745_v3  ;;  %v773_v11 = vmul.f32 1.442695, %v751_v0  ;;  %v733_v5 = vsub.f32 %v4149_v32, %v4513_v45 }
 0x244   :  { %v4529_v57 = vpop.permute.xlu1 %972  ;;  %v765_v1 = vmul.f32 1.442695, %v747_v15  ;;  %v777_v10 = vmul.f32 1.442695, %v753_v51  ;;  %v767_v55 = vmul.f32 1.442695, %v748_v60  ;;  %v741_v0 = vsub.f32 %v4180_v41, %v4513_v45 }
 0x245   :  { %6412 = vst [vmem:[#allocation65_spill] sm:$0xff] %v4529_v57  ;;  %3666 = vpow2.f32 %v763_v9  ;;  %v755_v3 = vmin.f32 %v739_v62, 0.0  ;;  %v4540_v15 = vsub.s32 2, %v4232_v6  ;;  %v749_v50 = vmin.f32 %v733_v5, 0.0  ;;  %v704_v9 = vpop.xlane.xlu0 %703 }
 0x246   :  { %3668 = vpow2.f32 %v761_v53  ;;  %v757_v58 = vmin.f32 %v741_v0, 0.0  ;;  %v743_v60 = vsub.f32 %v4187_v43, %v4513_v45  ;;  %v4549_v61 = vrot.slane %v704_v9, %v4330_v54 }
 0x247   :  { %3670 = vpow2.f32 %v773_v11  ;;  %v781_v53 = vmul.f32 1.442695, %v755_v3  ;;  %v734_v11 = vsub.f32 %v4155_v34, %v4513_v45  ;;  %v769_v51 = vmul.f32 1.442695, %v749_v50 }
 0x248   :  { %v4533_v63 = vpop.permute.xlu1 %976  ;;  %3672 = vpow2.f32 %v765_v1  ;;  %v736_v5 = vsub.f32 %v4163_v36, %v4513_v45  ;;  %v785_v3 = vmul.f32 1.442695, %v757_v58  ;;  %v759_v0 = vmin.f32 %v743_v60, 0.0 }
 0x249   :  { %6413 = vst [vmem:[#allocation66_spill] sm:$0xff] %v4533_v63  ;;  %3674 = vpow2.f32 %v777_v10  ;;  %v750_v62 = vmin.f32 %v734_v11, 0.0  ;;  %v4555_v10 = vrot.slane %v4089_v8, %v4540_v15  ;;  %v738_v11 = vsub.f32 %v4170_v38, %v4513_v45 }
 0x24a   :  { %3676 = vpow2.f32 %v767_v55  ;;  %v752_v50 = vmin.f32 %v736_v5, 0.0  ;;  %vm710_vm1 = vcmp.le.f32.partialorder %v4098_v13, %v4549_v61  ;;  %vm709_vm2 = vcmp.le.f32.partialorder %v4095_v12, %v4549_v61 }
 0x24b   :  { %3678 = vpow2.f32 %v781_v53  ;;  %v771_v55 = vmul.f32 1.442695, %v750_v62  ;;  %vm1036_vm15 = vcmp.lt.f32.partialorder %v4529_v57, %v4555_v10  ;;  %v789_v58 = vmul.f32 1.442695, %v759_v0 }
 0x24c   :  { %v4544_v1 = vpop.permute.xlu1 %980  ;;  %3680 = vpow2.f32 %v769_v51  ;;  %v740_v51 = vsub.f32 %v4177_v40, %v4513_v45  ;;  %v775_v38 = vmul.f32 1.442695, %v752_v50  ;;  %v754_v36 = vmin.f32 %v738_v11, 0.0 }
 0x24d   :  { %6414 = vst [vmem:[#allocation67_spill] sm:$0xff] %v4544_v1  ;;  %3682 = vpow2.f32 %v785_v3  ;;  %vm715_vm4 = vcmp.le.f32.partialorder %v4114_v19, %v4549_v61  ;;  %vm1035_vm13 = vcmp.lt.f32.partialorder %v4519_v4, %v4555_v10  ;;  %v6416_v3 = vmov 0.0  }
 0x24e   :  { %3684 = vpow2.f32 %v771_v55  ;;  %v3495_v0 = vsel %vm1036_vm15, 1.0, %v6416_v3  ;;  %vm1037_vm14 = vcmp.lt.f32.partialorder %v4533_v63, %v4555_v10  ;;  %v756_v50 = vmin.f32 %v740_v51, 0.0 }
 0x24f   :  { %3686 = vpow2.f32 %v789_v58  ;;  %vm717_vm15 = vcmp.le.f32.partialorder %v4120_v21, %v4549_v61 }
 0x250   :  { %v4557_v6 = vpop.permute.xlu1 %984  ;;  %3688 = vpow2.f32 %v775_v38  ;;  %v3496_v38 = vsel %vm1037_vm14, 1.0, %v6416_v3  ;;  %vm719_vm14 = vcmp.le.f32.partialorder %v4131_v25, %v4549_v61 }
 0x251   :  { %6415 = vst [vmem:[#allocation68_spill] sm:$0xff] %v4557_v6 }
 0x252   :  { %v3667_v54 = vpop.eup %3666 }
 0x253   :  { %v3669_v9 = vpop.eup %3668  ;;  %v794_v53 = vsel %vm710_vm1, %v3667_v54, 0.0  ;;  %vm711_vm1 = vcmp.le.f32.partialorder %v4101_v14, %v4549_v61  ;;  %v3494_v14 = vsel %vm1035_vm13, 1.0, %v6416_v3  ;;  %vm1039_vm13 = vcmp.lt.f32.partialorder %v4557_v6, %v4555_v10 }
 0x254   :  { %v3671_v60 = vpop.eup %3670  ;;  %832 = vperm.xlu0 %3613, %v794_v53   ;;  %v793_v62 = vsel %vm709_vm2, %v3669_v9, 0.0  ;;  %v4569_v5 = vpop.permute.xlu1 %988  ;;  %vm1038_vm2 = vcmp.lt.f32.partialorder %v4544_v1, %v4555_v10  ;;  %v779_v53 = vmul.f32 1.442695, %v754_v36  ;;  %v1083_v58 = vadd.f32 %v3495_v0, %v3494_v14 }
 0x255   :  { %v3673_v43 = vpop.eup %3672  ;;  %827 = vperm.xlu1 %3612, %v793_v62   ;;  %v799_v55 = vsel %vm715_vm4, %v3671_v60, 0.0  ;;  %v742_v62 = vsub.f32 %v4184_v42, %v4513_v45  ;;  %v3497_v36 = vsel %vm1038_vm2, 1.0, %v6416_v3  ;;  %vm712_vm4 = vcmp.le.f32.partialorder %v4105_v16, %v4549_v61 }
 0x256   :  { %v3675_v11 = vpop.eup %3674  ;;  %v795_v54 = vsel %vm711_vm1, %v3673_v43, 0.0  ;;  %vm1040_vm1 = vcmp.lt.f32.partialorder %v4569_v5, %v4555_v10  ;;  %v783_v43 = vmul.f32 1.442695, %v756_v50  ;;  %3690 = vpow2.f32 %v779_v53 }
 0x257   :  { %v3677_v57 = vpop.eup %3676  ;;  %v801_v14 = vsel %vm717_vm15, %v3675_v11, 0.0  ;;  %v1084_v63 = vadd.f32 %v3496_v38, %v1083_v58  ;;  %v3498_v6 = vsel %vm1039_vm13, 1.0, %v6416_v3  ;;  %vm713_vm2 = vcmp.le.f32.partialorder %v4108_v17, %v4549_v61 }
 0x258   :  { %857 = vperm.xlu0 %3613, %v799_v55   ;;  %v4585_v9 = vpop.permute.xlu1 %992  ;;  %v3679_v51 = vpop.eup %3678  ;;  %v796_v60 = vsel %vm712_vm4, %v3677_v57, 0.0  ;;  %v758_v55 = vmin.f32 %v742_v62, 0.0  ;;  %v3499_v57 = vsel %vm1040_vm1, 1.0, %v6416_v3  ;;  %3692 = vpow2.f32 %v783_v43 }
 0x259   :  { %837 = vperm.xlu1 %3612, %v795_v54   ;;  %v744_v54 = vsub.f32 %v4198_v47, %v4513_v45  ;;  %v3681_v1 = vpop.eup %3680  ;;  %v1085_v50 = vadd.f32 %v3497_v36, %v1084_v63  ;;  %vm1041_vm15 = vcmp.lt.f32.partialorder %v4585_v9, %v4555_v10  ;;  %v803_v45 = vsel %vm719_vm14, %v3679_v51, 0.0  ;;  %v4633_v43 = vpop.permute.xlu0 %1000 }
 0x25a   :  { %v3683_v11 = vpop.eup %3682  ;;  %v797_v53 = vsel %vm713_vm2, %v3681_v1, 0.0  ;;  %v787_v58 = vmul.f32 1.442695, %v758_v55  ;;  %v3500_v63 = vsel %vm1041_vm15, 1.0, %v6416_v3  ;;  %vm721_vm13 = vcmp.le.f32.partialorder %v4139_v28, %v4549_v61 }
 0x25b   :  { %v760_v38 = vmin.f32 %v744_v54, 0.0  ;;  %v805_v51 = vsel %vm721_vm13, %v3683_v11, 0.0  ;;  %vm714_vm1 = vcmp.le.f32.partialorder %v4111_v18, %v4549_v61  ;;  %vm723_vm14 = vcmp.le.f32.partialorder %v4147_v31, %v4549_v61 }
 0x25c   :  { %867 = vperm.xlu0 %3613, %v801_v14   ;;  %v4609_v0 = vpop.permute.xlu1 %996  ;;  %v3685_v14 = vpop.eup %3684  ;;  %3694 = vpow2.f32 %v787_v58  ;;  %vm1043_vm2 = vcmp.lt.f32.partialorder %v4633_v43, %v4555_v10  ;;  %vm716_vm15 = vcmp.le.f32.partialorder %v4117_v20, %v4549_v61 }
 0x25d   :  { %842 = vperm.xlu1 %3612, %v796_v60   ;;  %v1086_v60 = vadd.f32 %v3498_v6, %v1085_v50  ;;  %vm1042_vm4 = vcmp.lt.f32.partialorder %v4609_v0, %v4555_v10  ;;  %v3687_v1 = vpop.eup %3686  ;;  %v798_v6 = vsel %vm714_vm1, %v3685_v14, 0.0  ;;  %v791_v50 = vmul.f32 1.442695, %v760_v38 }
 0x25e   :  { %v3501_v55 = vsel %vm1042_vm4, 1.0, %v6416_v3  ;;  %v807_v11 = vsel %vm723_vm14, %v3687_v1, 0.0  ;;  %v3502_v38 = vsel %vm1043_vm2, 1.0, %v6416_v3  ;;  %vm718_vm1 = vcmp.le.f32.partialorder %v4126_v23, %v4549_v61 }
 0x25f   :  { %v1087_v36 = vadd.f32 %v3499_v57, %v1086_v60  ;;  %3696 = vpow2.f32 %v791_v50 }
 0x260   :  { %877 = vperm.xlu0 %3613, %v803_v45   ;;  %v4624_v62 = vpop.permute.xlu1 %1004  ;;  %v3689_v45 = vpop.eup %3688 }
 0x261   :  { %847 = vperm.xlu1 %3612, %v797_v53   ;;  %v1088_v53 = vadd.f32 %v3500_v63, %v1087_v36  ;;  %v800_v14 = vsel %vm716_vm15, %v3689_v45, 0.0  ;;  %vm1044_vm4 = vcmp.lt.f32.partialorder %v4624_v62, %v4555_v10  ;;  %vm720_vm15 = vcmp.le.f32.partialorder %v4134_v26, %v4549_v61 }
 0x262   :  { %v3503_v36 = vsel %vm1044_vm4, 1.0, %v6416_v3 }
 0x263   :  { %v1089_v57 = vadd.f32 %v3501_v55, %v1088_v53  ;;  %v3691_v58 = vpop.eup %3690  ;;  %v6419_v55 = vmov 2  }
 0x264   :  { %887 = vperm.xlu0 %3613, %v805_v51   ;;  %v4636_v54 = vpop.permute.xlu1 %1008  ;;  %v802_v51 = vsel %vm718_vm1, %v3691_v58, 0.0 }
 0x265   :  { %852 = vperm.xlu1 %3612, %v798_v6   ;;  %v1090_v63 = vadd.f32 %v3502_v38, %v1089_v57  ;;  %vm1045_vm13 = vcmp.lt.f32.partialorder %v4636_v54, %v4555_v10  ;;  %v3693_v6 = vpop.eup %3692 }
 0x266   :  { %v3504_v50 = vsel %vm1045_vm13, 1.0, %v6416_v3  ;;  %v804_v57 = vsel %vm720_vm15, %v3693_v6, 0.0  ;;  %vm722_vm13 = vcmp.le.f32.partialorder %v4144_v30, %v4549_v61  ;;  %vm1107_vm15 = vcmask 1042434  }
 0x267   :  { %v1091_v45 = vadd.f32 %v3503_v36, %v1090_v63 }
 0x268   :  { %897 = vperm.xlu0 %3613, %v807_v11   ;;  %v4644_v60 = vpop.permute.xlu1 %1012 }
 0x269   :  { %6417 = vst [vmem:[#allocation69_spill] sm:$0xff] %v4644_v60  ;;  %862 = vperm.xlu1 %3612, %v800_v14   ;;  %vm1046_vm14 = vcmp.lt.f32.partialorder %v4644_v60, %v4555_v10  ;;  %v3695_v14 = vpop.eup %3694  ;;  %v1092_v58 = vadd.f32 %v3504_v50, %v1091_v45 }
 0x26a   :  { %v3505_v53 = vsel %vm1046_vm14, 1.0, %v6416_v3  ;;  %vm724_vm14 = vcmp.le.f32.partialorder %v4152_v33, %v4549_v61 }
 0x26b   :  { %v1093_v63 = vadd.f32 %v3505_v53, %v1092_v58 }
 0x26c   :  { %v4654_v1 = vpop.permute.xlu1 %1016  ;;  %3615 = vset.pattern.permute.xlu0 %v6419_v55  ;;  %v3697_v6 = vpop.eup %3696 }
 0x26d   :  { %6418 = vst [vmem:[#allocation70_spill] sm:$0xff] %v4654_v1  ;;  %872 = vperm.xlu1 %3612, %v802_v51   ;;  %vm1047_vm2 = vcmp.lt.f32.partialorder %v4654_v1, %v4555_v10  ;;  %v806_v51 = vsel %vm722_vm13, %v3695_v14, 0.0  ;;  %v808_v53 = vsel %vm724_vm14, %v3697_v6, 0.0  ;;  %vm401_vm13 = vcmp.ge.f32.partialorder %v4207_v52, %v4245_v49 }
 0x26e   :  { %v3506_v38 = vsel %vm1047_vm2, 1.0, %v6416_v3  ;;  %vm403_vm14 = vcmp.ge.f32.partialorder %v4212_v56, %v4245_v49 }
 0x26f   :  { %v1094_v60 = vadd.f32 %v3506_v38, %v1093_v63 }
 0x270   :  { %v4665_v11 = vpop.permute.xlu1 %1020 }
 0x271   :  { %6420 = vst [vmem:[#allocation71_spill] sm:$0xff] %v4665_v11  ;;  %882 = vperm.xlu1 %3612, %v804_v57   ;;  %vm1048_vm4 = vcmp.lt.f32.partialorder %v4665_v11, %v4555_v10 }
 0x272   :  { %v3507_v36 = vsel %vm1048_vm4, 1.0, %v6416_v3 }
 0x273   :  { %v1095_v45 = vadd.f32 %v3507_v36, %v1094_v60 }
 0x274   :  { %v4673_v1 = vpop.permute.xlu1 %1024 }
 0x275   :  { %6421 = vst [vmem:[#allocation72_spill] sm:$0xff] %v4673_v1  ;;  %892 = vperm.xlu1 %3612, %v806_v51   ;;  %vm1049_vm1 = vcmp.lt.f32.partialorder %v4673_v1, %v4555_v10 }
 0x276   :  { %v3508_v50 = vsel %vm1049_vm1, 1.0, %v6416_v3  ;;  %vm402_vm1 = vcmp.ge.f32.partialorder %v4241_v48, %v4245_v49 }
 0x277   :  { %v1096_v58 = vadd.f32 %v3508_v50, %v1095_v45 }
 0x278   :  { %v4680_v57 = vpop.permute.xlu1 %1028 }
 0x279   :  { %902 = vperm.xlu1 %3612, %v808_v53   ;;  %vm1050_vm2 = vcmp.lt.f32.partialorder %v4680_v57, %v4555_v10 }
 0x27a   :  { %v3509_v14 = vsel %vm1050_vm2, 1.0, %v6416_v3  ;;  %vm404_vm2 = vcmp.ge.f32.partialorder %v4217_v59, %v4245_v49 }
 0x27b   :  { %v1097_v38 = vadd.f32 %v3509_v14, %v1096_v58 }
 0x27d   :  { %v1098_v63 = vrot.slane %v1097_v38, 4  ;;  %3614 = vset.pattern.permute.xlu1 %v6419_v55 }
 0x27f   :  { %v1099_v51 = vadd.f32 %v1098_v63, %v1097_v38 }
 0x281   :  { %v1100_v1 = vrot.slane %v1099_v51, 2 }
 0x283   :  { %v1101_v60 = vadd.f32 %v1100_v1, %v1099_v51  ;;  %v4703_v51 = vld [vmem:[#allocation2] sm:$0xff] }
 0x284   :  { %6423 = vst [vmem:[#allocation74_spill] sm:$0xff] %v4703_v51 }
 0x285   :  { %v1102_v36 = vrot.slane %v1101_v60, 1 }
 0x287   :  { %v4686_v11 = vadd.f32 %v1102_v36, %v1101_v60 }
 0x289   :  { %6422 = vst [vmem:[#allocation73_spill] sm:$0xff] %v4686_v11  ;;  %vm1105_vm4 = vcmp.lt.f32.partialorder %v4686_v11, %v4190_v44 }
 0x28a   :  { %v1111_v61 = vsel %vm1105_vm4, %v4089_v8, -1e+09  ;;  %v1106_v52 = vsel %vm1105_vm4, %v4703_v51, -1e+30  ;;  %vm407_vm4 = vcmp.ge.f32.partialorder %v4239_v46, %v4245_v49 }
 0x28b   :  { %v1112_v6 = vsel %vm1107_vm15, %v1111_v61, -inf }
 0x28c   :  { %1113 = vmax.xlane.f32.xlu0 %v1112_v6  ;;  %v1108_v6 = vsel %vm1107_vm15, %v1106_v52, -inf  ;;  %v6425_v52 = vld [vmem:[#allocation36_spill] sm:$0xff] }
 0x292   :  { %v425_v50 = vpop.permute.xlu1 %424 }
 0x293   :  { %v420_v1 = vpop.permute.xlu0 %419  ;;  %v498_v45 = vsel %vm402_vm1, %v425_v50, 0.0  ;;  %vm406_vm1 = vcmp.ge.f32.partialorder %v4234_v7, %v4245_v49 }
 0x294   :  { %v497_v55 = vsel %vm401_vm13, %v420_v1, 0.0  ;;  %vm405_vm13 = vcmp.ge.f32.partialorder %v4227_v2, %v4245_v49  ;;  %v6424_v2 = vld [vmem:[#allocation35_spill] sm:$0xff] }
 0x295   :  { %v513_v58 = vadd.f32 %v498_v45, %v497_v55 }
 0x296   :  { %v435_v53 = vpop.permute.xlu1 %434 }
 0x297   :  { %v430_v14 = vpop.permute.xlu0 %429  ;;  %v500_v48 = vsel %vm404_vm2, %v435_v53, 0.0  ;;  %vm409_vm2 = vcmp.ge.f32.partialorder %v6425_v52, %v4245_v49  ;;  %v6430_v52 = vld [vmem:[#allocation41_spill] sm:$0xff] }
 0x298   :  { %v499_v38 = vsel %vm403_vm14, %v430_v14, 0.0  ;;  %vm408_vm14 = vcmp.ge.f32.partialorder %v6424_v2, %v4245_v49  ;;  %v6429_v2 = vld [vmem:[#allocation40_spill] sm:$0xff] }
 0x299   :  { %v514_v63 = vadd.f32 %v513_v58, %v499_v38 }
 0x29a   :  { %v445_v60 = vpop.permute.xlu1 %444 }
 0x29b   :  { %v515_v36 = vadd.f32 %v514_v63, %v500_v48  ;;  %v440_v56 = vpop.permute.xlu0 %439  ;;  %v502_v59 = vsel %vm406_vm1, %v445_v60, 0.0 }
 0x29c   :  { %v501_v61 = vsel %vm405_vm13, %v440_v56, 0.0 }
 0x29d   :  { %v516_v50 = vadd.f32 %v515_v36, %v501_v61  ;;  %1109 = vmax.xlane.f32.xlu1 %v1108_v6  ;;  %v6426_v36 = vld [vmem:[#allocation37_spill] sm:$0xff]  ;;  %v6427_v6 = vld [vmem:[#allocation38_spill] sm:$0xff] }
 0x29e   :  { %v455_v1 = vpop.permute.xlu1 %454  ;;  %vm410_vm13 = vcmp.ge.f32.partialorder %v6426_v36, %v4245_v49  ;;  %vm411_vm1 = vcmp.ge.f32.partialorder %v6427_v6, %v4245_v49  ;;  %v6432_v6 = vld [vmem:[#allocation43_spill] sm:$0xff] }
 0x29f   :  { %v517_v55 = vadd.f32 %v516_v50, %v502_v59  ;;  %v450_v45 = vpop.permute.xlu0 %449  ;;  %v504_v14 = vsel %vm408_vm14, %v455_v1, 0.0  ;;  %vm413_vm14 = vcmp.ge.f32.partialorder %v6429_v2, %v4245_v49 }
 0x2a0   :  { %v503_v53 = vsel %vm407_vm4, %v450_v45, 0.0 }
 0x2a1   :  { %v518_v58 = vadd.f32 %v517_v55, %v503_v53  ;;  %v6428_v55 = vld [vmem:[#allocation39_spill] sm:$0xff] }
 0x2a2   :  { %v465_v38 = vpop.permute.xlu1 %464  ;;  %vm412_vm4 = vcmp.ge.f32.partialorder %v6428_v55, %v4245_v49 }
 0x2a3   :  { %v519_v63 = vadd.f32 %v518_v58, %v504_v14  ;;  %v460_v7 = vpop.permute.xlu0 %459  ;;  %v506_v56 = vsel %vm410_vm13, %v465_v38, 0.0 }
 0x2a4   :  { %v505_v48 = vsel %vm409_vm2, %v460_v7, 0.0  ;;  %vm414_vm2 = vcmp.ge.f32.partialorder %v6430_v52, %v4245_v49 }
 0x2a5   :  { %v520_v60 = vadd.f32 %v519_v63, %v505_v48 }
 0x2a6   :  { %v475_v46 = vpop.permute.xlu1 %474 }
 0x2a7   :  { %v521_v61 = vadd.f32 %v520_v60, %v506_v56  ;;  %v470_v50 = vpop.permute.xlu0 %469  ;;  %v508_v45 = vsel %vm412_vm4, %v475_v46, 0.0  ;;  %v6431_v60 = vld [vmem:[#allocation42_spill] sm:$0xff] }
 0x2a8   :  { %v507_v59 = vsel %vm411_vm1, %v470_v50, 0.0  ;;  %vm415_vm13 = vcmp.ge.f32.partialorder %v6431_v60, %v4245_v49  ;;  %vm416_vm1 = vcmp.ge.f32.partialorder %v6432_v6, %v4245_v49 }
 0x2a9   :  { %v522_v1 = vadd.f32 %v521_v61, %v507_v59 }
 0x2aa   :  { %v485_v53 = vpop.permute.xlu1 %484 }
 0x2ab   :  { %v523_v58 = vadd.f32 %v522_v1, %v508_v45  ;;  %v480_v14 = vpop.permute.xlu0 %479  ;;  %v510_v7 = vsel %vm414_vm2, %v485_v53, 0.0  ;;  %v6433_v53 = vld [vmem:[#allocation47_spill] sm:$0xff] }
 0x2ac   :  { %v509_v63 = vsel %vm413_vm14, %v480_v14, 0.0 }
 0x2ad   :  { %v524_v38 = vadd.f32 %v523_v58, %v509_v63  ;;  %v541_v63 = vmul.f32 -0.22314355, %v6433_v53 }
 0x2ae   :  { %v495_v56 = vpop.permute.xlu1 %494 }
 0x2af   :  { %v525_v48 = vadd.f32 %v524_v38, %v510_v7  ;;  %v490_v36 = vpop.permute.xlu0 %489  ;;  %v512_v50 = vsel %vm416_vm1, %v495_v56, 0.0  ;;  %v542_v52 = vmul.f32 1.442695, %v541_v63 }
 0x2b0   :  { %v511_v61 = vsel %vm415_vm13, %v490_v36, 0.0 }
 0x2b1   :  { %v526_v46 = vadd.f32 %v525_v48, %v511_v61  ;;  %v6434_v48 = vld [vmem:[#allocation63_spill] sm:$0xff]  ;;  %v4738_v61 = vadd.f32 -1.0, %v4190_v44 }
 0x2b3   :  { %v527_v59 = vadd.f32 %v526_v46, %v512_v50  ;;  %6435 = vst [vmem:[#allocation35_spill] sm:$0xff] %v4738_v61  ;;  %vm540_vm4 = vcmp.lt.f32.partialorder %v6433_v53, %v4738_v61 }
 0x2b5   :  { %v528_v1 = vrot.slane %v527_v59, 4 }
 0x2b7   :  { %v529_v55 = vadd.f32 %v528_v1, %v527_v59 }
 0x2b9   :  { %v530_v45 = vrot.slane %v529_v55, 2 }
 0x2bb   :  { %v531_v58 = vadd.f32 %v530_v45, %v529_v55 }
 0x2bd   :  { %v532_v2 = vrot.slane %v531_v58, 1 }
 0x2bf   :  { %v533_v14 = vadd.f32 %v532_v2, %v531_v58 }
 0x2c1   :  { %v535_v38 = vmax.f32 %v533_v14, 1e-30 }
 0x2c3   :  { %3698 = vlog2.f32 %v535_v38 }
 0x2c4   :  { %3700 = vpow2.f32 %v542_v52 }
 0x2cf   :  { %v4758_v14 = vpop.permute.xlu0 %832 }
 0x2d0   :  { %v3699_v7 = vpop.eup %3698  ;;  %v4744_v50 = vpop.permute.xlu1 %827 }
 0x2d1   :  { %v537_v60 = vmul.f32 0.6931472, %v3699_v7  ;;  %v3701_v56 = vpop.eup %3700 }
 0x2d3   :  { %v538_v36 = vadd.f32 %v537_v60, %v6434_v48  ;;  %v4762_v53 = vpop.permute.xlu0 %857 }
 0x2d4   :  { %v4746_v59 = vpop.permute.xlu1 %837 }
 0x2d5   :  { %v544_v49 = vsub.f32 %v4703_v51, %v538_v36 }
 0x2d7   :  { %v545_v46 = vmul.f32 %v3701_v56, %v544_v49  ;;  %v4766_v52 = vpop.permute.xlu0 %867 }
 0x2d8   :  { %v4748_v1 = vpop.permute.xlu1 %842 }
 0x2d9   :  { %v4742_v6 = vsel %vm540_vm4, %v545_v46, 0.0 }
 0x2da   :  { %6436 = vst [vmem:[#allocation36_spill] sm:$0xff] %v4742_v6 }
 0x2db   :  { %v4770_v60 = vpop.permute.xlu0 %877 }
 0x2dc   :  { %v4750_v55 = vpop.permute.xlu1 %847 }
 0x2df   :  { %v4790_v51 = vpop.permute.xlu0 %887 }
 0x2e0   :  { %v4752_v45 = vpop.permute.xlu1 %852 }
 0x2e4   :  { %v4754_v58 = vpop.permute.xlu1 %862 }
 0x2e8   :  { %v4756_v2 = vpop.permute.xlu1 %872 }
 0x2ec   :  { %v4760_v63 = vpop.permute.xlu1 %882 }
 0x2ed   :  { %6437 = vst [vmem:[#allocation37_spill] sm:$0xff] %v4760_v63 }
 0x2f0   :  { %v4764_v38 = vpop.permute.xlu1 %892 }
 0x2f1   :  { %6438 = vst [vmem:[#allocation38_spill] sm:$0xff] %v4764_v38 }
 0x2f4   :  { %v4768_v7 = vpop.permute.xlu1 %902 }
 0x2f5   :  { %6439 = vst [vmem:[#allocation39_spill] sm:$0xff] %v4768_v7 }
 0x326   :  { %v4772_v48 = vpop.xlane.xlu1 %1109 }
 0x327   :  { %6440 = vst [vmem:[#allocation40_spill] sm:$0xff] %v4772_v48  ;;  %v4776_v36 = vrot.slane %v4772_v48, %v4540_v15 }
 0x329   :  { %v1140_v49 = vsub.f32 %v4129_v24, %v4776_v36  ;;  %v1139_v56 = vsub.f32 %v4122_v22, %v4776_v36  ;;  %v1145_v46 = vsub.f32 %v4159_v35, %v4776_v36  ;;  %v1141_v6 = vsub.f32 %v4136_v27, %v4776_v36 }
 0x32a   :  { %v1147_v44 = vsub.f32 %v4166_v37, %v4776_v36  ;;  %v1142_v61 = vsub.f32 %v4142_v29, %v4776_v36  ;;  %v1149_v35 = vsub.f32 %v4173_v39, %v4776_v36  ;;  %v1143_v37 = vsub.f32 %v4149_v32, %v4776_v36  ;;  %v4796_v29 = vpop.permute.xlu0 %897 }
 0x32b   :  { %v1156_v48 = vmin.f32 %v1140_v49, 0.0  ;;  %v1155_v3 = vmin.f32 %v1139_v56, 0.0  ;;  %v1161_v24 = vmin.f32 %v1145_v46, 0.0  ;;  %v1157_v8 = vmin.f32 %v1141_v6, 0.0 }
 0x32c   :  { %v1163_v7 = vmin.f32 %v1147_v44, 0.0  ;;  %v1158_v63 = vmin.f32 %v1142_v61, 0.0  ;;  %v1165_v56 = vmin.f32 %v1149_v35, 0.0  ;;  %v1151_v44 = vsub.f32 %v4180_v41, %v4776_v36  ;;  %v6442_v35 = vld [vmem:[#allocation25_spill] sm:$0xff] }
 0x32d   :  { %v1173_v22 = vmul.f32 1.442695, %v1156_v48  ;;  %v1171_v11 = vmul.f32 1.442695, %v1155_v3  ;;  %v1183_v38 = vmul.f32 1.442695, %v1161_v24  ;;  %v1146_v46 = vsub.f32 %v6442_v35, %v4776_v36 }
 0x32e   :  { %v1175_v27 = vmul.f32 1.442695, %v1157_v8  ;;  %v1187_v49 = vmul.f32 1.442695, %v1163_v7  ;;  %v1177_v24 = vmul.f32 1.442695, %v1158_v63  ;;  %v1144_v8 = vsub.f32 %v4155_v34, %v4776_v36  ;;  %v1114_v61 = vpop.xlane.xlu0 %1113 }
 0x32f   :  { %3702 = vpow2.f32 %v1173_v22  ;;  %v1159_v3 = vmin.f32 %v1143_v37, 0.0  ;;  %v1191_v6 = vmul.f32 1.442695, %v1165_v56  ;;  %v1167_v48 = vmin.f32 %v1151_v44, 0.0  ;;  %v6441_v22 = vld [vmem:[#allocation32_spill] sm:$0xff]  ;;  %v6443_v56 = vld [vmem:[#allocation27_spill] sm:$0xff] }
 0x330   :  { %3704 = vpow2.f32 %v1171_v11  ;;  %v1153_v11 = vsub.f32 %v6441_v22, %v4776_v36  ;;  %v1160_v7 = vmin.f32 %v1144_v8, 0.0  ;;  %v1148_v44 = vsub.f32 %v6443_v56, %v4776_v36 }
 0x331   :  { %3706 = vpow2.f32 %v1183_v38  ;;  %v1179_v38 = vmul.f32 1.442695, %v1159_v3  ;;  %v1195_v37 = vmul.f32 1.442695, %v1167_v48  ;;  %v1150_v8 = vsub.f32 %v4177_v40, %v4776_v36 }
 0x332   :  { %3708 = vpow2.f32 %v1175_v27  ;;  %v4807_v27 = vrot.slane %v1114_v61, %v4540_v15  ;;  %v1169_v63 = vmin.f32 %v1153_v11, 0.0  ;;  %v1181_v34 = vmul.f32 1.442695, %v1160_v7 }
 0x333   :  { %3710 = vpow2.f32 %v1187_v49  ;;  %v1162_v49 = vmin.f32 %v1146_v46, 0.0  ;;  %v1164_v11 = vmin.f32 %v1148_v44, 0.0  ;;  %v6444_v46 = vld [vmem:[#allocation17_spill] sm:$0xff] }
 0x334   :  { %3712 = vpow2.f32 %v1177_v24  ;;  %vm1120_vm14 = vcmp.le.f32.partialorder %v4098_v13, %v4807_v27  ;;  %vm1119_vm2 = vcmp.le.f32.partialorder %v4095_v12, %v4807_v27  ;;  %v1199_v15 = vmul.f32 1.442695, %v1169_v63 }
 0x335   :  { %3714 = vpow2.f32 %v1191_v6  ;;  %v1185_v48 = vmul.f32 1.442695, %v1162_v49  ;;  %vm1125_vm13 = vcmp.le.f32.partialorder %v4114_v19, %v4807_v27  ;;  %vm1121_vm1 = vcmp.le.f32.partialorder %v6444_v46, %v4807_v27 }
 0x336   :  { %3716 = vpow2.f32 %v1179_v38  ;;  %vm1127_vm4 = vcmp.le.f32.partialorder %v4120_v21, %v4807_v27 }
 0x337   :  { %3718 = vpow2.f32 %v1195_v37 }
 0x338   :  { %3720 = vpow2.f32 %v1181_v34  ;;  %v1152_v34 = vsub.f32 %v4184_v42, %v4776_v36 }
 0x339   :  { %3722 = vpow2.f32 %v1199_v15 }
 0x33a   :  { %3724 = vpow2.f32 %v1185_v48 }
 0x33c   :  { %v3703_v41 = vpop.eup %3702 }
 0x33d   :  { %v3705_v24 = vpop.eup %3704  ;;  %v1204_v3 = vsel %vm1120_vm14, %v3703_v41, 0.0  ;;  %v1166_v41 = vmin.f32 %v1150_v8, 0.0  ;;  %vm1122_vm14 = vcmp.le.f32.partialorder %v4105_v16, %v4807_v27 }
 0x33e   :  { %v3707_v61 = vpop.eup %3706  ;;  %1242 = vperm.xlu0 %3615, %v1204_v3   ;;  %v1203_v6 = vsel %vm1119_vm2, %v3705_v24, 0.0  ;;  %v1189_v3 = vmul.f32 1.442695, %v1164_v11  ;;  %v1154_v24 = vsub.f32 %v4198_v47, %v4776_v36  ;;  %vm1129_vm2 = vcmp.le.f32.partialorder %v4131_v25, %v4807_v27 }
 0x33f   :  { %v3709_v38 = vpop.eup %3708  ;;  %1237 = vperm.xlu1 %3614, %v1203_v6   ;;  %v1209_v7 = vsel %vm1125_vm13, %v3707_v61, 0.0  ;;  %v1193_v61 = vmul.f32 1.442695, %v1166_v41  ;;  %v1168_v6 = vmin.f32 %v1152_v34, 0.0  ;;  %vm1123_vm13 = vcmp.le.f32.partialorder %v4108_v17, %v4807_v27 }
 0x340   :  { %v3711_v37 = vpop.eup %3710  ;;  %v1205_v63 = vsel %vm1121_vm1, %v3709_v38, 0.0  ;;  %3726 = vpow2.f32 %v1189_v3  ;;  %vm1131_vm1 = vcmp.le.f32.partialorder %v4139_v28, %v4807_v27 }
 0x341   :  { %v3713_v49 = vpop.eup %3712  ;;  %v1211_v44 = vsel %vm1127_vm4, %v3711_v37, 0.0  ;;  %3728 = vpow2.f32 %v1193_v61  ;;  %v1197_v36 = vmul.f32 1.442695, %v1168_v6  ;;  %v1170_v37 = vmin.f32 %v1154_v24, 0.0 }
 0x342   :  { %1267 = vperm.xlu0 %3615, %v1209_v7   ;;  %v3715_v15 = vpop.eup %3714  ;;  %v1206_v8 = vsel %vm1122_vm14, %v3713_v49, 0.0  ;;  %vm1124_vm4 = vcmp.le.f32.partialorder %v4111_v18, %v4807_v27  ;;  %vm1133_vm14 = vcmp.le.f32.partialorder %v4147_v31, %v4807_v27  ;;  %v4041_v61 = vmov 3  }
 0x343   :  { %1247 = vperm.xlu1 %3614, %v1205_v63   ;;  %v3717_v48 = vpop.eup %3716  ;;  %v1213_v11 = vsel %vm1129_vm2, %v3715_v15, 0.0  ;;  %3730 = vpow2.f32 %v1197_v36  ;;  %v1201_v49 = vmul.f32 1.442695, %v1170_v37  ;;  %vm1126_vm2 = vcmp.le.f32.partialorder %v4117_v20, %v4807_v27 }
 0x344   :  { %v3719_v38 = vpop.eup %3718  ;;  %v1207_v7 = vsel %vm1123_vm13, %v3717_v48, 0.0  ;;  %vm1128_vm13 = vcmp.le.f32.partialorder %v4126_v23, %v4807_v27 }
 0x345   :  { %v3721_v63 = vpop.eup %3720  ;;  %v1215_v41 = vsel %vm1131_vm1, %v3719_v38, 0.0  ;;  %3732 = vpow2.f32 %v1201_v49  ;;  %vm1130_vm1 = vcmp.le.f32.partialorder %v4134_v26, %v4807_v27  ;;  %v6447_v49 = vld [vmem:[#allocation44_spill] sm:$0xff] }
 0x346   :  { %1277 = vperm.xlu0 %3615, %v1211_v44   ;;  %v3723_v3 = vpop.eup %3722  ;;  %v1208_v34 = vsel %vm1124_vm4, %v3721_v63, 0.0  ;;  %vm1132_vm4 = vcmp.le.f32.partialorder %v4144_v30, %v4807_v27 }
 0x347   :  { %1252 = vperm.xlu1 %3614, %v1206_v8   ;;  %v3725_v44 = vpop.eup %3724  ;;  %v1217_v24 = vsel %vm1133_vm14, %v3723_v3, 0.0  ;;  %vm1134_vm14 = vcmp.le.f32.partialorder %v4152_v33, %v4807_v27  ;;  %v6445_v3 = vld [vmem:[#allocation50_spill] sm:$0xff] }
 0x348   :  { %v1210_v15 = vsel %vm1126_vm2, %v3725_v44, 0.0 }
 0x34a   :  { %1287 = vperm.xlu0 %3615, %v1213_v11  }
 0x34b   :  { %1257 = vperm.xlu1 %3614, %v1207_v7  }
 0x34d   :  { %v3727_v8 = vpop.eup %3726 }
 0x34e   :  { %1297 = vperm.xlu0 %3615, %v1215_v41   ;;  %v1212_v6 = vsel %vm1128_vm13, %v3727_v8, 0.0  ;;  %v3729_v48 = vpop.eup %3728  ;;  %vm809_vm13 = vcmp.ge.f32.partialorder %v6447_v49, %v6445_v3  ;;  %v6449_v8 = vld [vmem:[#allocation46_spill] sm:$0xff] }
 0x34f   :  { %1262 = vperm.xlu1 %3614, %v1208_v34   ;;  %v1214_v11 = vsel %vm1130_vm1, %v3729_v48, 0.0  ;;  %v6446_v34 = vld [vmem:[#allocation45_spill] sm:$0xff] }
 0x350   :  { %v3731_v38 = vpop.eup %3730  ;;  %vm810_vm2 = vcmp.ge.f32.partialorder %v6446_v34, %v6445_v3  ;;  %v6452_v34 = vld [vmem:[#allocation67_spill] sm:$0xff] }
 0x351   :  { %v1216_v7 = vsel %vm1132_vm4, %v3731_v38, 0.0  ;;  %v906_v44 = vsel %vm810_vm2, %v4758_v14, 0.0  ;;  %vm1219_vm4 = vcmp.ge.f32.partialorder %v4519_v4, %v4555_v10  ;;  %v6450_v38 = vld [vmem:[#allocation66_spill] sm:$0xff] }
 0x352   :  { %1307 = vperm.xlu0 %3615, %v1217_v24   ;;  %v3733_v36 = vpop.eup %3732  ;;  %v905_v24 = vsel %vm809_vm13, %v4744_v50, 0.0  ;;  %vm1221_vm11 = vcmp.ge.f32.partialorder %v6450_v38, %v4555_v10  ;;  %v6451_v50 = vld [vmem:[#allocation48_spill] sm:$0xff]  ;;  %vm1222_vm13 = vcmp.ge.f32.partialorder %v6452_v34, %v4555_v10 }
 0x353   :  { %1272 = vperm.xlu1 %3614, %v1210_v15   ;;  %v1218_v37 = vsel %vm1134_vm14, %v3733_v36, 0.0  ;;  %v6448_v15 = vld [vmem:[#allocation65_spill] sm:$0xff]  ;;  %vm811_vm14 = vcmp.ge.f32.partialorder %v6449_v8, %v6445_v3  ;;  %vm812_vm2 = vcmp.ge.f32.partialorder %v6451_v50, %v6445_v3 }
 0x354   :  { %vm1220_vm1 = vcmp.ge.f32.partialorder %v6448_v15, %v4555_v10  ;;  %v907_v48 = vsel %vm811_vm14, %v4746_v59, 0.0  ;;  %vm1224_vm14 = vcmp.ge.f32.partialorder %v4569_v5, %v4555_v10  ;;  %v6457_v5 = vld [vmem:[#allocation53_spill] sm:$0xff] }
 0x356   :  { %3617 = vset.pattern.permute.xlu0 %v4041_v61 }
 0x357   :  { %1282 = vperm.xlu1 %3614, %v1212_v6   ;;  %1410 = vperm.xlu0 %3617, %v4120_v21  }
 0x35b   :  { %1292 = vperm.xlu1 %3614, %v1214_v11  }
 0x35f   :  { %1302 = vperm.xlu1 %3614, %v1216_v7   ;;  %v921_v7 = vadd.f32 %v906_v44, %v905_v24  ;;  %v6454_v44 = vld [vmem:[#allocation68_spill] sm:$0xff] }
 0x363   :  { %1312 = vperm.xlu1 %3614, %v1218_v37   ;;  %v908_v37 = vsel %vm812_vm2, %v4748_v1, 0.0  ;;  %vm1225_vm2 = vcmp.ge.f32.partialorder %v4585_v9, %v4555_v10 }
 0x367   :  { %3616 = vset.pattern.permute.xlu1 %v4041_v61 }
 0x368   :  { %1378 = vperm.xlu1 %3616, %v4095_v12  }
 0x36c   :  { %1382 = vperm.xlu1 %3616, %v4098_v13  }
 0x370   :  { %1386 = vperm.xlu1 %3616, %v6444_v46  }
 0x374   :  { %1390 = vperm.xlu1 %3616, %v4105_v16  }
 0x378   :  { %1394 = vperm.xlu1 %3616, %v4108_v17  }
 0x37c   :  { %1398 = vperm.xlu1 %3616, %v4111_v18  }
 0x380   :  { %1402 = vperm.xlu1 %3616, %v4114_v19  }
 0x384   :  { %1406 = vperm.xlu1 %3616, %v4117_v20  }
 0x388   :  { %1414 = vperm.xlu1 %3616, %v4126_v23  }
 0x38c   :  { %1418 = vperm.xlu1 %3616, %v4131_v25  }
 0x390   :  { %1422 = vperm.xlu1 %3616, %v4134_v26  }
 0x394   :  { %1426 = vperm.xlu1 %3616, %v4139_v28  }
 0x398   :  { %1430 = vperm.xlu1 %3616, %v4144_v30  }
 0x39c   :  { %1434 = vperm.xlu1 %3616, %v4147_v31  }
 0x3a0   :  { %1438 = vperm.xlu1 %3616, %v4152_v33  }
 0x3b9   :  { %v1243_v63 = vpop.permute.xlu0 %1242 }
 0x3ba   :  { %v1238_v27 = vpop.permute.xlu1 %1237  ;;  %v1316_v61 = vsel %vm1220_vm1, %v1243_v63, 0.0  ;;  %v922_v63 = vadd.f32 %v921_v7, %v907_v48 }
 0x3bb   :  { %v1315_v6 = vsel %vm1219_vm4, %v1238_v27, 0.0  ;;  %v6453_v27 = vld [vmem:[#allocation49_spill] sm:$0xff]  ;;  %vm1223_vm4 = vcmp.ge.f32.partialorder %v6454_v44, %v4555_v10 }
 0x3bc   :  { %v1331_v4 = vadd.f32 %v1316_v61, %v1315_v6  ;;  %vm813_vm1 = vcmp.ge.f32.partialorder %v6453_v27, %v6445_v3  ;;  %v923_v8 = vadd.f32 %v922_v63, %v908_v37  ;;  %v6456_v37 = vld [vmem:[#allocation52_spill] sm:$0xff] }
 0x3bd   :  { %v1268_v11 = vpop.permute.xlu0 %1267  ;;  %v909_v49 = vsel %vm813_vm1, %v4750_v55, 0.0  ;;  %vm1226_vm1 = vcmp.ge.f32.partialorder %v4609_v0, %v4555_v10 }
 0x3be   :  { %v1248_v41 = vpop.permute.xlu1 %1247  ;;  %v924_v38 = vadd.f32 %v923_v8, %v909_v49 }
 0x3bf   :  { %v1317_v36 = vsel %vm1221_vm11, %v1248_v41, 0.0  ;;  %v6455_v41 = vld [vmem:[#allocation51_spill] sm:$0xff] }
 0x3c0   :  { %v1332_v15 = vadd.f32 %v1331_v4, %v1317_v36  ;;  %vm814_vm11 = vcmp.ge.f32.partialorder %v6455_v41, %v6445_v3  ;;  %v1321_v4 = vsel %vm1225_vm2, %v1268_v11, 0.0  ;;  %vm1229_vm2 = vcmp.ge.f32.partialorder %v4636_v54, %v4555_v10 }
 0x3c1   :  { %v910_v61 = vsel %vm814_vm11, %v4752_v45, 0.0  ;;  %v1278_v6 = vpop.permute.xlu0 %1277  ;;  %vm1227_vm11 = vcmp.ge.f32.partialorder %v4633_v43, %v4555_v10 }
 0x3c2   :  { %v1253_v14 = vpop.permute.xlu1 %1252  ;;  %v1323_v11 = vsel %vm1227_vm11, %v1278_v6, 0.0 }
 0x3c3   :  { %v1318_v59 = vsel %vm1222_vm13, %v1253_v14, 0.0  ;;  %v925_v14 = vadd.f32 %v924_v38, %v910_v61  ;;  %vm815_vm13 = vcmp.ge.f32.partialorder %v6456_v37, %v6445_v3  ;;  %v6459_v61 = vld [vmem:[#allocation69_spill] sm:$0xff] }
 0x3c4   :  { %v1333_v48 = vadd.f32 %v1332_v15, %v1318_v59  ;;  %v911_v45 = vsel %vm815_vm13, %v4762_v53, 0.0 }
 0x3c5   :  { %v1288_v34 = vpop.permute.xlu0 %1287  ;;  %v926_v59 = vadd.f32 %v925_v14, %v911_v45 }
 0x3c6   :  { %v1258_v24 = vpop.permute.xlu1 %1257 }
 0x3c7   :  { %v1319_v1 = vsel %vm1223_vm4, %v1258_v24, 0.0  ;;  %vm816_vm4 = vcmp.ge.f32.partialorder %v6457_v5, %v6445_v3  ;;  %v6464_v5 = vld [vmem:[#allocation56_spill] sm:$0xff] }
 0x3c8   :  { %v1334_v7 = vadd.f32 %v1333_v48, %v1319_v1  ;;  %v912_v9 = vsel %vm816_vm4, %v4754_v58, 0.0  ;;  %v6458_v1 = vld [vmem:[#allocation55_spill] sm:$0xff]  ;;  %v1325_v58 = vsel %vm1229_vm2, %v1288_v34, 0.0  ;;  %v6460_v48 = vld [vmem:[#allocation54_spill] sm:$0xff] }
 0x3c9   :  { %v927_v0 = vadd.f32 %v926_v59, %v912_v9  ;;  %v1298_v8 = vpop.permute.xlu0 %1297  ;;  %vm817_vm13 = vcmp.ge.f32.partialorder %v6458_v1, %v6445_v3  ;;  %vm818_vm4 = vcmp.ge.f32.partialorder %v6460_v48, %v6445_v3 }
 0x3ca   :  { %v1263_v55 = vpop.permute.xlu1 %1262  ;;  %v913_v43 = vsel %vm817_vm13, %v4766_v52, 0.0  ;;  %v914_v54 = vsel %vm818_vm4, %v4756_v2, 0.0  ;;  %v6462_v52 = vld [vmem:[#allocation71_spill] sm:$0xff]  ;;  %vm819_vm13 = vcmp.ge.f32.partialorder %v6464_v5, %v6445_v3  ;;  %v6474_v5 = vld [vmem:[#allocation34_spill] sm:$0xff] }
 0x3cb   :  { %v1320_v50 = vsel %vm1224_vm14, %v1263_v55, 0.0  ;;  %vm1228_vm14 = vcmp.ge.f32.partialorder %v4624_v62, %v4555_v10  ;;  %v928_v38 = vadd.f32 %v927_v0, %v913_v43  ;;  %v6461_v55 = vld [vmem:[#allocation70_spill] sm:$0xff]  ;;  %v915_v59 = vsel %vm819_vm13, %v4770_v60, 0.0  ;;  %v6468_v43 = vld [vmem:[#allocation59_spill] sm:$0xff] }
 0x3cc   :  { %v1335_v36 = vadd.f32 %v1334_v7, %v1320_v50  ;;  %vm1231_vm11 = vcmp.ge.f32.partialorder %v6461_v55, %v4555_v10  ;;  %v6467_v60 = vld [vmem:[#allocation58_spill] sm:$0xff] }
 0x3cd   :  { %v1327_v50 = vsel %vm1231_vm11, %v1298_v8, 0.0  ;;  %v929_v45 = vadd.f32 %v928_v38, %v914_v54  ;;  %vm821_vm11 = vcmp.ge.f32.partialorder %v6467_v60, %v6445_v3 }
 0x3ce   :  { %v1336_v63 = vadd.f32 %v1335_v36, %v1321_v4  ;;  %v1273_v27 = vpop.permute.xlu1 %1272  ;;  %v1308_v36 = vpop.permute.xlu0 %1307 }
 0x3cf   :  { %v1322_v49 = vsel %vm1226_vm1, %v1273_v27, 0.0  ;;  %vm1230_vm1 = vcmp.ge.f32.partialorder %v6459_v61, %v4555_v10 }
 0x3d0   :  { %v1337_v15 = vadd.f32 %v1336_v63, %v1322_v49  ;;  %v6463_v63 = vld [vmem:[#allocation72_spill] sm:$0xff] }
 0x3d1   :  { %vm1233_vm2 = vcmp.ge.f32.partialorder %v6463_v63, %v4555_v10  ;;  %v6473_v63 = vld [vmem:[#allocation39_spill] sm:$0xff] }
 0x3d2   :  { %v1338_v53 = vadd.f32 %v1337_v15, %v1323_v11  ;;  %v1283_v44 = vpop.permute.xlu1 %1282  ;;  %v1329_v2 = vsel %vm1233_vm2, %v1308_v36, 0.0  ;;  %v6465_v15 = vld [vmem:[#allocation57_spill] sm:$0xff]  ;;  %v930_v11 = vadd.f32 %v929_v45, %v915_v59 }
 0x3d3   :  { %v1324_v24 = vsel %vm1228_vm14, %v1283_v44, 0.0  ;;  %vm1232_vm14 = vcmp.ge.f32.partialorder %v6462_v52, %v4555_v10  ;;  %vm820_vm4 = vcmp.ge.f32.partialorder %v6465_v15, %v6445_v3  ;;  %v6466_v44 = vld [vmem:[#allocation37_spill] sm:$0xff]  ;;  %v6475_v15 = vld [vmem:[#allocation16_spill] sm:$0xff] }
 0x3d4   :  { %v1339_v41 = vadd.f32 %v1338_v53, %v1324_v24  ;;  %v916_v0 = vsel %vm820_vm4, %v6466_v44, 0.0  ;;  %v6471_v36 = vld [vmem:[#allocation73_spill] sm:$0xff]  ;;  %v6476_v44 = vmov 0.0  }
 0x3d6   :  { %v1340_v6 = vadd.f32 %v1339_v41, %v1325_v58  ;;  %v1293_v62 = vpop.permute.xlu1 %1292  ;;  %v931_v41 = vadd.f32 %v930_v11, %v916_v0 }
 0x3d7   :  { %v1326_v7 = vsel %vm1230_vm1, %v1293_v62, 0.0  ;;  %vm1234_vm1 = vcmp.ge.f32.partialorder %v4680_v57, %v4555_v10  ;;  %v917_v10 = vsel %vm821_vm11, %v4790_v51, 0.0  ;;  %v6469_v62 = vld [vmem:[#allocation38_spill] sm:$0xff]  ;;  %v1358_v51 = vmul.f32 -0.22314355, %v6471_v36 }
 0x3d8   :  { %v1341_v14 = vadd.f32 %v1340_v6, %v1326_v7  ;;  %v932_v61 = vadd.f32 %v931_v41, %v917_v10 }
 0x3d9   :  { %v1359_v59 = vmul.f32 1.442695, %v1358_v51 }
 0x3da   :  { %v1342_v37 = vadd.f32 %v1341_v14, %v1327_v50  ;;  %v1303_v4 = vpop.permute.xlu1 %1302  ;;  %v6470_v50 = vld [vmem:[#allocation60_spill] sm:$0xff] }
 0x3db   :  { %v1328_v34 = vsel %vm1232_vm14, %v1303_v4, 0.0  ;;  %vm822_vm14 = vcmp.ge.f32.partialorder %v6468_v43, %v6445_v3  ;;  %vm823_vm2 = vcmp.ge.f32.partialorder %v6470_v50, %v6445_v3  ;;  %v6472_v4 = vld [vmem:[#allocation61_spill] sm:$0xff] }
 0x3dc   :  { %v1343_v27 = vadd.f32 %v1342_v37, %v1328_v34  ;;  %v918_v48 = vsel %vm822_vm14, %v6469_v62, 0.0  ;;  %v919_v52 = vsel %vm823_vm2, %v4796_v29, 0.0  ;;  %vm824_vm13 = vcmp.ge.f32.partialorder %v6472_v4, %v6445_v3 }
 0x3dd   :  { %v933_v54 = vadd.f32 %v932_v61, %v918_v48  ;;  %v6477_v48 = vld [vmem:[#allocation40_spill] sm:$0xff] }
 0x3de   :  { %v1344_v49 = vadd.f32 %v1343_v27, %v1329_v2  ;;  %v1313_v9 = vpop.permute.xlu1 %1312  ;;  %v920_v27 = vsel %vm824_vm13, %v6473_v63, 0.0  ;;  %v4955_v2 = vsub.s32 3, %v6474_v5  ;;  %v6482_v5 = vld [vmem:[#allocation64_spill] sm:$0xff] }
 0x3df   :  { %v1330_v53 = vsel %vm1234_vm1, %v1313_v9, 0.0  ;;  %v934_v45 = vadd.f32 %v933_v54, %v919_v52 }
 0x3e0   :  { %v1345_v24 = vadd.f32 %v1344_v49, %v1330_v53  ;;  %v4961_v29 = vrot.slane %v6475_v15, %v4955_v2 }
 0x3e1   :  { %v935_v49 = vadd.f32 %v934_v45, %v920_v27 }
 0x3e2   :  { %v1346_v8 = vrot.slane %v1345_v24, 4 }
 0x3e3   :  { %v4933_v1 = vpop.permute.xlu1 %1378  ;;  %v936_v11 = vrot.slane %v935_v49, 4 }
 0x3e4   :  { %v1347_v58 = vadd.f32 %v1346_v8, %v1345_v24  ;;  %vm1445_vm4 = vcmp.lt.f32.partialorder %v4933_v1, %v4961_v29 }
 0x3e5   :  { %v937_v53 = vadd.f32 %v936_v11, %v935_v49  ;;  %v3510_v41 = vsel %vm1445_vm4, 1.0, %v6476_v44 }
 0x3e6   :  { %v1348_v57 = vrot.slane %v1347_v58, 2 }
 0x3e7   :  { %v4940_v6 = vpop.permute.xlu1 %1382 }
 0x3e8   :  { %v1349_v38 = vadd.f32 %v1348_v57, %v1347_v58  ;;  %vm1446_vm1 = vcmp.lt.f32.partialorder %v4940_v6, %v4961_v29  ;;  %v938_v57 = vrot.slane %v937_v53, 2 }
 0x3e9   :  { %v3511_v0 = vsel %vm1446_vm1, 1.0, %v6476_v44 }
 0x3ea   :  { %v1350_v7 = vrot.slane %v1349_v38, 1  ;;  %v1493_v60 = vadd.f32 %v3511_v0, %v3510_v41  ;;  %v939_v52 = vadd.f32 %v938_v57, %v937_v53 }
 0x3eb   :  { %v4943_v55 = vpop.permute.xlu1 %1386 }
 0x3ec   :  { %v1351_v14 = vadd.f32 %v1350_v7, %v1349_v38  ;;  %vm1447_vm11 = vcmp.lt.f32.partialorder %v4943_v55, %v4961_v29  ;;  %v940_v0 = vrot.slane %v939_v52, 1 }
 0x3ed   :  { %v3512_v58 = vsel %vm1447_vm11, 1.0, %v6476_v44 }
 0x3ee   :  { %v1353_v37 = vmax.f32 %v1351_v14, 1e-30  ;;  %v1494_v62 = vadd.f32 %v3512_v58, %v1493_v60  ;;  %v6478_v14 = vld [vmem:[#allocation74_spill] sm:$0xff] }
 0x3ef   :  { %v4951_v34 = vpop.permute.xlu1 %1390 }
 0x3f0   :  { %3734 = vlog2.f32 %v1353_v37  ;;  %vm1448_vm14 = vcmp.lt.f32.partialorder %v4951_v34, %v4961_v29 }
 0x3f1   :  { %3736 = vpow2.f32 %v1359_v59  ;;  %v3513_v43 = vsel %vm1448_vm14, 1.0, %v6476_v44  ;;  %v6479_v59 = vld [vmem:[#allocation35_spill] sm:$0xff] }
 0x3f2   :  { %v1495_v54 = vadd.f32 %v3513_v43, %v1494_v62  ;;  %vm1357_vm11 = vcmp.lt.f32.partialorder %v6471_v36, %v6479_v59 }
 0x3f3   :  { %v4957_v9 = vpop.permute.xlu1 %1394 }
 0x3f4   :  { %vm1449_vm2 = vcmp.lt.f32.partialorder %v4957_v9, %v4961_v29 }
 0x3f5   :  { %v3514_v7 = vsel %vm1449_vm2, 1.0, %v6476_v44 }
 0x3f6   :  { %v1496_v45 = vadd.f32 %v3514_v7, %v1495_v54 }
 0x3f7   :  { %v4963_v3 = vpop.permute.xlu1 %1398 }
 0x3f8   :  { %vm1450_vm13 = vcmp.lt.f32.partialorder %v4963_v3, %v4961_v29 }
 0x3f9   :  { %v3515_v37 = vsel %vm1450_vm13, 1.0, %v6476_v44 }
 0x3fa   :  { %v1497_v49 = vadd.f32 %v3515_v37, %v1496_v45 }
 0x3fb   :  { %v4972_v24 = vpop.permute.xlu1 %1402 }
 0x3fc   :  { %vm1451_vm1 = vcmp.lt.f32.partialorder %v4972_v24, %v4961_v29 }
 0x3fd   :  { %v3735_v8 = vpop.eup %3734  ;;  %v3516_v27 = vsel %vm1451_vm1, 1.0, %v6476_v44 }
 0x3fe   :  { %v1355_v10 = vmul.f32 0.6931472, %v3735_v8  ;;  %v3737_v51 = vpop.eup %3736  ;;  %v5000_v8 = vpop.permute.xlu0 %1410  ;;  %v1498_v58 = vadd.f32 %v3516_v27, %v1497_v49 }
 0x3ff   :  { %v4981_v61 = vpop.permute.xlu1 %1406  ;;  %vm1453_vm14 = vcmp.lt.f32.partialorder %v5000_v8, %v4961_v29 }
 0x400   :  { %v1356_v38 = vadd.f32 %v1355_v10, %v6477_v48  ;;  %vm1452_vm4 = vcmp.lt.f32.partialorder %v4981_v61, %v4961_v29  ;;  %v941_v10 = vadd.f32 %v940_v0, %v939_v52  ;;  %v3518_v36 = vsel %vm1453_vm14, 1.0, %v6476_v44  ;;  %v6481_v0 = vld [vmem:[#allocation62_spill] sm:$0xff] }
 0x401   :  { %v3517_v53 = vsel %vm1452_vm4, 1.0, %v6476_v44 }
 0x402   :  { %v1361_v50 = vsub.f32 %v6478_v14, %v1356_v38  ;;  %v1499_v60 = vadd.f32 %v3517_v53, %v1498_v58  ;;  %v943_v62 = vmax.f32 %v941_v10, 1e-30  ;;  %v948_v53 = vmul.f32 -0.22314355, %v6481_v0 }
 0x403   :  { %v4991_v4 = vpop.permute.xlu1 %1414 }
 0x404   :  { %v1362_v63 = vmul.f32 %v3737_v51, %v1361_v50  ;;  %vm1454_vm2 = vcmp.lt.f32.partialorder %v4991_v4, %v4961_v29  ;;  %v1500_v43 = vadd.f32 %v3518_v36, %v1499_v60  ;;  %3738 = vlog2.f32 %v943_v62 }
 0x405   :  { %v3519_v48 = vsel %vm1454_vm2, 1.0, %v6476_v44 }
 0x406   :  { %v4998_v11 = vsel %vm1357_vm11, %v1362_v63, 0.0  ;;  %v1501_v54 = vadd.f32 %v3519_v48, %v1500_v43  ;;  %v949_v43 = vmul.f32 1.442695, %v948_v53 }
 0x407   :  { %v5003_v41 = vpop.permute.xlu1 %1418 }
 0x408   :  { %vm1455_vm13 = vcmp.lt.f32.partialorder %v5003_v41, %v4961_v29  ;;  %3740 = vpow2.f32 %v949_v43 }
 0x409   :  { %v3520_v7 = vsel %vm1455_vm13, 1.0, %v6476_v44  ;;  %vm1517_vm13 = vcmask 1043459  }
 0x40a   :  { %v1502_v52 = vadd.f32 %v3520_v7, %v1501_v54 }
 0x40b   :  { %v5007_v57 = vpop.permute.xlu1 %1422 }
 0x40c   :  { %vm1456_vm1 = vcmp.lt.f32.partialorder %v5007_v57, %v4961_v29 }
 0x40d   :  { %v3521_v50 = vsel %vm1456_vm1, 1.0, %v6476_v44 }
 0x40e   :  { %v1503_v45 = vadd.f32 %v3521_v50, %v1502_v52 }
 0x40f   :  { %v5015_v38 = vpop.permute.xlu1 %1426 }
 0x410   :  { %vm1457_vm4 = vcmp.lt.f32.partialorder %v5015_v38, %v4961_v29 }
 0x411   :  { %v3522_v37 = vsel %vm1457_vm4, 1.0, %v6476_v44  ;;  %v3739_v7 = vpop.eup %3738  ;;  %vm947_vm4 = vcmp.lt.f32.partialorder %v6481_v0, %v6479_v59  ;;  %v6486_v0 = vld [vmem:[#allocation18_spill] sm:$0xff] }
 0x412   :  { %v1504_v49 = vadd.f32 %v3522_v37, %v1503_v45  ;;  %v945_v52 = vmul.f32 0.6931472, %v3739_v7  ;;  %v6484_v7 = vld [vmem:[#allocation36_spill] sm:$0xff] }
 0x413   :  { %v5023_v51 = vpop.permute.xlu1 %1430 }
 0x414   :  { %vm1458_vm11 = vcmp.lt.f32.partialorder %v5023_v51, %v4961_v29 }
 0x415   :  { %v3523_v63 = vsel %vm1458_vm11, 1.0, %v6476_v44  ;;  %v3741_v43 = vpop.eup %3740 }
 0x416   :  { %v1505_v60 = vadd.f32 %v3523_v63, %v1504_v49 }
 0x417   :  { %v5029_v27 = vpop.permute.xlu1 %1434 }
 0x418   :  { %6480 = vst [vmem:[#allocation41_spill] sm:$0xff] %v5029_v27  ;;  %vm1459_vm14 = vcmp.lt.f32.partialorder %v5029_v27, %v4961_v29  ;;  %v946_v27 = vadd.f32 %v945_v52, %v6482_v5 }
 0x419   :  { %v3524_v58 = vsel %vm1459_vm14, 1.0, %v6476_v44 }
 0x41a   :  { %v1506_v36 = vadd.f32 %v3524_v58, %v1505_v60  ;;  %v951_v58 = vsub.f32 %v6478_v14, %v946_v27  ;;  %v6483_v60 = vld [vmem:[#allocation33_spill] sm:$0xff] }
 0x41b   :  { %v5035_v10 = vpop.permute.xlu1 %1438 }
 0x41c   :  { %vm1460_vm2 = vcmp.lt.f32.partialorder %v5035_v10, %v4961_v29  ;;  %v952_v5 = vmul.f32 %v3741_v43, %v951_v58  ;;  %v6488_v43 = vld [vmem:[#allocation20_spill] sm:$0xff] }
 0x41d   :  { %v3525_v62 = vsel %vm1460_vm2, 1.0, %v6476_v44 }
 0x41e   :  { %v1507_v48 = vadd.f32 %v3525_v62, %v1506_v36  ;;  %v953_v27 = vsel %vm947_vm4, %v952_v5, 0.0 }
 0x420   :  { %v1508_v54 = vrot.slane %v1507_v48, 4 }
 0x422   :  { %v1509_v50 = vadd.f32 %v1508_v54, %v1507_v48  ;;  %v547_v54 = vsel %vm289_vm12, %v6484_v7, 0.0 }
 0x424   :  { %v1510_v37 = vrot.slane %v1509_v50, 2 }
 0x426   :  { %v1511_v45 = vadd.f32 %v1510_v37, %v1509_v50  ;;  %v954_v50 = vsel %vm697_vm0, %v953_v27, 0.0 }
 0x428   :  { %v1512_v63 = vrot.slane %v1511_v45, 1 }
 0x42a   :  { %v5041_v49 = vadd.f32 %v1512_v63, %v1511_v45  ;;  %v6485_v45 = vld [vmem:[#allocation19_spill] sm:$0xff] }
 0x42c   :  { %vm1515_vm1 = vcmp.lt.f32.partialorder %v5041_v49, %v6483_v60 }
 0x42d   :  { %v1521_v53 = vsel %vm1515_vm1, %v6475_v15, -1e+09  ;;  %v1516_v36 = vsel %vm1515_vm1, %v6478_v14, -1e+30  ;;  %v1364_v14 = vsel %vm1107_vm15, %v4998_v11, 0.0 }
 0x42e   :  { %v1522_v62 = vsel %vm1517_vm13, %v1521_v53, -inf  ;;  %v1518_v48 = vsel %vm1517_vm13, %v1516_v36, -inf  ;;  %v6487_v53 = vld [vmem:[#allocation24_spill] sm:$0xff] }
 0x42f   :  { %1523 = vmax.xlane.f32.xlu0 %v1522_v62  ;;  %1519 = vmax.xlane.f32.xlu1 %v1518_v48 }
 0x433   :  { %548 = vadd.xlane.f32.xlu0 %v547_v54  ;;  %v6489_v54 = vld [vmem:[#allocation26_spill] sm:$0xff] }
 0x437   :  { %955 = vadd.xlane.f32.xlu0 %v954_v50 }
 0x43b   :  { %1365 = vadd.xlane.f32.xlu0 %v1364_v14 }
 0x4b8   :  { %v5057_v52 = vpop.xlane.xlu1 %1519 }
 0x4b9   :  { %v5061_v37 = vrot.slane %v5057_v52, %v4955_v2 }
 0x4bb   :  { %v1550_v63 = vsub.f32 %v6485_v45, %v5061_v37  ;;  %v1549_v58 = vsub.f32 %v6486_v0, %v5061_v37  ;;  %v1555_v36 = vsub.f32 %v6487_v53, %v5061_v37  ;;  %v1551_v62 = vsub.f32 %v6488_v43, %v5061_v37  ;;  %v6490_v45 = vld [vmem:[#allocation21_spill] sm:$0xff] }
 0x4bc   :  { %v1557_v27 = vsub.f32 %v6489_v54, %v5061_v37  ;;  %v1552_v60 = vsub.f32 %v6490_v45, %v5061_v37  ;;  %v6491_v54 = vld [vmem:[#allocation30_spill] sm:$0xff] }
 0x4bd   :  { %v1566_v11 = vmin.f32 %v1550_v63, 0.0  ;;  %v1565_v48 = vmin.f32 %v1549_v58, 0.0  ;;  %v1571_v5 = vmin.f32 %v1555_v36, 0.0  ;;  %v1567_v7 = vmin.f32 %v1551_v62, 0.0 }
 0x4be   :  { %v1573_v15 = vmin.f32 %v1557_v27, 0.0  ;;  %v1568_v53 = vmin.f32 %v1552_v60, 0.0  ;;  %v1559_v63 = vsub.f32 %v4173_v39, %v5061_v37  ;;  %v1553_v36 = vsub.f32 %v4149_v32, %v5061_v37  ;;  %v1524_v60 = vpop.xlane.xlu0 %1523 }
 0x4bf   :  { %v1583_v50 = vmul.f32 1.442695, %v1566_v11  ;;  %v1581_v14 = vmul.f32 1.442695, %v1565_v48  ;;  %v1593_v44 = vmul.f32 1.442695, %v1571_v5  ;;  %v1561_v5 = vsub.f32 %v6491_v54, %v5061_v37 }
 0x4c0   :  { %v1585_v0 = vmul.f32 1.442695, %v1567_v7  ;;  %v1597_v58 = vmul.f32 1.442695, %v1573_v15  ;;  %v1587_v62 = vmul.f32 1.442695, %v1568_v53  ;;  %v1563_v39 = vsub.f32 %v6441_v22, %v5061_v37 }
 0x4c1   :  { %3742 = vpow2.f32 %v1583_v50  ;;  %v1575_v11 = vmin.f32 %v1559_v63, 0.0  ;;  %v1569_v48 = vmin.f32 %v1553_v36, 0.0  ;;  %v6492_v7 = vld [vmem:[#allocation23_spill] sm:$0xff]  ;;  %v5088_v53 = vrot.slane %v1524_v60, %v4955_v2 }
 0x4c2   :  { %3744 = vpow2.f32 %v1581_v14  ;;  %v1554_v27 = vsub.f32 %v6492_v7, %v5061_v37  ;;  %v1577_v14 = vmin.f32 %v1561_v5, 0.0  ;;  %v1579_v36 = vmin.f32 %v1563_v39, 0.0 }
 0x4c3   :  { %3746 = vpow2.f32 %v1593_v44  ;;  %v1601_v50 = vmul.f32 1.442695, %v1575_v11  ;;  %v1589_v44 = vmul.f32 1.442695, %v1569_v48  ;;  %vm1530_vm12 = vcmp.le.f32.partialorder %v4098_v13, %v5088_v53 }
 0x4c4   :  { %3748 = vpow2.f32 %v1585_v0  ;;  %v1570_v15 = vmin.f32 %v1554_v27, 0.0  ;;  %v1556_v0 = vsub.f32 %v6442_v35, %v5061_v37  ;;  %v1605_v63 = vmul.f32 1.442695, %v1577_v14 }
 0x4c5   :  { %3750 = vpow2.f32 %v1597_v58  ;;  %vm1529_vm0 = vcmp.le.f32.partialorder %v4095_v12, %v5088_v53  ;;  %v1609_v2 = vmul.f32 1.442695, %v1579_v36  ;;  %v1560_v39 = vsub.f32 %v4177_v40, %v5061_v37 }
 0x4c6   :  { %3752 = vpow2.f32 %v1587_v62  ;;  %v1591_v54 = vmul.f32 1.442695, %v1570_v15  ;;  %v1572_v58 = vmin.f32 %v1556_v0, 0.0  ;;  %v1558_v62 = vsub.f32 %v6443_v56, %v5061_v37 }
 0x4c7   :  { %3754 = vpow2.f32 %v1601_v50  ;;  %vm1535_vm15 = vcmp.le.f32.partialorder %v4114_v19, %v5088_v53  ;;  %vm1531_vm11 = vcmp.le.f32.partialorder %v6444_v46, %v5088_v53  ;;  %v1576_v0 = vmin.f32 %v1560_v39, 0.0 }
 0x4c8   :  { %3756 = vpow2.f32 %v1589_v44  ;;  %v1595_v50 = vmul.f32 1.442695, %v1572_v58  ;;  %v1574_v14 = vmin.f32 %v1558_v62, 0.0  ;;  %vm1537_vm14 = vcmp.le.f32.partialorder %v4120_v21, %v5088_v53 }
 0x4c9   :  { %3758 = vpow2.f32 %v1605_v63  ;;  %vm1532_vm2 = vcmp.le.f32.partialorder %v4105_v16, %v5088_v53  ;;  %v1603_v39 = vmul.f32 1.442695, %v1576_v0  ;;  %vm1539_vm1 = vcmp.le.f32.partialorder %v4131_v25, %v5088_v53 }
 0x4ca   :  { %3760 = vpow2.f32 %v1591_v54  ;;  %v1562_v54 = vsub.f32 %v4184_v42, %v5061_v37  ;;  %vm1533_vm4 = vcmp.le.f32.partialorder %v4108_v17, %v5088_v53 }
 0x4cb   :  { %3762 = vpow2.f32 %v1609_v2 }
 0x4cc   :  { %3764 = vpow2.f32 %v1595_v50 }
 0x4ce   :  { %v3743_v11 = vpop.eup %3742 }
 0x4cf   :  { %v3745_v48 = vpop.eup %3744  ;;  %v1614_v5 = vsel %vm1530_vm12, %v3743_v11, 0.0  ;;  %v1599_v11 = vmul.f32 1.442695, %v1574_v14  ;;  %vm1541_vm12 = vcmp.le.f32.partialorder %v4139_v28, %v5088_v53 }
 0x4d0   :  { %v3747_v27 = vpop.eup %3746  ;;  %1652 = vperm.xlu0 %3617, %v1614_v5   ;;  %v1613_v60 = vsel %vm1529_vm0, %v3745_v48, 0.0  ;;  %v1564_v48 = vsub.f32 %v4198_v47, %v5061_v37  ;;  %vm1534_vm0 = vcmp.le.f32.partialorder %v4111_v18, %v5088_v53 }
 0x4d1   :  { %v3749_v44 = vpop.eup %3748  ;;  %1647 = vperm.xlu1 %3616, %v1613_v60   ;;  %v1619_v15 = vsel %vm1535_vm15, %v3747_v27, 0.0  ;;  %3766 = vpow2.f32 %v1599_v11  ;;  %v1578_v27 = vmin.f32 %v1562_v54, 0.0  ;;  %vm1543_vm15 = vcmp.le.f32.partialorder %v4147_v31, %v5088_v53 }
 0x4d2   :  { %v3751_v63 = vpop.eup %3750  ;;  %v1615_v36 = vsel %vm1531_vm11, %v3749_v44, 0.0  ;;  %3768 = vpow2.f32 %v1603_v39  ;;  %vm1536_vm11 = vcmp.le.f32.partialorder %v4117_v20, %v5088_v53  ;;  %v4042_v39 = vmov 4  }
 0x4d3   :  { %v3753_v58 = vpop.eup %3752  ;;  %v1621_v62 = vsel %vm1537_vm14, %v3751_v63, 0.0  ;;  %v1607_v37 = vmul.f32 1.442695, %v1578_v27  ;;  %vm1538_vm14 = vcmp.le.f32.partialorder %v4126_v23, %v5088_v53 }
 0x4d4   :  { %1677 = vperm.xlu0 %3617, %v1619_v15   ;;  %v3755_v5 = vpop.eup %3754  ;;  %v1616_v2 = vsel %vm1532_vm2, %v3753_v58, 0.0  ;;  %v1580_v15 = vmin.f32 %v1564_v48, 0.0  ;;  %vm1540_vm2 = vcmp.le.f32.partialorder %v4134_v26, %v5088_v53 }
 0x4d5   :  { %1657 = vperm.xlu1 %3616, %v1615_v36   ;;  %v3757_v60 = vpop.eup %3756  ;;  %v1623_v50 = vsel %vm1539_vm1, %v3755_v5, 0.0  ;;  %3770 = vpow2.f32 %v1607_v37  ;;  %vm1542_vm1 = vcmp.le.f32.partialorder %v4144_v30, %v5088_v53 }
 0x4d6   :  { %v3759_v14 = vpop.eup %3758  ;;  %v1617_v44 = vsel %vm1533_vm4, %v3757_v60, 0.0  ;;  %v1611_v54 = vmul.f32 1.442695, %v1580_v15  ;;  %vm1544_vm4 = vcmp.le.f32.partialorder %v4152_v33, %v5088_v53  ;;  %v5145_v53 = vpop.xlane.xlu0 %548 }
 0x4d7   :  { %v3761_v63 = vpop.eup %3760  ;;  %v1625_v0 = vsel %vm1541_vm12, %v3759_v14, 0.0  ;;  %6493 = vst [vmem:[#allocation42_spill] sm:$0xff] %v5145_v53  ;;  %vm1630_vm12 = vcmp.ge.f32.partialorder %v4940_v6, %v4961_v29 }
 0x4d8   :  { %1687 = vperm.xlu0 %3617, %v1621_v62   ;;  %v3763_v36 = vpop.eup %3762  ;;  %v1618_v11 = vsel %vm1534_vm0, %v3761_v63, 0.0  ;;  %3772 = vpow2.f32 %v1611_v54  ;;  %vm1629_vm0 = vcmp.ge.f32.partialorder %v4933_v1, %v4961_v29 }
 0x4d9   :  { %1662 = vperm.xlu1 %3616, %v1616_v2   ;;  %v3765_v58 = vpop.eup %3764  ;;  %v1627_v62 = vsel %vm1543_vm15, %v3763_v36, 0.0  ;;  %vm1631_vm15 = vcmp.ge.f32.partialorder %v4943_v55, %v4961_v29 }
 0x4da   :  { %v1620_v48 = vsel %vm1536_vm11, %v3765_v58, 0.0  ;;  %v5147_v15 = vpop.xlane.xlu0 %955  ;;  %vm1632_vm11 = vcmp.ge.f32.partialorder %v4951_v34, %v4961_v29 }
 0x4db   :  { %6494 = vst [vmem:[#allocation43_spill] sm:$0xff] %v5147_v15 }
 0x4dc   :  { %1697 = vperm.xlu0 %3617, %v1623_v50  }
 0x4dd   :  { %1667 = vperm.xlu1 %3616, %v1617_v44  }
 0x4de   :  { %v3767_v5 = vpop.eup %3766  ;;  %v5149_v63 = vpop.xlane.xlu0 %1365 }
 0x4df   :  { %v1622_v2 = vsel %vm1538_vm14, %v3767_v5, 0.0  ;;  %v3769_v27 = vpop.eup %3768  ;;  %6495 = vst [vmem:[#allocation47_spill] sm:$0xff] %v5149_v63  ;;  %vm1633_vm14 = vcmp.ge.f32.partialorder %v4957_v9, %v4961_v29 }
 0x4e0   :  { %1707 = vperm.xlu0 %3617, %v1625_v0   ;;  %v1624_v60 = vsel %vm1540_vm2, %v3769_v27, 0.0  ;;  %vm1634_vm2 = vcmp.ge.f32.partialorder %v4963_v3, %v4961_v29 }
 0x4e1   :  { %1672 = vperm.xlu1 %3616, %v1618_v11  }
 0x4e2   :  { %v3771_v50 = vpop.eup %3770 }
 0x4e3   :  { %v1626_v14 = vsel %vm1542_vm1, %v3771_v50, 0.0  ;;  %vm1635_vm1 = vcmp.ge.f32.partialorder %v4972_v24, %v4961_v29 }
 0x4e4   :  { %1717 = vperm.xlu0 %3617, %v1627_v62  }
 0x4e5   :  { %1682 = vperm.xlu1 %3616, %v1620_v48   ;;  %v3773_v44 = vpop.eup %3772 }
 0x4e6   :  { %v1628_v37 = vsel %vm1544_vm4, %v3773_v44, 0.0  ;;  %vm1636_vm4 = vcmp.ge.f32.partialorder %v4981_v61, %v4961_v29 }
 0x4e8   :  { %3619 = vset.pattern.permute.xlu0 %v4042_v39 }
 0x4e9   :  { %1692 = vperm.xlu1 %3616, %v1622_v2  }
 0x4ed   :  { %1702 = vperm.xlu1 %3616, %v1624_v60  }
 0x4f1   :  { %1712 = vperm.xlu1 %3616, %v1626_v14  }
 0x4f5   :  { %1722 = vperm.xlu1 %3616, %v1628_v37  }
 0x4f9   :  { %3618 = vset.pattern.permute.xlu1 %v4042_v39 }
 0x4fa   :  { %1788 = vperm.xlu1 %3618, %v4095_v12  }
 0x4fe   :  { %1792 = vperm.xlu1 %3618, %v4098_v13  }
 0x502   :  { %1796 = vperm.xlu1 %3618, %v6444_v46  }
 0x506   :  { %1800 = vperm.xlu1 %3618, %v4105_v16  }
 0x50a   :  { %1804 = vperm.xlu1 %3618, %v4108_v17  }
 0x50e   :  { %1808 = vperm.xlu1 %3618, %v4111_v18  }
 0x512   :  { %1812 = vperm.xlu1 %3618, %v4114_v19  }
 0x516   :  { %1820 = vperm.xlu1 %3618, %v4120_v21  }
 0x51a   :  { %1824 = vperm.xlu1 %3618, %v4126_v23  }
 0x51e   :  { %1828 = vperm.xlu1 %3618, %v4131_v25  }
 0x522   :  { %1832 = vperm.xlu1 %3618, %v4134_v26  }
 0x526   :  { %1836 = vperm.xlu1 %3618, %v4139_v28  }
 0x52a   :  { %1840 = vperm.xlu1 %3618, %v4144_v30  }
 0x52e   :  { %1844 = vperm.xlu1 %3618, %v4147_v31  }
 0x532   :  { %1848 = vperm.xlu1 %3618, %v4152_v33  }
 0x54b   :  { %v1653_v36 = vpop.permute.xlu0 %1652 }
 0x54c   :  { %v1648_v0 = vpop.permute.xlu1 %1647  ;;  %v1726_v54 = vsel %vm1630_vm12, %v1653_v36, 0.0  ;;  %vm1637_vm12 = vcmp.ge.f32.partialorder %v5000_v8, %v4961_v29 }
 0x54d   :  { %v1725_v58 = vsel %vm1629_vm0, %v1648_v0, 0.0  ;;  %vm1638_vm0 = vcmp.ge.f32.partialorder %v4991_v4, %v4961_v29 }
 0x54e   :  { %v1741_v2 = vadd.f32 %v1726_v54, %v1725_v58 }
 0x54f   :  { %v1678_v62 = vpop.permute.xlu0 %1677 }
 0x550   :  { %v1658_v11 = vpop.permute.xlu1 %1657  ;;  %v1731_v34 = vsel %vm1635_vm1, %v1678_v62, 0.0 }
 0x551   :  { %v1727_v5 = vsel %vm1631_vm15, %v1658_v11, 0.0  ;;  %vm1639_vm15 = vcmp.ge.f32.partialorder %v5003_v41, %v4961_v29 }
 0x552   :  { %v1742_v27 = vadd.f32 %v1741_v2, %v1727_v5 }
 0x553   :  { %v1688_v1 = vpop.permute.xlu0 %1687 }
 0x554   :  { %v1663_v48 = vpop.permute.xlu1 %1662  ;;  %v1733_v58 = vsel %vm1637_vm12, %v1688_v1, 0.0  ;;  %vm1767_vm12 = vcmp.lt.f32.partialorder %v5041_v49, %v6479_v59 }
 0x555   :  { %v1728_v39 = vsel %vm1632_vm11, %v1663_v48, 0.0  ;;  %vm1640_vm11 = vcmp.ge.f32.partialorder %v5007_v57, %v4961_v29 }
 0x556   :  { %v1743_v50 = vadd.f32 %v1742_v27, %v1728_v39 }
 0x557   :  { %v1698_v0 = vpop.permute.xlu0 %1697 }
 0x558   :  { %v1668_v6 = vpop.permute.xlu1 %1667  ;;  %v1735_v61 = vsel %vm1639_vm15, %v1698_v0, 0.0 }
 0x559   :  { %v1729_v60 = vsel %vm1633_vm14, %v1668_v6, 0.0  ;;  %vm1641_vm14 = vcmp.ge.f32.partialorder %v5015_v38, %v4961_v29 }
 0x55a   :  { %v1744_v14 = vadd.f32 %v1743_v50, %v1729_v60  ;;  %v6496_v50 = vld [vmem:[#allocation41_spill] sm:$0xff] }
 0x55b   :  { %v1708_v62 = vpop.permute.xlu0 %1707  ;;  %vm1643_vm1 = vcmp.ge.f32.partialorder %v6496_v50, %v4961_v29  ;;  %v6497_v50 = vld [vmem:[#allocation34_spill] sm:$0xff] }
 0x55c   :  { %v1673_v55 = vpop.permute.xlu1 %1672  ;;  %v1737_v4 = vsel %vm1641_vm14, %v1708_v62, 0.0 }
 0x55d   :  { %v1730_v44 = vsel %vm1634_vm2, %v1673_v55, 0.0  ;;  %vm1642_vm2 = vcmp.ge.f32.partialorder %v5023_v51, %v4961_v29 }
 0x55e   :  { %v1745_v37 = vadd.f32 %v1744_v14, %v1730_v44 }
 0x55f   :  { %v1718_v6 = vpop.permute.xlu0 %1717 }
 0x560   :  { %v1746_v9 = vadd.f32 %v1745_v37, %v1731_v34  ;;  %v1683_v36 = vpop.permute.xlu1 %1682  ;;  %v1739_v57 = vsel %vm1643_vm1, %v1718_v6, 0.0 }
 0x561   :  { %v1732_v11 = vsel %vm1636_vm4, %v1683_v36, 0.0  ;;  %vm1644_vm4 = vcmp.ge.f32.partialorder %v5035_v10, %v4961_v29  ;;  %v5185_v10 = vld [vmem:[#allocation2] sm:$0xff] }
 0x562   :  { %v1747_v54 = vadd.f32 %v1746_v9, %v1732_v11 }
 0x564   :  { %v1748_v3 = vadd.f32 %v1747_v54, %v1733_v58  ;;  %v1693_v48 = vpop.permute.xlu1 %1692  ;;  %v1768_v54 = vmul.f32 -0.22314355, %v5041_v49 }
 0x565   :  { %v1734_v24 = vsel %vm1638_vm0, %v1693_v48, 0.0 }
 0x566   :  { %v1749_v5 = vadd.f32 %v1748_v3, %v1734_v24  ;;  %v1769_v3 = vmul.f32 1.442695, %v1768_v54 }
 0x568   :  { %v1750_v2 = vadd.f32 %v1749_v5, %v1735_v61  ;;  %v1703_v39 = vpop.permute.xlu1 %1702 }
 0x569   :  { %v1736_v8 = vsel %vm1640_vm11, %v1703_v39, 0.0 }
 0x56a   :  { %v1751_v27 = vadd.f32 %v1750_v2, %v1736_v8 }
 0x56c   :  { %v1752_v60 = vadd.f32 %v1751_v27, %v1737_v4  ;;  %v1713_v41 = vpop.permute.xlu1 %1712 }
 0x56d   :  { %v1738_v1 = vsel %vm1642_vm2, %v1713_v41, 0.0 }
 0x56e   :  { %v1753_v14 = vadd.f32 %v1752_v60, %v1738_v1 }
 0x570   :  { %v1754_v55 = vadd.f32 %v1753_v14, %v1739_v57  ;;  %v1723_v44 = vpop.permute.xlu1 %1722  ;;  %v5211_v14 = vsub.s32 4, %v6497_v50 }
 0x571   :  { %v1740_v38 = vsel %vm1644_vm4, %v1723_v44, 0.0 }
 0x572   :  { %v1755_v37 = vadd.f32 %v1754_v55, %v1740_v38  ;;  %v6498_v55 = vld [vmem:[#allocation16_spill] sm:$0xff]  ;;  %v6499_v38 = vmov 0.0  }
 0x573   :  { %v5217_v44 = vrot.slane %v6498_v55, %v5211_v14 }
 0x574   :  { %v1756_v34 = vrot.slane %v1755_v37, 4 }
 0x575   :  { %v5192_v8 = vpop.permute.xlu1 %1788 }
 0x576   :  { %v1757_v0 = vadd.f32 %v1756_v34, %v1755_v37  ;;  %vm1855_vm0 = vcmp.lt.f32.partialorder %v5192_v8, %v5217_v44 }
 0x578   :  { %v1758_v9 = vrot.slane %v1757_v0, 2 }
 0x579   :  { %v5194_v27 = vpop.permute.xlu1 %1792 }
 0x57a   :  { %v1759_v36 = vadd.f32 %v1758_v9, %v1757_v0  ;;  %v3526_v0 = vsel %vm1855_vm0, 1.0, %v6499_v38 }
 0x57c   :  { %v1760_v51 = vrot.slane %v1759_v36, 1 }
 0x57e   :  { %v1761_v11 = vadd.f32 %v1760_v51, %v1759_v36 }
 0x580   :  { %v1763_v58 = vmax.f32 %v1761_v11, 1e-30 }
 0x582   :  { %3774 = vlog2.f32 %v1763_v58 }
 0x583   :  { %3776 = vpow2.f32 %v1769_v3 }
 0x58f   :  { %v3775_v48 = vpop.eup %3774 }
 0x590   :  { %v1765_v24 = vmul.f32 0.6931472, %v3775_v48  ;;  %v3777_v5 = vpop.eup %3776 }
 0x592   :  { %v1766_v29 = vadd.f32 %v1765_v24, %v5057_v52  ;;  %v5196_v52 = vpop.permute.xlu1 %1796 }
 0x593   :  { %vm1857_vm15 = vcmp.lt.f32.partialorder %v5196_v52, %v5217_v44 }
 0x594   :  { %v1771_v62 = vsub.f32 %v5185_v10, %v1766_v29  ;;  %v3528_v9 = vsel %vm1857_vm15, 1.0, %v6499_v38 }
 0x596   :  { %v1772_v61 = vmul.f32 %v3777_v5, %v1771_v62  ;;  %v5198_v4 = vpop.permute.xlu1 %1800 }
 0x597   :  { %vm1858_vm11 = vcmp.lt.f32.partialorder %v5198_v4, %v5217_v44 }
 0x598   :  { %v1773_v2 = vsel %vm1767_vm12, %v1772_v61, 0.0  ;;  %v3529_v51 = vsel %vm1858_vm11, 1.0, %v6499_v38 }
 0x599   :  { %v1774_v39 = vsel %vm1517_vm13, %v1773_v2, 0.0  ;;  %vm1856_vm13 = vcmp.lt.f32.partialorder %v5194_v27, %v5217_v44 }
 0x59a   :  { %1775 = vadd.xlane.f32.xlu0 %v1774_v39  ;;  %v5200_v6 = vpop.permute.xlu1 %1804  ;;  %v3527_v37 = vsel %vm1856_vm13, 1.0, %v6499_v38 }
 0x59b   :  { %v1903_v36 = vadd.f32 %v3527_v37, %v3526_v0  ;;  %vm1859_vm14 = vcmp.lt.f32.partialorder %v5200_v6, %v5217_v44 }
 0x59c   :  { %v3530_v54 = vsel %vm1859_vm14, 1.0, %v6499_v38 }
 0x59d   :  { %v1904_v11 = vadd.f32 %v3528_v9, %v1903_v36 }
 0x59e   :  { %v5202_v60 = vpop.permute.xlu1 %1808 }
 0x59f   :  { %vm1860_vm2 = vcmp.lt.f32.partialorder %v5202_v60, %v5217_v44  ;;  %v1905_v3 = vadd.f32 %v3529_v51, %v1904_v11 }
 0x5a0   :  { %v3531_v48 = vsel %vm1860_vm2, 1.0, %v6499_v38 }
 0x5a1   :  { %v1906_v29 = vadd.f32 %v3530_v54, %v1905_v3 }
 0x5a2   :  { %v5204_v41 = vpop.permute.xlu1 %1812 }
 0x5a3   :  { %vm1861_vm1 = vcmp.lt.f32.partialorder %v5204_v41, %v5217_v44  ;;  %v1907_v5 = vadd.f32 %v3531_v48, %v1906_v29 }
 0x5a4   :  { %v3532_v62 = vsel %vm1861_vm1, 1.0, %v6499_v38 }
 0x5a5   :  { %v1908_v39 = vadd.f32 %v3532_v62, %v1907_v5 }
 0x5a6   :  { %v5206_v49 = vpop.permute.xlu1 %1820 }
 0x5a7   :  { %vm1863_vm4 = vcmp.lt.f32.partialorder %v5206_v49, %v5217_v44 }
 0x5a8   :  { %v3534_v9 = vsel %vm1863_vm4, 1.0, %v6499_v38  ;;  %vm1927_vm4 = vcmask 1044484  }
 0x5aa   :  { %v5208_v1 = vpop.permute.xlu1 %1824 }
 0x5ab   :  { %vm1864_vm13 = vcmp.lt.f32.partialorder %v5208_v1, %v5217_v44 }
 0x5ac   :  { %v3535_v51 = vsel %vm1864_vm13, 1.0, %v6499_v38 }
 0x5ae   :  { %v5213_v57 = vpop.permute.xlu1 %1828 }
 0x5af   :  { %vm1865_vm0 = vcmp.lt.f32.partialorder %v5213_v57, %v5217_v44 }
 0x5b0   :  { %1816 = vperm.xlu0 %3619, %v4117_v20   ;;  %v3536_v3 = vsel %vm1865_vm0, 1.0, %v6499_v38 }
 0x5b2   :  { %v5226_v34 = vpop.permute.xlu1 %1832 }
 0x5b3   :  { %vm1866_vm15 = vcmp.lt.f32.partialorder %v5226_v34, %v5217_v44 }
 0x5b4   :  { %v3537_v29 = vsel %vm1866_vm15, 1.0, %v6499_v38 }
 0x5b6   :  { %v5238_v58 = vpop.permute.xlu1 %1836 }
 0x5b7   :  { %vm1867_vm11 = vcmp.lt.f32.partialorder %v5238_v58, %v5217_v44 }
 0x5b8   :  { %v3538_v5 = vsel %vm1867_vm11, 1.0, %v6499_v38 }
 0x5ba   :  { %v5246_v61 = vpop.permute.xlu1 %1840 }
 0x5bb   :  { %vm1868_vm14 = vcmp.lt.f32.partialorder %v5246_v61, %v5217_v44 }
 0x5be   :  { %v5261_v11 = vpop.permute.xlu1 %1844 }
 0x5bf   :  { %vm1869_vm2 = vcmp.lt.f32.partialorder %v5261_v11, %v5217_v44 }
 0x623   :  { %v5243_v24 = vpop.xlane.xlu0 %1775 }
 0x624   :  { %6500 = vst [vmem:[#allocation63_spill] sm:$0xff] %v5243_v24 }
 0x62b   :  { %v5248_v2 = vpop.permute.xlu0 %1816 }
 0x62c   :  { %vm1862_vm12 = vcmp.lt.f32.partialorder %v5248_v2, %v5217_v44 }
 0x62d   :  { %v3533_v37 = vsel %vm1862_vm12, 1.0, %v6499_v38 }
 0x62e   :  { %v1909_v0 = vadd.f32 %v3533_v37, %v1908_v39  ;;  %v5272_v39 = vpop.permute.xlu1 %1848 }
 0x62f   :  { %vm1870_vm1 = vcmp.lt.f32.partialorder %v5272_v39, %v5217_v44 }
 0x630   :  { %v1910_v36 = vadd.f32 %v3534_v9, %v1909_v0  ;;  %v3539_v0 = vsel %vm1868_vm14, 1.0, %v6499_v38 }
 0x632   :  { %v1911_v54 = vadd.f32 %v3535_v51, %v1910_v36  ;;  %v3540_v36 = vsel %vm1869_vm2, 1.0, %v6499_v38 }
 0x634   :  { %v1912_v48 = vadd.f32 %v3536_v3, %v1911_v54  ;;  %v3541_v54 = vsel %vm1870_vm1, 1.0, %v6499_v38 }
 0x636   :  { %v1913_v62 = vadd.f32 %v3537_v29, %v1912_v48 }
 0x638   :  { %v1914_v37 = vadd.f32 %v3538_v5, %v1913_v62  ;;  %v6501_v62 = vld [vmem:[#allocation33_spill] sm:$0xff] }
 0x63a   :  { %v1915_v9 = vadd.f32 %v3539_v0, %v1914_v37 }
 0x63c   :  { %v1916_v51 = vadd.f32 %v3540_v36, %v1915_v9 }
 0x63e   :  { %v1917_v3 = vadd.f32 %v3541_v54, %v1916_v51  ;;  %v6503_v51 = vld [vmem:[#allocation18_spill] sm:$0xff] }
 0x640   :  { %v1918_v48 = vrot.slane %v1917_v3, 4 }
 0x642   :  { %v1919_v29 = vadd.f32 %v1918_v48, %v1917_v3 }
 0x644   :  { %v1920_v24 = vrot.slane %v1919_v29, 2 }
 0x646   :  { %v1921_v63 = vadd.f32 %v1920_v24, %v1919_v29 }
 0x648   :  { %v1922_v15 = vrot.slane %v1921_v63, 1 }
 0x64a   :  { %v5281_v53 = vadd.f32 %v1922_v15, %v1921_v63  ;;  %v6502_v63 = vld [vmem:[#allocation19_spill] sm:$0xff] }
 0x64c   :  { %vm1925_vm12 = vcmp.lt.f32.partialorder %v5281_v53, %v6501_v62 }
 0x64d   :  { %v1931_v5 = vsel %vm1925_vm12, %v6498_v55, -1e+09  ;;  %v1926_v37 = vsel %vm1925_vm12, %v5185_v10, -1e+30 }
 0x64e   :  { %v1932_v0 = vsel %vm1927_vm4, %v1931_v5, -inf  ;;  %v1928_v9 = vsel %vm1927_vm4, %v1926_v37, -inf }
 0x64f   :  { %1933 = vmax.xlane.f32.xlu0 %v1932_v0  ;;  %1929 = vmax.xlane.f32.xlu1 %v1928_v9 }
 0x6d8   :  { %v5289_v36 = vpop.xlane.xlu1 %1929 }
 0x6d9   :  { %v5293_v15 = vrot.slane %v5289_v36, %v5211_v14 }
 0x6db   :  { %v1960_v24 = vsub.f32 %v6502_v63, %v5293_v15  ;;  %v1959_v54 = vsub.f32 %v6503_v51, %v5293_v15  ;;  %v1964_v3 = vsub.f32 %v6492_v7, %v5293_v15  ;;  %v1961_v48 = vsub.f32 %v6488_v43, %v5293_v15 }
 0x6dc   :  { %v1966_v37 = vsub.f32 %v6442_v35, %v5293_v15  ;;  %v1962_v62 = vsub.f32 %v6490_v45, %v5293_v15  ;;  %v1968_v7 = vsub.f32 %v6443_v56, %v5293_v15 }
 0x6dd   :  { %v1976_v29 = vmin.f32 %v1960_v24, 0.0  ;;  %v1975_v5 = vmin.f32 %v1959_v54, 0.0  ;;  %v1980_v0 = vmin.f32 %v1964_v3, 0.0  ;;  %v1977_v9 = vmin.f32 %v1961_v48, 0.0 }
 0x6de   :  { %v1982_v55 = vmin.f32 %v1966_v37, 0.0  ;;  %v1978_v59 = vmin.f32 %v1962_v62, 0.0  ;;  %v1963_v24 = vsub.f32 %v4149_v32, %v5293_v15  ;;  %v1984_v3 = vmin.f32 %v1968_v7, 0.0  ;;  %v6504_v37 = vld [vmem:[#allocation24_spill] sm:$0xff] }
 0x6df   :  { %v1993_v63 = vmul.f32 1.442695, %v1976_v29  ;;  %v1991_v38 = vmul.f32 1.442695, %v1975_v5  ;;  %v2001_v51 = vmul.f32 1.442695, %v1980_v0  ;;  %v1970_v48 = vsub.f32 %v4177_v40, %v5293_v15 }
 0x6e0   :  { %v1995_v50 = vmul.f32 1.442695, %v1977_v9  ;;  %v2005_v54 = vmul.f32 1.442695, %v1982_v55  ;;  %v1997_v29 = vmul.f32 1.442695, %v1978_v59  ;;  %v1965_v62 = vsub.f32 %v6504_v37, %v5293_v15 }
 0x6e1   :  { %3778 = vpow2.f32 %v1993_v63  ;;  %v1979_v5 = vmin.f32 %v1963_v24, 0.0  ;;  %v1972_v0 = vsub.f32 %v4184_v42, %v5293_v15  ;;  %v1934_v63 = vpop.xlane.xlu0 %1933  ;;  %v2009_v9 = vmul.f32 1.442695, %v1984_v3  ;;  %v6506_v3 = vld [vmem:[#allocation28_spill] sm:$0xff] }
 0x6e2   :  { %3780 = vpow2.f32 %v1991_v38  ;;  %v1986_v56 = vmin.f32 %v1970_v48, 0.0  ;;  %v6505_v38 = vld [vmem:[#allocation26_spill] sm:$0xff]  ;;  %v1974_v42 = vsub.f32 %v4198_v47, %v5293_v15  ;;  %v1969_v48 = vsub.f32 %v6506_v3, %v5293_v15 }
 0x6e3   :  { %3782 = vpow2.f32 %v2001_v51  ;;  %v1967_v55 = vsub.f32 %v6505_v38, %v5293_v15  ;;  %v1999_v7 = vmul.f32 1.442695, %v1979_v5  ;;  %v1981_v51 = vmin.f32 %v1965_v62, 0.0 }
 0x6e4   :  { %3784 = vpow2.f32 %v1995_v50  ;;  %v5320_v50 = vrot.slane %v1934_v63, %v5211_v14  ;;  %v1988_v59 = vmin.f32 %v1972_v0, 0.0  ;;  %v2013_v24 = vmul.f32 1.442695, %v1986_v56 }
 0x6e5   :  { %3786 = vpow2.f32 %v2005_v54  ;;  %v1983_v40 = vmin.f32 %v1967_v55, 0.0  ;;  %v2003_v54 = vmul.f32 1.442695, %v1981_v51  ;;  %v1990_v62 = vmin.f32 %v1974_v42, 0.0  ;;  %v6507_v55 = vld [vmem:[#allocation30_spill] sm:$0xff] }
 0x6e6   :  { %3788 = vpow2.f32 %v1997_v29  ;;  %vm1940_vm13 = vcmp.le.f32.partialorder %v4098_v13, %v5320_v50  ;;  %vm1939_vm0 = vcmp.le.f32.partialorder %v4095_v12, %v5320_v50  ;;  %v2017_v14 = vmul.f32 1.442695, %v1988_v59 }
 0x6e7   :  { %3790 = vpow2.f32 %v2009_v9  ;;  %v2007_v56 = vmul.f32 1.442695, %v1983_v40  ;;  %v1985_v9 = vmin.f32 %v1969_v48, 0.0  ;;  %vm1944_vm15 = vcmp.le.f32.partialorder %v4111_v18, %v5320_v50 }
 0x6e8   :  { %3792 = vpow2.f32 %v1999_v7  ;;  %v1971_v7 = vsub.f32 %v6507_v55, %v5293_v15  ;;  %vm1941_vm11 = vcmp.le.f32.partialorder %v6444_v46, %v5320_v50  ;;  %v2021_v40 = vmul.f32 1.442695, %v1990_v62 }
 0x6e9   :  { %3794 = vpow2.f32 %v2013_v24  ;;  %v2011_v24 = vmul.f32 1.442695, %v1985_v9  ;;  %v1973_v48 = vsub.f32 %v6441_v22, %v5293_v15  ;;  %vm1946_vm14 = vcmp.le.f32.partialorder %v4117_v20, %v5320_v50 }
 0x6ea   :  { %3796 = vpow2.f32 %v2003_v54  ;;  %v1987_v54 = vmin.f32 %v1971_v7, 0.0  ;;  %vm1942_vm2 = vcmp.le.f32.partialorder %v4105_v16, %v5320_v50  ;;  %vm1948_vm1 = vcmp.le.f32.partialorder %v4126_v23, %v5320_v50 }
 0x6eb   :  { %3798 = vpow2.f32 %v2017_v14  ;;  %vm1943_vm12 = vcmp.le.f32.partialorder %v4108_v17, %v5320_v50 }
 0x6ec   :  { %3800 = vpow2.f32 %v2007_v56  ;;  %v2015_v62 = vmul.f32 1.442695, %v1987_v54 }
 0x6ed   :  { %3802 = vpow2.f32 %v2021_v40 }
 0x6ee   :  { %v3779_v37 = vpop.eup %3778  ;;  %3804 = vpow2.f32 %v2011_v24 }
 0x6ef   :  { %v3781_v29 = vpop.eup %3780  ;;  %v2024_v5 = vsel %vm1940_vm13, %v3779_v37, 0.0  ;;  %3806 = vpow2.f32 %v2015_v62  ;;  %vm1950_vm13 = vcmp.le.f32.partialorder %v4134_v26, %v5320_v50 }
 0x6f0   :  { %v3783_v0 = vpop.eup %3782  ;;  %2062 = vperm.xlu0 %3619, %v2024_v5   ;;  %v2023_v63 = vsel %vm1939_vm0, %v3781_v29, 0.0  ;;  %vm1945_vm0 = vcmp.le.f32.partialorder %v4114_v19, %v5320_v50 }
 0x6f1   :  { %v3785_v51 = vpop.eup %3784  ;;  %2057 = vperm.xlu1 %3618, %v2023_v63   ;;  %v2028_v59 = vsel %vm1944_vm15, %v3783_v0, 0.0  ;;  %v1989_v0 = vmin.f32 %v1973_v48, 0.0  ;;  %vm1952_vm15 = vcmp.le.f32.partialorder %v4144_v30, %v5320_v50 }
 0x6f2   :  { %v3787_v42 = vpop.eup %3786  ;;  %v2025_v37 = vsel %vm1941_vm11, %v3785_v51, 0.0  ;;  %vm1947_vm11 = vcmp.le.f32.partialorder %v4120_v21, %v5320_v50 }
 0x6f3   :  { %v3789_v29 = vpop.eup %3788  ;;  %v2030_v14 = vsel %vm1946_vm14, %v3787_v42, 0.0  ;;  %v2019_v51 = vmul.f32 1.442695, %v1989_v0  ;;  %vm1954_vm14 = vcmp.le.f32.partialorder %v4152_v33, %v5320_v50  ;;  %v4043_v0 = vmov 5  }
 0x6f4   :  { %2082 = vperm.xlu0 %3619, %v2028_v59   ;;  %v3791_v5 = vpop.eup %3790  ;;  %v2026_v56 = vsel %vm1942_vm2, %v3789_v29, 0.0  ;;  %vm1949_vm2 = vcmp.le.f32.partialorder %v4131_v25, %v5320_v50 }
 0x6f5   :  { %2067 = vperm.xlu1 %3618, %v2025_v37   ;;  %v3793_v63 = vpop.eup %3792  ;;  %v2032_v15 = vsel %vm1948_vm1, %v3791_v5, 0.0  ;;  %3808 = vpow2.f32 %v2019_v51  ;;  %vm1951_vm1 = vcmp.le.f32.partialorder %v4139_v28, %v5320_v50 }
 0x6f6   :  { %v3795_v9 = vpop.eup %3794  ;;  %v2027_v7 = vsel %vm1943_vm12, %v3793_v63, 0.0  ;;  %vm1953_vm12 = vcmp.le.f32.partialorder %v4147_v31, %v5320_v50 }
 0x6f7   :  { %v3797_v59 = vpop.eup %3796  ;;  %v2034_v42 = vsel %vm1950_vm13, %v3795_v9, 0.0  ;;  %vm2040_vm13 = vcmp.ge.f32.partialorder %v5194_v27, %v5217_v44 }
 0x6f8   :  { %2092 = vperm.xlu0 %3619, %v2030_v14   ;;  %v3799_v40 = vpop.eup %3798  ;;  %v2029_v24 = vsel %vm1945_vm0, %v3797_v59, 0.0  ;;  %vm2039_vm0 = vcmp.ge.f32.partialorder %v5192_v8, %v5217_v44 }
 0x6f9   :  { %2072 = vperm.xlu1 %3618, %v2026_v56   ;;  %v3801_v37 = vpop.eup %3800  ;;  %v2036_v54 = vsel %vm1952_vm15, %v3799_v40, 0.0  ;;  %vm2041_vm15 = vcmp.ge.f32.partialorder %v5196_v52, %v5217_v44 }
 0x6fa   :  { %v3803_v48 = vpop.eup %3802  ;;  %v2031_v29 = vsel %vm1947_vm11, %v3801_v37, 0.0  ;;  %vm2042_vm11 = vcmp.ge.f32.partialorder %v5198_v4, %v5217_v44 }
 0x6fb   :  { %v3805_v14 = vpop.eup %3804  ;;  %v2038_v5 = vsel %vm1954_vm14, %v3803_v48, 0.0  ;;  %vm2043_vm14 = vcmp.ge.f32.partialorder %v5200_v6, %v5217_v44 }
 0x6fc   :  { %2102 = vperm.xlu0 %3619, %v2032_v15   ;;  %v2033_v56 = vsel %vm1949_vm2, %v3805_v14, 0.0  ;;  %v3807_v62 = vpop.eup %3806  ;;  %vm2044_vm2 = vcmp.ge.f32.partialorder %v5202_v60, %v5217_v44 }
 0x6fd   :  { %2077 = vperm.xlu1 %3618, %v2027_v7   ;;  %v2035_v63 = vsel %vm1951_vm1, %v3807_v62, 0.0  ;;  %vm2045_vm1 = vcmp.ge.f32.partialorder %v5204_v41, %v5217_v44 }
 0x700   :  { %2112 = vperm.xlu0 %3619, %v2034_v42  }
 0x701   :  { %2087 = vperm.xlu1 %3618, %v2029_v24  }
 0x702   :  { %v3809_v15 = vpop.eup %3808 }
 0x703   :  { %v2037_v9 = vsel %vm1953_vm12, %v3809_v15, 0.0  ;;  %vm2046_vm12 = vcmp.ge.f32.partialorder %v5248_v2, %v5217_v44 }
 0x704   :  { %2122 = vperm.xlu0 %3619, %v2036_v54  }
 0x705   :  { %2097 = vperm.xlu1 %3618, %v2031_v29  }
 0x708   :  { %2132 = vperm.xlu0 %3619, %v2038_v5  }
 0x709   :  { %2107 = vperm.xlu1 %3618, %v2033_v56  }
 0x70c   :  { %3620 = vset.pattern.permute.xlu0 %v4043_v0 }
 0x70d   :  { %2117 = vperm.xlu1 %3618, %v2035_v63   ;;  %2198 = vperm.xlu0 %3620, %v4095_v12  }
 0x711   :  { %2127 = vperm.xlu1 %3618, %v2037_v9   ;;  %2202 = vperm.xlu0 %3620, %v4098_v13  }
 0x715   :  { %2206 = vperm.xlu0 %3620, %v6444_v46   ;;  %3621 = vset.pattern.permute.xlu1 %v4043_v0 }
 0x719   :  { %2210 = vperm.xlu0 %3620, %v4105_v16  }
 0x71d   :  { %2214 = vperm.xlu0 %3620, %v4108_v17  }
 0x721   :  { %2218 = vperm.xlu0 %3620, %v4111_v18  }
 0x725   :  { %2222 = vperm.xlu0 %3620, %v4114_v19  }
 0x729   :  { %2226 = vperm.xlu0 %3620, %v4117_v20  }
 0x72d   :  { %2234 = vperm.xlu0 %3620, %v4126_v23  }
 0x731   :  { %2238 = vperm.xlu0 %3620, %v4131_v25  }
 0x735   :  { %2242 = vperm.xlu0 %3620, %v4134_v26  }
 0x739   :  { %2246 = vperm.xlu0 %3620, %v4139_v28  }
 0x73d   :  { %2254 = vperm.xlu0 %3620, %v4147_v31  }
 0x76b   :  { %v2063_v50 = vpop.permute.xlu0 %2062 }
 0x76c   :  { %v2058_v7 = vpop.permute.xlu1 %2057  ;;  %v2136_v40 = vsel %vm2040_vm13, %v2063_v50, 0.0  ;;  %vm2047_vm13 = vcmp.ge.f32.partialorder %v5206_v49, %v5217_v44 }
 0x76d   :  { %v2135_v42 = vsel %vm2039_vm0, %v2058_v7, 0.0  ;;  %vm2048_vm0 = vcmp.ge.f32.partialorder %v5208_v1, %v5217_v44 }
 0x76e   :  { %v2151_v24 = vadd.f32 %v2136_v40, %v2135_v42 }
 0x76f   :  { %v2083_v51 = vpop.permute.xlu0 %2082 }
 0x770   :  { %v2068_v59 = vpop.permute.xlu1 %2067  ;;  %v2140_v62 = vsel %vm2044_vm2, %v2083_v51, 0.0  ;;  %vm2052_vm2 = vcmp.ge.f32.partialorder %v5246_v61, %v5217_v44 }
 0x771   :  { %v2137_v37 = vsel %vm2041_vm15, %v2068_v59, 0.0  ;;  %vm2049_vm15 = vcmp.ge.f32.partialorder %v5213_v57, %v5217_v44 }
 0x772   :  { %v2152_v14 = vadd.f32 %v2151_v24, %v2137_v37 }
 0x773   :  { %v2093_v54 = vpop.permute.xlu0 %2092 }
 0x774   :  { %v2073_v48 = vpop.permute.xlu1 %2072  ;;  %v2142_v9 = vsel %vm2046_vm12, %v2093_v54, 0.0  ;;  %vm2054_vm12 = vcmp.ge.f32.partialorder %v5272_v39, %v5217_v44 }
 0x775   :  { %v2138_v29 = vsel %vm2042_vm11, %v2073_v48, 0.0  ;;  %vm2050_vm11 = vcmp.ge.f32.partialorder %v5226_v34, %v5217_v44 }
 0x776   :  { %v2153_v5 = vadd.f32 %v2152_v14, %v2138_v29 }
 0x777   :  { %v2103_v56 = vpop.permute.xlu0 %2102 }
 0x778   :  { %v2078_v8 = vpop.permute.xlu1 %2077  ;;  %v2144_v41 = vsel %vm2048_vm0, %v2103_v56, 0.0 }
 0x779   :  { %v2139_v27 = vsel %vm2043_vm14, %v2078_v8, 0.0  ;;  %vm2051_vm14 = vcmp.ge.f32.partialorder %v5238_v58, %v5217_v44 }
 0x77a   :  { %v2154_v52 = vadd.f32 %v2153_v5, %v2139_v27 }
 0x77b   :  { %v2113_v6 = vpop.permute.xlu0 %2112 }
 0x77c   :  { %v2155_v0 = vadd.f32 %v2154_v52, %v2140_v62  ;;  %v2088_v4 = vpop.permute.xlu1 %2087  ;;  %v2146_v49 = vsel %vm2050_vm11, %v2113_v6, 0.0 }
 0x77d   :  { %v2141_v63 = vsel %vm2045_vm1, %v2088_v4, 0.0  ;;  %vm2053_vm1 = vcmp.ge.f32.partialorder %v5261_v11, %v5217_v44 }
 0x77e   :  { %v2156_v15 = vadd.f32 %v2155_v0, %v2141_v63  ;;  %v2178_v63 = vmul.f32 -0.22314355, %v5281_v53 }
 0x77f   :  { %v2123_v42 = vpop.permute.xlu0 %2122 }
 0x780   :  { %v2157_v50 = vadd.f32 %v2156_v15, %v2142_v9  ;;  %v2098_v60 = vpop.permute.xlu1 %2097  ;;  %v2148_v57 = vsel %vm2052_vm2, %v2123_v42, 0.0  ;;  %v2179_v11 = vmul.f32 1.442695, %v2178_v63 }
 0x781   :  { %v2143_v7 = vsel %vm2047_vm13, %v2098_v60, 0.0 }
 0x782   :  { %v2158_v51 = vadd.f32 %v2157_v50, %v2143_v7  ;;  %v6508_v7 = vld [vmem:[#allocation35_spill] sm:$0xff] }
 0x783   :  { %v2133_v29 = vpop.permute.xlu0 %2132  ;;  %vm2177_vm13 = vcmp.lt.f32.partialorder %v5281_v53, %v6508_v7 }
 0x784   :  { %v2159_v59 = vadd.f32 %v2158_v51, %v2144_v41  ;;  %v2108_v40 = vpop.permute.xlu1 %2107  ;;  %v2150_v58 = vsel %vm2054_vm12, %v2133_v29, 0.0  ;;  %v6511_v29 = vmov 0.0  }
 0x785   :  { %v2145_v2 = vsel %vm2049_vm15, %v2108_v40, 0.0 }
 0x786   :  { %v2160_v37 = vadd.f32 %v2159_v59, %v2145_v2 }
 0x788   :  { %v2161_v24 = vadd.f32 %v2160_v37, %v2146_v49  ;;  %v2118_v54 = vpop.permute.xlu1 %2117  ;;  %v5416_v59 = vpop.permute.xlu0 %2198  ;;  %v6509_v49 = vld [vmem:[#allocation34_spill] sm:$0xff] }
 0x789   :  { %v2147_v1 = vsel %vm2051_vm14, %v2118_v54, 0.0 }
 0x78a   :  { %v2162_v48 = vadd.f32 %v2161_v24, %v2147_v1  ;;  %v5431_v24 = vsub.s32 5, %v6509_v49  ;;  %v6510_v1 = vld [vmem:[#allocation16_spill] sm:$0xff] }
 0x78c   :  { %v2163_v14 = vadd.f32 %v2162_v48, %v2148_v57  ;;  %v2128_v34 = vpop.permute.xlu1 %2127  ;;  %v5437_v48 = vrot.slane %v6510_v1, %v5431_v24 }
 0x78d   :  { %v2149_v5 = vsel %vm2053_vm1, %v2128_v34, 0.0 }
 0x78e   :  { %v2164_v8 = vadd.f32 %v2163_v14, %v2149_v5  ;;  %vm2265_vm0 = vcmp.lt.f32.partialorder %v5416_v59, %v5437_v48 }
 0x78f   :  { %v3542_v34 = vsel %vm2265_vm0, 1.0, %v6511_v29 }
 0x790   :  { %v2165_v27 = vadd.f32 %v2164_v8, %v2150_v58 }
 0x792   :  { %v2166_v56 = vrot.slane %v2165_v27, 4 }
 0x794   :  { %v2167_v52 = vadd.f32 %v2166_v56, %v2165_v27 }
 0x796   :  { %v2168_v62 = vrot.slane %v2167_v52, 2 }
 0x798   :  { %v2169_v0 = vadd.f32 %v2168_v62, %v2167_v52 }
 0x79a   :  { %v2170_v61 = vrot.slane %v2169_v0, 1 }
 0x79c   :  { %v2171_v4 = vadd.f32 %v2170_v61, %v2169_v0 }
 0x79e   :  { %v2173_v15 = vmax.f32 %v2171_v4, 1e-30 }
 0x7a0   :  { %3810 = vlog2.f32 %v2173_v15 }
 0x7a1   :  { %3812 = vpow2.f32 %v2179_v11 }
 0x7ad   :  { %v3811_v9 = vpop.eup %3810 }
 0x7ae   :  { %v2175_v6 = vmul.f32 0.6931472, %v3811_v9  ;;  %v3813_v39 = vpop.eup %3812 }
 0x7b0   :  { %v2176_v50 = vadd.f32 %v2175_v6, %v5289_v36  ;;  %v5418_v36 = vpop.permute.xlu0 %2202 }
 0x7b2   :  { %v2181_v44 = vsub.f32 %v5185_v10, %v2176_v50 }
 0x7b4   :  { %v2182_v60 = vmul.f32 %v3813_v39, %v2181_v44  ;;  %v5420_v40 = vpop.permute.xlu0 %2206 }
 0x7b5   :  { %vm2267_vm15 = vcmp.lt.f32.partialorder %v5420_v40, %v5437_v48 }
 0x7b6   :  { %v2183_v51 = vsel %vm2177_vm13, %v2182_v60, 0.0  ;;  %v3544_v5 = vsel %vm2267_vm15, 1.0, %v6511_v29 }
 0x7b7   :  { %v2184_v41 = vsel %vm1927_vm4, %v2183_v51, 0.0  ;;  %vm2266_vm4 = vcmp.lt.f32.partialorder %v5418_v36, %v5437_v48 }
 0x7b8   :  { %2185 = vadd.xlane.f32.xlu1 %v2184_v41  ;;  %v5422_v2 = vpop.permute.xlu0 %2210  ;;  %v3543_v14 = vsel %vm2266_vm4, 1.0, %v6511_v29 }
 0x7b9   :  { %vm2268_vm11 = vcmp.lt.f32.partialorder %v5422_v2, %v5437_v48  ;;  %v2313_v8 = vadd.f32 %v3543_v14, %v3542_v34 }
 0x7ba   :  { %v3545_v58 = vsel %vm2268_vm11, 1.0, %v6511_v29 }
 0x7bb   :  { %v2314_v56 = vadd.f32 %v3544_v5, %v2313_v8 }
 0x7bc   :  { %v5424_v42 = vpop.permute.xlu0 %2214 }
 0x7bd   :  { %vm2269_vm14 = vcmp.lt.f32.partialorder %v5424_v42, %v5437_v48  ;;  %v2315_v62 = vadd.f32 %v3545_v58, %v2314_v56 }
 0x7be   :  { %v3546_v52 = vsel %vm2269_vm14, 1.0, %v6511_v29 }
 0x7bf   :  { %v2316_v61 = vadd.f32 %v3546_v52, %v2315_v62 }
 0x7c0   :  { %v5426_v53 = vpop.permute.xlu0 %2218 }
 0x7c1   :  { %vm2270_vm2 = vcmp.lt.f32.partialorder %v5426_v53, %v5437_v48 }
 0x7c2   :  { %v3547_v0 = vsel %vm2270_vm2, 1.0, %v6511_v29 }
 0x7c3   :  { %v2317_v11 = vadd.f32 %v3547_v0, %v2316_v61 }
 0x7c4   :  { %v5428_v37 = vpop.permute.xlu0 %2222 }
 0x7c5   :  { %vm2271_vm1 = vcmp.lt.f32.partialorder %v5428_v37, %v5437_v48 }
 0x7c6   :  { %v3548_v4 = vsel %vm2271_vm1, 1.0, %v6511_v29 }
 0x7c7   :  { %v2318_v6 = vadd.f32 %v3548_v4, %v2317_v11 }
 0x7c8   :  { %v5433_v54 = vpop.permute.xlu0 %2226 }
 0x7c9   :  { %2230 = vperm.xlu1 %3621, %v4120_v21   ;;  %vm2272_vm12 = vcmp.lt.f32.partialorder %v5433_v54, %v5437_v48 }
 0x7ca   :  { %v3549_v9 = vsel %vm2272_vm12, 1.0, %v6511_v29  ;;  %vm2337_vm12 = vcmask 1045509  }
 0x7cb   :  { %v2319_v44 = vadd.f32 %v3549_v9, %v2318_v6 }
 0x7cc   :  { %v5441_v57 = vpop.permute.xlu0 %2234 }
 0x7cd   :  { %2250 = vperm.xlu1 %3621, %v4144_v30   ;;  %vm2274_vm13 = vcmp.lt.f32.partialorder %v5441_v57, %v5437_v48 }
 0x7ce   :  { %v3551_v41 = vsel %vm2274_vm13, 1.0, %v6511_v29 }
 0x7d0   :  { %v5455_v27 = vpop.permute.xlu0 %2238 }
 0x7d1   :  { %2258 = vperm.xlu1 %3621, %v4152_v33   ;;  %vm2275_vm0 = vcmp.lt.f32.partialorder %v5455_v27, %v5437_v48 }
 0x7d2   :  { %v3552_v5 = vsel %vm2275_vm0, 1.0, %v6511_v29 }
 0x7d4   :  { %v5466_v63 = vpop.permute.xlu0 %2242 }
 0x7d5   :  { %vm2276_vm15 = vcmp.lt.f32.partialorder %v5466_v63, %v5437_v48 }
 0x7d6   :  { %v3553_v58 = vsel %vm2276_vm15, 1.0, %v6511_v29 }
 0x7d8   :  { %v5477_v39 = vpop.permute.xlu0 %2246 }
 0x7d9   :  { %vm2277_vm11 = vcmp.lt.f32.partialorder %v5477_v39, %v5437_v48 }
 0x7da   :  { %v3554_v62 = vsel %vm2277_vm11, 1.0, %v6511_v29 }
 0x7dc   :  { %v5491_v56 = vpop.permute.xlu0 %2254 }
 0x7dd   :  { %vm2279_vm2 = vcmp.lt.f32.partialorder %v5491_v56, %v5437_v48 }
 0x7de   :  { %v3556_v9 = vsel %vm2279_vm2, 1.0, %v6511_v29 }
 0x841   :  { %v5468_v15 = vpop.xlane.xlu1 %2185 }
 0x842   :  { %6512 = vst [vmem:[#allocation32_spill] sm:$0xff] %v5468_v15 }
 0x845   :  { %v5471_v50 = vpop.permute.xlu1 %2230 }
 0x846   :  { %vm2273_vm4 = vcmp.lt.f32.partialorder %v5471_v50, %v5437_v48 }
 0x847   :  { %v3550_v60 = vsel %vm2273_vm4, 1.0, %v6511_v29 }
 0x848   :  { %v2320_v51 = vadd.f32 %v3550_v60, %v2319_v44 }
 0x849   :  { %v5483_v14 = vpop.permute.xlu1 %2250 }
 0x84a   :  { %v2321_v34 = vadd.f32 %v3551_v41, %v2320_v51  ;;  %vm2278_vm14 = vcmp.lt.f32.partialorder %v5483_v14, %v5437_v48 }
 0x84b   :  { %v3555_v4 = vsel %vm2278_vm14, 1.0, %v6511_v29 }
 0x84c   :  { %v2322_v8 = vadd.f32 %v3552_v5, %v2321_v34 }
 0x84d   :  { %v5496_v0 = vpop.permute.xlu1 %2258 }
 0x84e   :  { %v2323_v52 = vadd.f32 %v3553_v58, %v2322_v8  ;;  %vm2280_vm1 = vcmp.lt.f32.partialorder %v5496_v0, %v5437_v48 }
 0x84f   :  { %v3557_v44 = vsel %vm2280_vm1, 1.0, %v6511_v29 }
 0x850   :  { %v2324_v61 = vadd.f32 %v3554_v62, %v2323_v52  ;;  %v6513_v52 = vld [vmem:[#allocation33_spill] sm:$0xff] }
 0x852   :  { %v2325_v11 = vadd.f32 %v3555_v4, %v2324_v61 }
 0x854   :  { %v2326_v6 = vadd.f32 %v3556_v9, %v2325_v11 }
 0x856   :  { %v2327_v60 = vadd.f32 %v3557_v44, %v2326_v6  ;;  %v6515_v44 = vld [vmem:[#allocation19_spill] sm:$0xff] }
 0x858   :  { %v2328_v51 = vrot.slane %v2327_v60, 4 }
 0x85a   :  { %v2329_v41 = vadd.f32 %v2328_v51, %v2327_v60  ;;  %v6516_v51 = vld [vmem:[#allocation18_spill] sm:$0xff] }
 0x85c   :  { %v2330_v34 = vrot.slane %v2329_v41, 2 }
 0x85e   :  { %v2331_v5 = vadd.f32 %v2330_v34, %v2329_v41 }
 0x860   :  { %v2332_v8 = vrot.slane %v2331_v5, 1 }
 0x862   :  { %v5505_v58 = vadd.f32 %v2332_v8, %v2331_v5 }
 0x864   :  { %vm2335_vm13 = vcmp.lt.f32.partialorder %v5505_v58, %v6513_v52 }
 0x865   :  { %v2341_v62 = vsel %vm2335_vm13, %v6510_v1, -1e+09  ;;  %v2336_v61 = vsel %vm2335_vm13, %v5185_v10, -1e+30 }
 0x866   :  { %v2342_v4 = vsel %vm2337_vm12, %v2341_v62, -inf  ;;  %v2338_v11 = vsel %vm2337_vm12, %v2336_v61, -inf  ;;  %v6517_v62 = vld [vmem:[#allocation23_spill] sm:$0xff] }
 0x867   :  { %2343 = vmax.xlane.f32.xlu1 %v2342_v4  ;;  %2339 = vmax.xlane.f32.xlu0 %v2338_v11 }
 0x8f0   :  { %v5513_v9 = vpop.xlane.xlu0 %2339 }
 0x8f1   :  { %6514 = vst [vmem:[#allocation17_spill] sm:$0xff] %v5513_v9  ;;  %v5517_v6 = vrot.slane %v5513_v9, %v5431_v24 }
 0x8f3   :  { %v2370_v60 = vsub.f32 %v6515_v44, %v5517_v6  ;;  %v2369_v41 = vsub.f32 %v6516_v51, %v5517_v6  ;;  %v2372_v10 = vsub.f32 %v6490_v45, %v5517_v6  ;;  %v2371_v34 = vsub.f32 %v6488_v43, %v5517_v6 }
 0x8f4   :  { %v2374_v61 = vsub.f32 %v6517_v62, %v5517_v6  ;;  %v2373_v15 = vsub.f32 %v4149_v32, %v5517_v6  ;;  %v2376_v45 = vsub.f32 %v6442_v35, %v5517_v6  ;;  %v6519_v62 = vld [vmem:[#allocation27_spill] sm:$0xff] }
 0x8f5   :  { %v2386_v5 = vmin.f32 %v2370_v60, 0.0  ;;  %v2385_v8 = vmin.f32 %v2369_v41, 0.0  ;;  %v2388_v4 = vmin.f32 %v2372_v10, 0.0  ;;  %v2387_v11 = vmin.f32 %v2371_v34, 0.0  ;;  %v6518_v60 = vld [vmem:[#allocation24_spill] sm:$0xff] }
 0x8f6   :  { %v2390_v7 = vmin.f32 %v2374_v61, 0.0  ;;  %v2389_v29 = vmin.f32 %v2373_v15, 0.0  ;;  %v2375_v41 = vsub.f32 %v6518_v60, %v5517_v6  ;;  %v2392_v34 = vmin.f32 %v2376_v45, 0.0 }
 0x8f7   :  { %v2403_v44 = vmul.f32 1.442695, %v2386_v5  ;;  %v2401_v52 = vmul.f32 1.442695, %v2385_v8  ;;  %v2407_v51 = vmul.f32 1.442695, %v2388_v4  ;;  %v2378_v32 = vsub.f32 %v6519_v62, %v5517_v6 }
 0x8f8   :  { %v2405_v9 = vmul.f32 1.442695, %v2387_v11  ;;  %v2411_v10 = vmul.f32 1.442695, %v2390_v7  ;;  %v2409_v5 = vmul.f32 1.442695, %v2389_v29  ;;  %v2377_v15 = vsub.f32 %v6505_v38, %v5517_v6  ;;  %v2344_v11 = vpop.xlane.xlu1 %2343 }
 0x8f9   :  { %3814 = vpow2.f32 %v2403_v44  ;;  %v2391_v8 = vmin.f32 %v2375_v41, 0.0  ;;  %v2394_v61 = vmin.f32 %v2378_v32, 0.0  ;;  %v6520_v4 = vld [vmem:[#allocation29_spill] sm:$0xff]  ;;  %v2415_v35 = vmul.f32 1.442695, %v2392_v34  ;;  %v6521_v32 = vld [vmem:[#allocation31_spill] sm:$0xff] }
 0x8fa   :  { %3816 = vpow2.f32 %v2401_v52  ;;  %v2380_v44 = vsub.f32 %v6520_v4, %v5517_v6  ;;  %v2393_v52 = vmin.f32 %v2377_v15, 0.0  ;;  %v2379_v45 = vsub.f32 %v6506_v3, %v5517_v6 }
 0x8fb   :  { %3818 = vpow2.f32 %v2407_v51  ;;  %v2413_v7 = vmul.f32 1.442695, %v2391_v8  ;;  %v2419_v29 = vmul.f32 1.442695, %v2394_v61  ;;  %v2382_v62 = vsub.f32 %v6521_v32, %v5517_v6 }
 0x8fc   :  { %3820 = vpow2.f32 %v2405_v9  ;;  %v5544_v9 = vrot.slane %v2344_v11, %v5431_v24  ;;  %v2396_v51 = vmin.f32 %v2380_v44, 0.0  ;;  %v2417_v41 = vmul.f32 1.442695, %v2393_v52 }
 0x8fd   :  { %3822 = vpow2.f32 %v2411_v10  ;;  %v2395_v4 = vmin.f32 %v2379_v45, 0.0  ;;  %v2381_v10 = vsub.f32 %v6507_v55, %v5517_v6  ;;  %v2398_v8 = vmin.f32 %v2382_v62, 0.0 }
 0x8fe   :  { %3824 = vpow2.f32 %v2409_v5  ;;  %vm2350_vm4 = vcmp.le.f32.partialorder %v4098_v13, %v5544_v9  ;;  %vm2349_vm0 = vcmp.le.f32.partialorder %v4095_v12, %v5544_v9  ;;  %v2423_v24 = vmul.f32 1.442695, %v2396_v51 }
 0x8ff   :  { %3826 = vpow2.f32 %v2415_v35  ;;  %v2384_v15 = vsub.f32 %v4198_v47, %v5517_v6  ;;  %v2421_v11 = vmul.f32 1.442695, %v2395_v4  ;;  %v2397_v52 = vmin.f32 %v2381_v10, 0.0 }
 0x900   :  { %3828 = vpow2.f32 %v2413_v7  ;;  %v2383_v7 = vsub.f32 %v6441_v22, %v5517_v6  ;;  %vm2352_vm15 = vcmp.le.f32.partialorder %v4105_v16, %v5544_v9  ;;  %vm2351_vm11 = vcmp.le.f32.partialorder %v6444_v46, %v5544_v9 }
 0x901   :  { %3830 = vpow2.f32 %v2419_v29  ;;  %v2427_v29 = vmul.f32 1.442695, %v2398_v8  ;;  %v2400_v51 = vmin.f32 %v2384_v15, 0.0  ;;  %v2425_v4 = vmul.f32 1.442695, %v2397_v52 }
 0x902   :  { %3832 = vpow2.f32 %v2417_v41  ;;  %v2399_v10 = vmin.f32 %v2383_v7, 0.0  ;;  %vm2354_vm14 = vcmp.le.f32.partialorder %v4111_v18, %v5544_v9  ;;  %vm2353_vm2 = vcmp.le.f32.partialorder %v4108_v17, %v5544_v9 }
 0x903   :  { %3834 = vpow2.f32 %v2423_v24  ;;  %vm2356_vm1 = vcmp.le.f32.partialorder %v4117_v20, %v5544_v9  ;;  %vm2355_vm13 = vcmp.le.f32.partialorder %v4114_v19, %v5544_v9 }
 0x904   :  { %3836 = vpow2.f32 %v2421_v11  ;;  %v2429_v15 = vmul.f32 1.442695, %v2399_v10 }
 0x905   :  { %3838 = vpow2.f32 %v2427_v29 }
 0x906   :  { %v3815_v34 = vpop.eup %3814  ;;  %3840 = vpow2.f32 %v2425_v4 }
 0x907   :  { %v3817_v5 = vpop.eup %3816  ;;  %v2434_v35 = vsel %vm2350_vm4, %v3815_v34, 0.0  ;;  %vm2358_vm4 = vcmp.le.f32.partialorder %v4126_v23, %v5544_v9 }
 0x908   :  { %v3819_v61 = vpop.eup %3818  ;;  %2472 = vperm.xlu1 %3621, %v2434_v35   ;;  %v2433_v44 = vsel %vm2349_vm0, %v3817_v5, 0.0  ;;  %v2431_v35 = vmul.f32 1.442695, %v2400_v51  ;;  %vm2357_vm0 = vcmp.le.f32.partialorder %v4120_v21, %v5544_v9 }
 0x909   :  { %v3821_v45 = vpop.eup %3820  ;;  %2467 = vperm.xlu0 %3620, %v2433_v44   ;;  %v2436_v62 = vsel %vm2352_vm15, %v3819_v61, 0.0  ;;  %vm2360_vm15 = vcmp.le.f32.partialorder %v4134_v26, %v5544_v9 }
 0x90a   :  { %v3823_v41 = vpop.eup %3822  ;;  %v2435_v34 = vsel %vm2351_vm11, %v3821_v45, 0.0  ;;  %3842 = vpow2.f32 %v2431_v35  ;;  %vm2359_vm11 = vcmp.le.f32.partialorder %v4131_v25, %v5544_v9 }
 0x90b   :  { %v3825_v5 = vpop.eup %3824  ;;  %v2438_v6 = vsel %vm2354_vm14, %v3823_v41, 0.0  ;;  %3844 = vpow2.f32 %v2429_v15  ;;  %vm2362_vm14 = vcmp.le.f32.partialorder %v4144_v30, %v5544_v9 }
 0x90c   :  { %2482 = vperm.xlu1 %3621, %v2436_v62   ;;  %v3827_v24 = vpop.eup %3826  ;;  %v2437_v8 = vsel %vm2353_vm2, %v3825_v5, 0.0  ;;  %vm2361_vm2 = vcmp.le.f32.partialorder %v4139_v28, %v5544_v9 }
 0x90d   :  { %2477 = vperm.xlu0 %3620, %v2435_v34   ;;  %v3829_v61 = vpop.eup %3828  ;;  %v2440_v11 = vsel %vm2356_vm1, %v3827_v24, 0.0  ;;  %vm2364_vm1 = vcmp.le.f32.partialorder %v4152_v33, %v5544_v9 }
 0x90e   :  { %v3831_v44 = vpop.eup %3830  ;;  %v2439_v7 = vsel %vm2355_vm13, %v3829_v61, 0.0  ;;  %vm2363_vm13 = vcmp.le.f32.partialorder %v4147_v31, %v5544_v9  ;;  %v6328_v61 = vmov 6  }
 0x90f   :  { %v3833_v52 = vpop.eup %3832  ;;  %v2442_v45 = vsel %vm2358_vm4, %v3831_v44, 0.0  ;;  %v6329_v44 = vmov 7   ;;  %vm2450_vm4 = vcmp.ge.f32.partialorder %v5418_v36, %v5437_v48 }
 0x910   :  { %2492 = vperm.xlu1 %3621, %v2438_v6   ;;  %v3835_v62 = vpop.eup %3834  ;;  %v2441_v29 = vsel %vm2357_vm0, %v3833_v52, 0.0  ;;  %vm2449_vm0 = vcmp.ge.f32.partialorder %v5416_v59, %v5437_v48 }
 0x911   :  { %2487 = vperm.xlu0 %3620, %v2437_v8   ;;  %v3837_v51 = vpop.eup %3836  ;;  %v2444_v41 = vsel %vm2360_vm15, %v3835_v62, 0.0  ;;  %vm2451_vm15 = vcmp.ge.f32.partialorder %v5420_v40, %v5437_v48 }
 0x912   :  { %v3839_v34 = vpop.eup %3838  ;;  %v2443_v4 = vsel %vm2359_vm11, %v3837_v51, 0.0  ;;  %vm2452_vm11 = vcmp.ge.f32.partialorder %v5422_v2, %v5437_v48 }
 0x913   :  { %v3841_v10 = vpop.eup %3840  ;;  %v2446_v5 = vsel %vm2362_vm14, %v3839_v34, 0.0  ;;  %vm2453_vm14 = vcmp.ge.f32.partialorder %v5424_v42, %v5437_v48 }
 0x914   :  { %2502 = vperm.xlu1 %3621, %v2440_v11   ;;  %v2445_v35 = vsel %vm2361_vm2, %v3841_v10, 0.0  ;;  %vm2454_vm2 = vcmp.ge.f32.partialorder %v5426_v53, %v5437_v48 }
 0x915   :  { %2497 = vperm.xlu0 %3620, %v2439_v7  }
 0x917   :  { %v3843_v6 = vpop.eup %3842 }
 0x918   :  { %2512 = vperm.xlu1 %3621, %v2442_v45   ;;  %v3845_v24 = vpop.eup %3844  ;;  %v2448_v8 = vsel %vm2364_vm1, %v3843_v6, 0.0  ;;  %vm2455_vm1 = vcmp.ge.f32.partialorder %v5428_v37, %v5437_v48 }
 0x919   :  { %2507 = vperm.xlu0 %3620, %v2441_v29   ;;  %v2447_v15 = vsel %vm2363_vm13, %v3845_v24, 0.0  ;;  %vm2456_vm13 = vcmp.ge.f32.partialorder %v5433_v54, %v5437_v48 }
 0x91c   :  { %2522 = vperm.xlu1 %3621, %v2444_v41  }
 0x91d   :  { %2517 = vperm.xlu0 %3620, %v2443_v4  }
 0x920   :  { %2532 = vperm.xlu1 %3621, %v2446_v5  }
 0x921   :  { %2527 = vperm.xlu0 %3620, %v2445_v35  }
 0x924   :  { %2542 = vperm.xlu1 %3621, %v2448_v8  }
 0x925   :  { %2537 = vperm.xlu0 %3620, %v2447_v15  }
 0x928   :  { %3623 = vset.pattern.permute.xlu1 %v6328_v61 }
 0x929   :  { %3622 = vset.pattern.permute.xlu0 %v6328_v61  ;;  %2612 = vperm.xlu1 %3623, %v4098_v13  }
 0x92a   :  { %2608 = vperm.xlu0 %3622, %v4095_v12  }
 0x92d   :  { %2616 = vperm.xlu1 %3623, %v6444_v46  }
 0x92e   :  { %3624 = vset.pattern.permute.xlu0 %v6329_v44 }
 0x92f   :  { %3018 = vperm.xlu0 %3624, %v4095_v12  }
 0x931   :  { %3625 = vset.pattern.permute.xlu1 %v6329_v44 }
 0x932   :  { %3022 = vperm.xlu1 %3625, %v4098_v13  }
 0x933   :  { %3026 = vperm.xlu0 %3624, %v6444_v46  }
 0x936   :  { %3626 = vset.pattern.permute.xlu1 %v6328_v61 }
 0x937   :  { %3030 = vperm.xlu0 %3624, %v4105_v16   ;;  %2620 = vperm.xlu1 %3626, %v4105_v16  }
 0x93b   :  { %3034 = vperm.xlu0 %3624, %v4108_v17   ;;  %2624 = vperm.xlu1 %3626, %v4108_v17  }
 0x93f   :  { %3038 = vperm.xlu0 %3624, %v4111_v18   ;;  %2628 = vperm.xlu1 %3626, %v4111_v18  }
 0x943   :  { %3042 = vperm.xlu0 %3624, %v4114_v19   ;;  %2632 = vperm.xlu1 %3626, %v4114_v19  }
 0x947   :  { %3046 = vperm.xlu0 %3624, %v4117_v20   ;;  %2636 = vperm.xlu1 %3626, %v4117_v20  }
 0x94b   :  { %3050 = vperm.xlu0 %3624, %v4120_v21   ;;  %2640 = vperm.xlu1 %3626, %v4120_v21  }
 0x94f   :  { %3054 = vperm.xlu0 %3624, %v4126_v23   ;;  %2644 = vperm.xlu1 %3626, %v4126_v23  }
 0x953   :  { %3058 = vperm.xlu0 %3624, %v4131_v25   ;;  %2648 = vperm.xlu1 %3626, %v4131_v25  }
 0x957   :  { %3062 = vperm.xlu0 %3624, %v4134_v26   ;;  %2652 = vperm.xlu1 %3626, %v4134_v26  }
 0x95b   :  { %3066 = vperm.xlu0 %3624, %v4139_v28   ;;  %2656 = vperm.xlu1 %3626, %v4139_v28  }
 0x95f   :  { %3070 = vperm.xlu0 %3624, %v4144_v30   ;;  %2660 = vperm.xlu1 %3626, %v4144_v30  }
 0x963   :  { %3074 = vperm.xlu0 %3624, %v4147_v31   ;;  %2664 = vperm.xlu1 %3626, %v4147_v31  }
 0x967   :  { %2668 = vperm.xlu1 %3626, %v4152_v33   ;;  %3628 = vset.pattern.permute.xlu0 %v6328_v61 }
 0x96b   :  { %3627 = vset.pattern.permute.xlu1 %v6329_v44 }
 0x96c   :  { %3078 = vperm.xlu1 %3627, %v4152_v33  }
 0x970   :  { %3629 = vset.pattern.permute.xlu1 %v6328_v61 }
 0x983   :  { %v2473_v9 = vpop.permute.xlu1 %2472 }
 0x984   :  { %v2468_v11 = vpop.permute.xlu0 %2467  ;;  %v2546_v52 = vsel %vm2450_vm4, %v2473_v9, 0.0  ;;  %vm2457_vm4 = vcmp.ge.f32.partialorder %v5471_v50, %v5437_v48 }
 0x985   :  { %v2545_v7 = vsel %vm2449_vm0, %v2468_v11, 0.0  ;;  %vm2458_vm0 = vcmp.ge.f32.partialorder %v5441_v57, %v5437_v48 }
 0x986   :  { %v2561_v62 = vadd.f32 %v2546_v52, %v2545_v7 }
 0x987   :  { %v2483_v45 = vpop.permute.xlu1 %2482 }
 0x988   :  { %v2478_v29 = vpop.permute.xlu0 %2477  ;;  %v2548_v34 = vsel %vm2452_vm11, %v2483_v45, 0.0  ;;  %vm2460_vm11 = vcmp.ge.f32.partialorder %v5466_v63, %v5437_v48 }
 0x989   :  { %v2547_v51 = vsel %vm2451_vm15, %v2478_v29, 0.0  ;;  %vm2459_vm15 = vcmp.ge.f32.partialorder %v5455_v27, %v5437_v48 }
 0x98a   :  { %v2562_v41 = vadd.f32 %v2561_v62, %v2547_v51 }
 0x98b   :  { %v2493_v4 = vpop.permute.xlu1 %2492 }
 0x98c   :  { %v2563_v59 = vadd.f32 %v2562_v41, %v2548_v34  ;;  %v2488_v36 = vpop.permute.xlu0 %2487  ;;  %v2550_v6 = vsel %vm2454_vm2, %v2493_v4, 0.0  ;;  %v5653_v34 = vsub.s32 6, %v6509_v49  ;;  %vm2462_vm2 = vcmp.ge.f32.partialorder %v5483_v14, %v5437_v48 }
 0x98d   :  { %v2549_v10 = vsel %vm2453_vm14, %v2488_v36, 0.0  ;;  %vm2461_vm14 = vcmp.ge.f32.partialorder %v5477_v39, %v5437_v48 }
 0x98e   :  { %v2564_v5 = vadd.f32 %v2563_v59, %v2549_v10  ;;  %v5661_v39 = vrot.slane %v6510_v1, %v5653_v34 }
 0x98f   :  { %v2503_v40 = vpop.permute.xlu1 %2502 }
 0x990   :  { %v2565_v35 = vadd.f32 %v2564_v5, %v2550_v6  ;;  %v2498_v2 = vpop.permute.xlu0 %2497  ;;  %v2552_v42 = vsel %vm2456_vm13, %v2503_v40, 0.0  ;;  %vm2464_vm13 = vcmp.ge.f32.partialorder %v5496_v0, %v5437_v48  ;;  %v5666_v40 = vsub.s32 7, %v6509_v49 }
 0x991   :  { %v2551_v24 = vsel %vm2455_vm1, %v2498_v2, 0.0  ;;  %vm2463_vm1 = vcmp.ge.f32.partialorder %v5491_v56, %v5437_v48 }
 0x992   :  { %v2566_v8 = vadd.f32 %v2565_v35, %v2551_v24  ;;  %v5678_v48 = vrot.slane %v6510_v1, %v5666_v40 }
 0x993   :  { %v2513_v15 = vpop.permute.xlu1 %2512 }
 0x994   :  { %v2567_v9 = vadd.f32 %v2566_v8, %v2552_v42  ;;  %v2508_v53 = vpop.permute.xlu0 %2507  ;;  %v2554_v37 = vsel %vm2458_vm0, %v2513_v15, 0.0 }
 0x995   :  { %v2553_v11 = vsel %vm2457_vm4, %v2508_v53, 0.0 }
 0x996   :  { %v2568_v52 = vadd.f32 %v2567_v9, %v2553_v11 }
 0x997   :  { %v2523_v7 = vpop.permute.xlu1 %2522 }
 0x998   :  { %v2569_v45 = vadd.f32 %v2568_v52, %v2554_v37  ;;  %v2518_v54 = vpop.permute.xlu0 %2517  ;;  %v2556_v50 = vsel %vm2460_vm11, %v2523_v7, 0.0  ;;  %v2588_v37 = vmul.f32 -0.22314355, %v5505_v58 }
 0x999   :  { %v2555_v62 = vsel %vm2459_vm15, %v2518_v54, 0.0 }
 0x99a   :  { %v2570_v29 = vadd.f32 %v2569_v45, %v2555_v62  ;;  %v2589_v62 = vmul.f32 1.442695, %v2588_v37 }
 0x99b   :  { %v2533_v51 = vpop.permute.xlu1 %2532 }
 0x99c   :  { %v2571_v41 = vadd.f32 %v2570_v29, %v2556_v50  ;;  %v2528_v57 = vpop.permute.xlu0 %2527  ;;  %v2558_v59 = vsel %vm2462_vm2, %v2533_v51, 0.0 }
 0x99d   :  { %v2557_v4 = vsel %vm2461_vm14, %v2528_v57, 0.0 }
 0x99e   :  { %v2572_v27 = vadd.f32 %v2571_v41, %v2557_v4 }
 0x99f   :  { %v2543_v36 = vpop.permute.xlu1 %2542 }
 0x9a0   :  { %v2573_v63 = vadd.f32 %v2572_v27, %v2558_v59  ;;  %v2538_v10 = vpop.permute.xlu0 %2537  ;;  %v2560_v14 = vsel %vm2464_vm13, %v2543_v36, 0.0 }
 0x9a1   :  { %v2559_v5 = vsel %vm2463_vm1, %v2538_v10, 0.0  ;;  %v6528_v10 = vmov 0.0  }
 0x9a2   :  { %v2574_v6 = vadd.f32 %v2573_v63, %v2559_v5 }
 0x9a4   :  { %v2575_v35 = vadd.f32 %v2574_v6, %v2560_v14  ;;  %v5668_v2 = vpop.permute.xlu1 %2612  ;;  %v6529_v6 = vld [vmem:[#allocation17_spill] sm:$0xff] }
 0x9a5   :  { %v5670_v24 = vpop.permute.xlu0 %2608  ;;  %vm2860_vm4 = vcmp.ge.f32.partialorder %v5668_v2, %v5661_v39  ;;  %vm2676_vm8 = vcmp.lt.f32.partialorder %v5668_v2, %v5661_v39 }
 0x9a6   :  { %v2576_v56 = vrot.slane %v2575_v35, 4  ;;  %vm2859_vm0 = vcmp.ge.f32.partialorder %v5670_v24, %v5661_v39  ;;  %vm2675_vm9 = vcmp.lt.f32.partialorder %v5670_v24, %v5661_v39 }
 0x9a8   :  { %v2577_v0 = vadd.f32 %v2576_v56, %v2575_v35  ;;  %v5680_v49 = vpop.permute.xlu1 %2616  ;;  %v3559_v35 = vsel %vm2676_vm8, 1.0, %v6528_v10  ;;  %v3558_v56 = vsel %vm2675_vm9, 1.0, %v6528_v10 }
 0x9a9   :  { %vm2861_vm15 = vcmp.ge.f32.partialorder %v5680_v49, %v5661_v39  ;;  %vm2677_vm14 = vcmp.lt.f32.partialorder %v5680_v49, %v5661_v39 }
 0x9aa   :  { %v2578_v8 = vrot.slane %v2577_v0, 2  ;;  %v5684_v42 = vpop.permute.xlu0 %3018 }
 0x9ab   :  { %vm3085_vm13 = vcmp.lt.f32.partialorder %v5684_v42, %v5678_v48 }
 0x9ac   :  { %v2579_v15 = vadd.f32 %v2578_v8, %v2577_v0  ;;  %v3574_v0 = vsel %vm3085_vm13, 1.0, %v6528_v10 }
 0x9ad   :  { %v5688_v9 = vpop.permute.xlu1 %3022 }
 0x9ae   :  { %v2580_v53 = vrot.slane %v2579_v15, 1  ;;  %v5690_v11 = vpop.permute.xlu0 %3026  ;;  %vm3086_vm3 = vcmp.lt.f32.partialorder %v5688_v9, %v5678_v48 }
 0x9af   :  { %6522 = vst [vmem:[#allocation50_spill] sm:$0xff] %v5690_v11  ;;  %v3575_v5 = vsel %vm3086_vm3, 1.0, %v6528_v10  ;;  %vm3087_vm3 = vcmp.lt.f32.partialorder %v5690_v11, %v5678_v48 }
 0x9b0   :  { %v2581_v52 = vadd.f32 %v2580_v53, %v2579_v15  ;;  %v3133_v8 = vadd.f32 %v3575_v5, %v3574_v0  ;;  %v3576_v5 = vsel %vm3087_vm3, 1.0, %v6528_v10 }
 0x9b2   :  { %v2583_v7 = vmax.f32 %v2581_v52, 1e-30  ;;  %v5697_v45 = vpop.permute.xlu0 %3030  ;;  %v5699_v54 = vpop.permute.xlu1 %2620  ;;  %v5760_v52 = vld [vmem:[#allocation2] sm:$0xff]  ;;  %v3134_v61 = vadd.f32 %v3576_v5, %v3133_v8 }
 0x9b3   :  { %6523 = vst [vmem:[#allocation45_spill] sm:$0xff] %v5697_v45  ;;  %vm2862_vm1 = vcmp.ge.f32.partialorder %v5699_v54, %v5661_v39  ;;  %vm2678_vm5 = vcmp.lt.f32.partialorder %v5699_v54, %v5661_v39  ;;  %vm3088_vm13 = vcmp.lt.f32.partialorder %v5697_v45, %v5678_v48 }
 0x9b4   :  { %3846 = vlog2.f32 %v2583_v7 }
 0x9b5   :  { %3848 = vpow2.f32 %v2589_v62  ;;  %v3560_v62 = vsel %vm2677_vm14, 1.0, %v6528_v10 }
 0x9b6   :  { %v5705_v29 = vpop.permute.xlu0 %3034  ;;  %v5707_v50 = vpop.permute.xlu1 %2624 }
 0x9b7   :  { %6524 = vst [vmem:[#allocation44_spill] sm:$0xff] %v5705_v29  ;;  %vm2863_vm10 = vcmp.ge.f32.partialorder %v5707_v50, %v5661_v39  ;;  %vm2679_vm11 = vcmp.lt.f32.partialorder %v5707_v50, %v5661_v39  ;;  %vm3089_vm3 = vcmp.lt.f32.partialorder %v5705_v29, %v5678_v48 }
 0x9ba   :  { %v5713_v51 = vpop.permute.xlu0 %3038  ;;  %v5715_v41 = vpop.permute.xlu1 %2628 }
 0x9bb   :  { %6525 = vst [vmem:[#allocation65_spill] sm:$0xff] %v5713_v51  ;;  %vm2864_vm7 = vcmp.ge.f32.partialorder %v5715_v41, %v5661_v39  ;;  %vm2680_vm8 = vcmp.lt.f32.partialorder %v5715_v41, %v5661_v39 }
 0x9bc   :  { %v3563_v8 = vsel %vm2680_vm8, 1.0, %v6528_v10 }
 0x9be   :  { %v5721_v57 = vpop.permute.xlu0 %3042  ;;  %v5723_v4 = vpop.permute.xlu1 %2632 }
 0x9bf   :  { %6526 = vst [vmem:[#allocation46_spill] sm:$0xff] %v5721_v57  ;;  %vm2865_vm6 = vcmp.ge.f32.partialorder %v5723_v4, %v5661_v39  ;;  %vm2681_vm9 = vcmp.lt.f32.partialorder %v5723_v4, %v5661_v39 }
 0x9c1   :  { %v3847_v27 = vpop.eup %3846 }
 0x9c2   :  { %v5737_v59 = vpop.permute.xlu0 %3046  ;;  %v5739_v36 = vpop.permute.xlu1 %2636  ;;  %v2585_v63 = vmul.f32 0.6931472, %v3847_v27  ;;  %v2723_v27 = vadd.f32 %v3559_v35, %v3558_v56 }
 0x9c3   :  { %6527 = vst [vmem:[#allocation66_spill] sm:$0xff] %v5737_v59  ;;  %v3849_v7 = vpop.eup %3848 }
 0x9c4   :  { %v2586_v14 = vadd.f32 %v2585_v63, %v6529_v6  ;;  %v3561_v6 = vsel %vm2678_vm5, 1.0, %v6528_v10  ;;  %v2724_v0 = vadd.f32 %v3560_v62, %v2723_v27  ;;  %v3578_v27 = vsel %vm3089_vm3, 1.0, %v6528_v10 }
 0x9c5   :  { %vm3091_vm5 = vcmp.lt.f32.partialorder %v5721_v57, %v5678_v48 }
 0x9c6   :  { %v5756_v15 = vpop.permute.xlu0 %3050  ;;  %v5758_v53 = vpop.permute.xlu1 %2640  ;;  %v2591_v37 = vsub.f32 %v5760_v52, %v2586_v14  ;;  %v6531_v14 = vld [vmem:[#allocation35_spill] sm:$0xff] }
 0x9c7   :  { %6530 = vst [vmem:[#allocation48_spill] sm:$0xff] %v5756_v15  ;;  %vm2587_vm14 = vcmp.lt.f32.partialorder %v5505_v58, %v6531_v14  ;;  %v2725_v58 = vadd.f32 %v3561_v6, %v2724_v0  ;;  %v3564_v6 = vsel %vm2681_vm9, 1.0, %v6528_v10  ;;  %vm2683_vm3 = vcmp.lt.f32.partialorder %v5758_v53, %v5661_v39 }
 0x9c8   :  { %v2592_v63 = vmul.f32 %v3849_v7, %v2591_v37  ;;  %v3577_v37 = vsel %vm3088_vm13, 1.0, %v6528_v10  ;;  %v3562_v7 = vsel %vm2679_vm11, 1.0, %v6528_v10  ;;  %vm2682_vm13 = vcmp.lt.f32.partialorder %v5739_v36, %v5661_v39 }
 0x9c9   :  { %v3135_v62 = vadd.f32 %v3577_v37, %v3134_v61  ;;  %vm3090_vm11 = vcmp.lt.f32.partialorder %v5713_v51, %v5678_v48  ;;  %v3565_v37 = vsel %vm2682_vm13, 1.0, %v6528_v10  ;;  %vm3092_vm9 = vcmp.lt.f32.partialorder %v5737_v59, %v5678_v48 }
 0x9ca   :  { %v5778_v35 = vpop.permute.xlu0 %3054  ;;  %v5780_v56 = vpop.permute.xlu1 %2644  ;;  %v5782_v44 = vsel %vm2587_vm14, %v2592_v63, 0.0  ;;  %v2726_v63 = vadd.f32 %v3562_v7, %v2725_v58  ;;  %v3579_v7 = vsel %vm3090_vm11, 1.0, %v6528_v10 }
 0x9cb   :  { %6532 = vst [vmem:[#allocation67_spill] sm:$0xff] %v5778_v35  ;;  %6533 = vst [vmem:[#allocation49_spill] sm:$0xff] %v5780_v56  ;;  %v3136_v0 = vadd.f32 %v3578_v27, %v3135_v62  ;;  %vm2684_vm8 = vcmp.lt.f32.partialorder %v5780_v56, %v5661_v39  ;;  %vm3094_vm11 = vcmp.lt.f32.partialorder %v5778_v35, %v5678_v48 }
 0x9cc   :  { %v2727_v61 = vadd.f32 %v3563_v8, %v2726_v63  ;;  %v3566_v8 = vsel %vm2683_vm3, 1.0, %v6528_v10  ;;  %v3580_v63 = vsel %vm3091_vm5, 1.0, %v6528_v10  ;;  %vm3093_vm3 = vcmp.lt.f32.partialorder %v5756_v15, %v5678_v48 }
 0x9cd   :  { %v3137_v27 = vadd.f32 %v3579_v7, %v3136_v0  ;;  %v3567_v56 = vsel %vm2684_vm8, 1.0, %v6528_v10  ;;  %v3582_v7 = vsel %vm3093_vm3, 1.0, %v6528_v10 }
 0x9ce   :  { %v5798_v5 = vpop.permute.xlu0 %3058  ;;  %v5800_v14 = vpop.permute.xlu1 %2648  ;;  %v2728_v58 = vadd.f32 %v3564_v6, %v2727_v61  ;;  %v3581_v6 = vsel %vm3092_vm9, 1.0, %v6528_v10 }
 0x9cf   :  { %6534 = vst [vmem:[#allocation68_spill] sm:$0xff] %v5798_v5  ;;  %6535 = vst [vmem:[#allocation51_spill] sm:$0xff] %v5800_v14  ;;  %vm2685_vm14 = vcmp.lt.f32.partialorder %v5800_v14, %v5661_v39  ;;  %v3138_v0 = vadd.f32 %v3580_v63, %v3137_v27  ;;  %vm3095_vm2 = vcmp.lt.f32.partialorder %v5798_v5, %v5678_v48 }
 0x9d0   :  { %v2729_v62 = vadd.f32 %v3565_v37, %v2728_v58  ;;  %v3568_v37 = vsel %vm2685_vm14, 1.0, %v6528_v10 }
 0x9d2   :  { %v5817_v51 = vpop.permute.xlu0 %3062  ;;  %v5819_v29 = vpop.permute.xlu1 %2652  ;;  %v2730_v61 = vadd.f32 %v3566_v8, %v2729_v62  ;;  %v3139_v8 = vadd.f32 %v3581_v6, %v3138_v0  ;;  %v3583_v62 = vsel %vm3094_vm11, 1.0, %v6528_v10  ;;  %v3584_v6 = vsel %vm3095_vm2, 1.0, %v6528_v10 }
 0x9d3   :  { %6536 = vst [vmem:[#allocation52_spill] sm:$0xff] %v5817_v51  ;;  %6537 = vst [vmem:[#allocation53_spill] sm:$0xff] %v5819_v29  ;;  %vm2686_vm5 = vcmp.lt.f32.partialorder %v5819_v29, %v5661_v39  ;;  %vm3096_vm11 = vcmp.lt.f32.partialorder %v5817_v51, %v5678_v48 }
 0x9d4   :  { %v2731_v58 = vadd.f32 %v3567_v56, %v2730_v61  ;;  %v3569_v29 = vsel %vm2686_vm5, 1.0, %v6528_v10  ;;  %v3140_v56 = vadd.f32 %v3582_v7, %v3139_v8 }
 0x9d6   :  { %v5835_v59 = vpop.permute.xlu0 %3066  ;;  %v5837_v57 = vpop.permute.xlu1 %2656  ;;  %v2732_v27 = vadd.f32 %v3568_v37, %v2731_v58  ;;  %v3141_v0 = vadd.f32 %v3583_v62, %v3140_v56 }
 0x9d7   :  { %6538 = vst [vmem:[#allocation55_spill] sm:$0xff] %v5835_v59  ;;  %6539 = vst [vmem:[#allocation69_spill] sm:$0xff] %v5837_v57  ;;  %vm3281_vm13 = vcmp.ge.f32.partialorder %v5835_v59, %v5678_v48  ;;  %vm2687_vm8 = vcmp.lt.f32.partialorder %v5837_v57, %v5661_v39  ;;  %vm3097_vm5 = vcmp.lt.f32.partialorder %v5835_v59, %v5678_v48  ;;  %v3585_v57 = vsel %vm3096_vm11, 1.0, %v6528_v10 }
 0x9d8   :  { %v3570_v63 = vsel %vm2687_vm8, 1.0, %v6528_v10  ;;  %v2733_v61 = vadd.f32 %v3569_v29, %v2732_v27  ;;  %v3142_v29 = vadd.f32 %v3584_v6, %v3141_v0  ;;  %v3586_v62 = vsel %vm3097_vm5, 1.0, %v6528_v10 }
 0x9d9   :  { %vm6359_vm5 = vcmask 1046534  }
 0x9da   :  { %v5855_v14 = vpop.permute.xlu0 %3070  ;;  %v5857_v35 = vpop.permute.xlu1 %2660  ;;  %v3143_v56 = vadd.f32 %v3585_v57, %v3142_v29 }
 0x9db   :  { %6540 = vst [vmem:[#allocation54_spill] sm:$0xff] %v5855_v14  ;;  %6541 = vst [vmem:[#allocation70_spill] sm:$0xff] %v5857_v35  ;;  %vm2688_vm14 = vcmp.lt.f32.partialorder %v5857_v35, %v5661_v39  ;;  %vm3282_vm3 = vcmp.ge.f32.partialorder %v5855_v14, %v5678_v48  ;;  %v2734_v35 = vadd.f32 %v3570_v63, %v2733_v61 }
 0x9dc   :  { %v3571_v37 = vsel %vm2688_vm14, 1.0, %v6528_v10  ;;  %vm3098_vm8 = vcmp.lt.f32.partialorder %v5855_v14, %v5678_v48  ;;  %v3144_v6 = vadd.f32 %v3586_v62, %v3143_v56 }
 0x9dd   :  { %v2735_v27 = vadd.f32 %v3571_v37, %v2734_v35  ;;  %v3587_v61 = vsel %vm3098_vm8, 1.0, %v6528_v10 }
 0x9de   :  { %v5872_v58 = vpop.permute.xlu1 %2664  ;;  %v5875_v7 = vpop.permute.xlu0 %3074  ;;  %v3145_v37 = vadd.f32 %v3587_v61, %v3144_v6  ;;  %v6547_v61 = vld [vmem:[#allocation33_spill] sm:$0xff] }
 0x9df   :  { %6542 = vst [vmem:[#allocation71_spill] sm:$0xff] %v5872_v58  ;;  %6543 = vst [vmem:[#allocation72_spill] sm:$0xff] %v5875_v7  ;;  %vm2689_vm9 = vcmp.lt.f32.partialorder %v5872_v58, %v5661_v39  ;;  %vm3099_vm14 = vcmp.lt.f32.partialorder %v5875_v7, %v5678_v48 }
 0x9e0   :  { %v3572_v8 = vsel %vm2689_vm9, 1.0, %v6528_v10  ;;  %v3588_v35 = vsel %vm3099_vm14, 1.0, %v6528_v10  ;;  %vm6358_vm14 = vcmask 1047559  }
 0x9e1   :  { %v2736_v59 = vadd.f32 %v3572_v8, %v2735_v27  ;;  %v3146_v7 = vadd.f32 %v3588_v35, %v3145_v37 }
 0x9e2   :  { %v5887_v63 = vpop.permute.xlu1 %2668 }
 0x9e3   :  { %6544 = vst [vmem:[#allocation56_spill] sm:$0xff] %v5887_v63  ;;  %vm2690_vm11 = vcmp.lt.f32.partialorder %v5887_v63, %v5661_v39  ;;  %vm2874_vm2 = vcmp.ge.f32.partialorder %v5887_v63, %v5661_v39 }
 0x9e4   :  { %v3573_v0 = vsel %vm2690_vm11, 1.0, %v6528_v10 }
 0x9e5   :  { %v2737_v57 = vadd.f32 %v3573_v0, %v2736_v59 }
 0x9e7   :  { %v2738_v29 = vrot.slane %v2737_v57, 4  ;;  %v5896_v58 = vpop.permute.xlu1 %3078 }
 0x9e8   :  { %6545 = vst [vmem:[#allocation57_spill] sm:$0xff] %v5896_v58  ;;  %vm3100_vm9 = vcmp.lt.f32.partialorder %v5896_v58, %v5678_v48 }
 0x9e9   :  { %v2739_v8 = vadd.f32 %v2738_v29, %v2737_v57  ;;  %v3589_v27 = vsel %vm3100_vm9, 1.0, %v6528_v10  ;;  %v2594_v57 = vsel %vm2337_vm12, %v5782_v44, 0.0 }
 0x9ea   :  { %v3147_v14 = vadd.f32 %v3589_v27, %v3146_v7  ;;  %v6551_v27 = vld [vmem:[#allocation18_spill] sm:$0xff] }
 0x9eb   :  { %v2740_v51 = vrot.slane %v2739_v8, 2 }
 0x9ec   :  { %v3148_v63 = vrot.slane %v3147_v14, 4 }
 0x9ed   :  { %v2741_v62 = vadd.f32 %v2740_v51, %v2739_v8 }
 0x9ee   :  { %v3149_v56 = vadd.f32 %v3148_v63, %v3147_v14 }
 0x9ef   :  { %v2742_v5 = vrot.slane %v2741_v62, 1 }
 0x9f0   :  { %v3150_v15 = vrot.slane %v3149_v56, 2 }
 0x9f1   :  { %v5901_v45 = vadd.f32 %v2742_v5, %v2741_v62 }
 0x9f2   :  { %v3151_v59 = vadd.f32 %v3150_v15, %v3149_v56  ;;  %v6552_v56 = vld [vmem:[#allocation21_spill] sm:$0xff] }
 0x9f3   :  { %6546 = vst [vmem:[#allocation37_spill] sm:$0xff] %v5901_v45  ;;  %vm2745_vm8 = vcmp.lt.f32.partialorder %v5901_v45, %v6547_v61 }
 0x9f4   :  { %v3152_v6 = vrot.slane %v3151_v59, 1  ;;  %v2746_v0 = vsel %vm2745_vm8, %v5760_v52, -1e+30  ;;  %v2751_v10 = vsel %vm2745_vm8, %v6510_v1, -1e+09 }
 0x9f5   :  { %v2748_v35 = vsel %vm6359_vm5, %v2746_v0, -inf  ;;  %v2752_v51 = vsel %vm6359_vm5, %v2751_v10, -inf }
 0x9f6   :  { %2749 = vmax.xlane.f32.xlu0 %v2748_v35  ;;  %v5908_v7 = vadd.f32 %v3152_v6, %v3151_v59 }
 0x9f8   :  { %6548 = vst [vmem:[#allocation58_spill] sm:$0xff] %v5908_v7  ;;  %vm3155_vm11 = vcmp.lt.f32.partialorder %v5908_v7, %v6547_v61 }
 0x9f9   :  { %v3156_v15 = vsel %vm3155_vm11, %v5760_v52, -1e+30  ;;  %v3161_v5 = vsel %vm3155_vm11, %v6510_v1, -1e+09  ;;  %v6550_v52 = vld [vmem:[#allocation19_spill] sm:$0xff] }
 0x9fa   :  { %2753 = vmax.xlane.f32.xlu0 %v2752_v51  ;;  %v3158_v14 = vsel %vm6358_vm14, %v3156_v15, -inf  ;;  %v3162_v63 = vsel %vm6358_vm14, %v3161_v5, -inf }
 0x9fb   :  { %3159 = vmax.xlane.f32.xlu1 %v3158_v14  ;;  %v6554_v14 = vld [vmem:[#allocation22_spill] sm:$0xff] }
 0x9fe   :  { %3163 = vmax.xlane.f32.xlu0 %v3162_v63 }
 0x9ff   :  { %2595 = vadd.xlane.f32.xlu1 %v2594_v57 }
 0xa7f   :  { %v5919_v37 = vpop.xlane.xlu0 %2749 }
 0xa80   :  { %6549 = vst [vmem:[#allocation59_spill] sm:$0xff] %v5919_v37  ;;  %v5923_v29 = vrot.slane %v5919_v37, %v5653_v34 }
 0xa82   :  { %v2780_v8 = vsub.f32 %v6550_v52, %v5923_v29  ;;  %v2779_v1 = vsub.f32 %v6551_v27, %v5923_v29  ;;  %v2781_v62 = vsub.f32 %v6488_v43, %v5923_v29  ;;  %v2782_v59 = vsub.f32 %v6552_v56, %v5923_v29 }
 0xa83   :  { %v2783_v5 = vsub.f32 %v6554_v14, %v5923_v29  ;;  %v2754_v7 = vpop.xlane.xlu0 %2753 }
 0xa84   :  { %v5933_v44 = vpop.xlane.xlu1 %3159  ;;  %v2796_v61 = vmin.f32 %v2780_v8, 0.0  ;;  %v2795_v6 = vmin.f32 %v2779_v1, 0.0  ;;  %v2797_v0 = vmin.f32 %v2781_v62, 0.0  ;;  %v2798_v15 = vmin.f32 %v2782_v59, 0.0  ;;  %v6555_v62 = vld [vmem:[#allocation23_spill] sm:$0xff] }
 0xa85   :  { %6553 = vst [vmem:[#allocation38_spill] sm:$0xff] %v5933_v44  ;;  %v5937_v35 = vrot.slane %v5933_v44, %v5666_v40  ;;  %v2784_v44 = vsub.f32 %v6555_v62, %v5923_v29  ;;  %v2799_v59 = vmin.f32 %v2783_v5, 0.0 }
 0xa86   :  { %v2813_v10 = vmul.f32 1.442695, %v2796_v61  ;;  %v2811_v51 = vmul.f32 1.442695, %v2795_v6  ;;  %v2815_v63 = vmul.f32 1.442695, %v2797_v0 }
 0xa87   :  { %v3189_v57 = vsub.f32 %v6551_v27, %v5937_v35  ;;  %v3192_v8 = vsub.f32 %v6552_v56, %v5937_v35  ;;  %v2817_v61 = vmul.f32 1.442695, %v2798_v15  ;;  %v3194_v0 = vsub.f32 %v6555_v62, %v5937_v35 }
 0xa88   :  { %3850 = vpow2.f32 %v2813_v10  ;;  %v2800_v27 = vmin.f32 %v2784_v44, 0.0  ;;  %v2785_v56 = vsub.f32 %v6518_v60, %v5923_v29  ;;  %v2819_v10 = vmul.f32 1.442695, %v2799_v59  ;;  %v3164_v44 = vpop.xlane.xlu0 %3163 }
 0xa89   :  { %3852 = vpow2.f32 %v2811_v51  ;;  %v3205_v1 = vmin.f32 %v3189_v57, 0.0  ;;  %v3208_v6 = vmin.f32 %v3192_v8, 0.0  ;;  %v3210_v51 = vmin.f32 %v3194_v0, 0.0  ;;  %v6556_v57 = vld [vmem:[#allocation25_spill] sm:$0xff]  ;;  %v6557_v0 = vld [vmem:[#allocation27_spill] sm:$0xff] }
 0xa8a   :  { %3854 = vpow2.f32 %v2815_v63  ;;  %v3196_v63 = vsub.f32 %v6556_v57, %v5937_v35  ;;  %v3197_v15 = vsub.f32 %v6505_v38, %v5937_v35  ;;  %v2801_v62 = vmin.f32 %v2785_v56, 0.0 }
 0xa8b   :  { %v3221_v37 = vmul.f32 1.442695, %v3205_v1  ;;  %v3227_v45 = vmul.f32 1.442695, %v3208_v6  ;;  %v3231_v5 = vmul.f32 1.442695, %v3210_v51  ;;  %v5956_v1 = vrot.slane %v2754_v7, %v5653_v34 }
 0xa8c   :  { %v3212_v8 = vmin.f32 %v3196_v63, 0.0  ;;  %v3213_v6 = vmin.f32 %v3197_v15, 0.0  ;;  %v3198_v58 = vsub.f32 %v6557_v0, %v5937_v35  ;;  %v3199_v15 = vsub.f32 %v6506_v3, %v5937_v35 }
 0xa8d   :  { %3856 = vpow2.f32 %v3221_v37  ;;  %v2821_v37 = vmul.f32 1.442695, %v2800_v27  ;;  %vm2760_vm12 = vcmp.le.f32.partialorder %v4098_v13, %v5956_v1  ;;  %vm2759_vm9 = vcmp.le.f32.partialorder %v4095_v12, %v5956_v1 }
 0xa8e   :  { %3858 = vpow2.f32 %v2817_v61  ;;  %v2786_v61 = vsub.f32 %v6556_v57, %v5923_v29  ;;  %v3235_v59 = vmul.f32 1.442695, %v3212_v8  ;;  %v2823_v27 = vmul.f32 1.442695, %v2801_v62 }
 0xa8f   :  { %3860 = vpow2.f32 %v3227_v45  ;;  %v5963_v45 = vrot.slane %v3164_v44, %v5666_v40  ;;  %v3237_v63 = vmul.f32 1.442695, %v3213_v6  ;;  %v3214_v40 = vmin.f32 %v3198_v58, 0.0 }
 0xa90   :  { %3862 = vpow2.f32 %v2819_v10  ;;  %v2802_v56 = vmin.f32 %v2786_v61, 0.0  ;;  %v2787_v10 = vsub.f32 %v6505_v38, %v5923_v29  ;;  %vm2761_vm8 = vcmp.le.f32.partialorder %v6444_v46, %v5956_v1 }
 0xa91   :  { %3864 = vpow2.f32 %v3231_v5  ;;  %vm3169_vm11 = vcmp.le.f32.partialorder %v4095_v12, %v5963_v45  ;;  %v3190_v58 = vsub.f32 %v6550_v52, %v5937_v35  ;;  %v6558_v62 = vmov 7  }
 0xa92   :  { %3866 = vpow2.f32 %v2821_v37  ;;  %v2825_v38 = vmul.f32 1.442695, %v2802_v56  ;;  %v2803_v8 = vmin.f32 %v2787_v10, 0.0  ;;  %v3239_v61 = vmul.f32 1.442695, %v3214_v40 }
 0xa93   :  { %3868 = vpow2.f32 %v3235_v59  ;;  %v3215_v6 = vmin.f32 %v3199_v15, 0.0  ;;  %v6559_v59 = vld [vmem:[#allocation29_spill] sm:$0xff]  ;;  %v3206_v52 = vmin.f32 %v3190_v58, 0.0  ;;  %vm2773_vm14 = vcmp.le.f32.partialorder %v4147_v31, %v5956_v1 }
 0xa94   :  { %3870 = vpow2.f32 %v2823_v27  ;;  %v2827_v56 = vmul.f32 1.442695, %v2803_v8  ;;  %vm3184_vm5 = vcmp.le.f32.partialorder %v4152_v33, %v5963_v45 }
 0xa95   :  { %v3851_v11 = vpop.eup %3850  ;;  %3872 = vpow2.f32 %v3237_v63  ;;  %v3241_v63 = vmul.f32 1.442695, %v3215_v6  ;;  %v3223_v8 = vmul.f32 1.442695, %v3206_v52 }
 0xa96   :  { %v3853_v34 = vpop.eup %3852  ;;  %v2844_v7 = vsel %vm2760_vm12, %v3851_v11, 0.0  ;;  %vm2762_vm12 = vcmp.le.f32.partialorder %v4105_v16, %v5956_v1  ;;  %3874 = vpow2.f32 %v2825_v38 }
 0xa97   :  { %v3855_v51 = vpop.eup %3854  ;;  %2882 = vperm.xlu1 %3629, %v2844_v7   ;;  %v2843_v57 = vsel %vm2759_vm9, %v3853_v34, 0.0  ;;  %v3200_v34 = vsub.f32 %v6559_v59, %v5937_v35  ;;  %v3191_v7 = vsub.f32 %v6488_v43, %v5937_v35  ;;  %vm3172_vm9 = vcmp.le.f32.partialorder %v4105_v16, %v5963_v45 }
 0xa98   :  { %2877 = vperm.xlu0 %3628, %v2843_v57   ;;  %v2845_v5 = vsel %vm2761_vm8, %v3855_v51, 0.0  ;;  %v3201_v51 = vsub.f32 %v6507_v55, %v5937_v35  ;;  %3876 = vpow2.f32 %v3239_v61  ;;  %vm2763_vm8 = vcmp.le.f32.partialorder %v4108_v17, %v5956_v1 }
 0xa99   :  { %v3216_v40 = vmin.f32 %v3200_v34, 0.0  ;;  %v3207_v43 = vmin.f32 %v3191_v7, 0.0  ;;  %3878 = vpow2.f32 %v2827_v56  ;;  %v3202_v16 = vsub.f32 %v6521_v32, %v5937_v35 }
 0xa9a   :  { %v3857_v11 = vpop.eup %3856  ;;  %3880 = vpow2.f32 %v3241_v63 }
 0xa9b   :  { %v3859_v37 = vpop.eup %3858  ;;  %2887 = vperm.xlu1 %3629, %v2845_v5   ;;  %v3253_v44 = vsel %vm3169_vm11, %v3857_v11, 0.0  ;;  %v3193_v11 = vsub.f32 %v6554_v14, %v5937_v35  ;;  %vm3174_vm11 = vcmp.le.f32.partialorder %v4111_v18, %v5963_v45  ;;  %v3243_v61 = vmul.f32 1.442695, %v3216_v40 }
 0xa9c   :  { %3630 = vset.pattern.permute.xlu0 %v6558_v62  ;;  %v3861_v12 = vpop.eup %3860  ;;  %v2846_v27 = vsel %vm2762_vm12, %v3859_v37, 0.0  ;;  %v3217_v37 = vmin.f32 %v3201_v51, 0.0  ;;  %vm2764_vm12 = vcmp.le.f32.partialorder %v4111_v18, %v5956_v1  ;;  %v3225_v14 = vmul.f32 1.442695, %v3207_v43 }
 0xa9d   :  { %3287 = vperm.xlu0 %3630, %v3253_v44   ;;  %v3863_v10 = vpop.eup %3862  ;;  %v3256_v57 = vsel %vm3172_vm9, %v3861_v12, 0.0  ;;  %v3195_v44 = vsub.f32 %v6518_v60, %v5937_v35  ;;  %v3209_v34 = vmin.f32 %v3193_v11, 0.0  ;;  %v3218_v7 = vmin.f32 %v3202_v16, 0.0 }
 0xa9e   :  { %v3865_v15 = vpop.eup %3864  ;;  %v2847_v38 = vsel %vm2763_vm8, %v3863_v10, 0.0  ;;  %vm3176_vm9 = vcmp.le.f32.partialorder %v4117_v20, %v5963_v45  ;;  %3882 = vpow2.f32 %v3223_v8  ;;  %v3245_v56 = vmul.f32 1.442695, %v3217_v37 }
 0xa9f   :  { %2892 = vperm.xlu1 %3629, %v2846_v27   ;;  %v3867_v5 = vpop.eup %3866  ;;  %v3258_v58 = vsel %vm3174_vm11, %v3865_v15, 0.0  ;;  %v3211_v60 = vmin.f32 %v3195_v44, 0.0  ;;  %vm2765_vm8 = vcmp.le.f32.partialorder %v4114_v19, %v5956_v1  ;;  %3884 = vpow2.f32 %v3243_v61 }
 0xaa0   :  { %v3869_v6 = vpop.eup %3868  ;;  %v2848_v12 = vsel %vm2764_vm12, %v3867_v5, 0.0  ;;  %v3203_v18 = vsub.f32 %v6441_v22, %v5937_v35  ;;  %vm3177_vm11 = vcmp.le.f32.partialorder %v4120_v21, %v5963_v45  ;;  %vm2766_vm12 = vcmp.le.f32.partialorder %v4117_v20, %v5956_v1 }
 0xaa1   :  { %3302 = vperm.xlu0 %3630, %v3256_v57   ;;  %v3871_v27 = vpop.eup %3870  ;;  %v3260_v52 = vsel %vm3176_vm9, %v3869_v6, 0.0  ;;  %3886 = vpow2.f32 %v3225_v14  ;;  %v3229_v51 = vmul.f32 1.442695, %v3209_v34  ;;  %v3247_v63 = vmul.f32 1.442695, %v3218_v7 }
 0xaa2   :  { %v3873_v10 = vpop.eup %3872  ;;  %v2849_v57 = vsel %vm2765_vm8, %v3871_v27, 0.0  ;;  %v2792_v40 = vsub.f32 %v6521_v32, %v5923_v29  ;;  %v2793_v15 = vsub.f32 %v6441_v22, %v5923_v29  ;;  %3888 = vpow2.f32 %v3245_v56 }
 0xaa3   :  { %2897 = vperm.xlu1 %3629, %v2847_v38   ;;  %v3875_v43 = vpop.eup %3874  ;;  %v3261_v11 = vsel %vm3177_vm11, %v3873_v10, 0.0  ;;  %v3233_v5 = vmul.f32 1.442695, %v3211_v60  ;;  %v2794_v38 = vsub.f32 %v4198_v47, %v5923_v29  ;;  %v3219_v16 = vmin.f32 %v3203_v18, 0.0 }
 0xaa4   :  { %v2788_v8 = vsub.f32 %v6557_v0, %v5923_v29  ;;  %v2808_v37 = vmin.f32 %v2792_v40, 0.0  ;;  %v2809_v44 = vmin.f32 %v2793_v15, 0.0  ;;  %vm3178_vm9 = vcmp.le.f32.partialorder %v4126_v23, %v5963_v45 }
 0xaa5   :  { %3312 = vperm.xlu0 %3630, %v3258_v58   ;;  %v3877_v58 = vpop.eup %3876  ;;  %3890 = vpow2.f32 %v3229_v51  ;;  %v2810_v22 = vmin.f32 %v2794_v38, 0.0  ;;  %v3204_v32 = vsub.f32 %v4198_v47, %v5937_v35  ;;  %v2850_v61 = vsel %vm2766_vm12, %v3875_v43, 0.0 }
 0xaa6   :  { %3892 = vpow2.f32 %v3247_v63  ;;  %v2837_v6 = vmul.f32 1.442695, %v2808_v37  ;;  %v2839_v14 = vmul.f32 1.442695, %v2809_v44  ;;  %v3879_v0 = vpop.eup %3878  ;;  %v2789_v34 = vsub.f32 %v6506_v3, %v5923_v29 }
 0xaa7   :  { %2902 = vperm.xlu1 %3629, %v2848_v12   ;;  %3894 = vpow2.f32 %v3233_v5  ;;  %v2841_v12 = vmul.f32 1.442695, %v2810_v22  ;;  %v3220_v7 = vmin.f32 %v3204_v32, 0.0  ;;  %v3262_v27 = vsel %vm3178_vm9, %v3877_v58, 0.0  ;;  %v3881_v47 = vpop.eup %3880 }
 0xaa8   :  { %v3249_v56 = vmul.f32 1.442695, %v3219_v16  ;;  %v2804_v60 = vmin.f32 %v2788_v8, 0.0  ;;  %3896 = vpow2.f32 %v2837_v6  ;;  %vm2767_vm8 = vcmp.le.f32.partialorder %v4120_v21, %v5956_v1 }
 0xaa9   :  { %3322 = vperm.xlu0 %3630, %v3260_v52   ;;  %3898 = vpow2.f32 %v2839_v14  ;;  %v3251_v20 = vmul.f32 1.442695, %v3220_v7  ;;  %v2851_v35 = vsel %vm2767_vm8, %v3879_v0, 0.0  ;;  %vm3179_vm11 = vcmp.le.f32.partialorder %v4131_v25, %v5963_v45 }
 0xaaa   :  { %3900 = vpow2.f32 %v2841_v12  ;;  %v2790_v3 = vsub.f32 %v6559_v59, %v5923_v29  ;;  %v3263_v52 = vsel %vm3179_vm11, %v3881_v47, 0.0  ;;  %v2829_v18 = vmul.f32 1.442695, %v2804_v60 }
 0xaab   :  { %2907 = vperm.xlu1 %3629, %v2849_v57   ;;  %3902 = vpow2.f32 %v3251_v20  ;;  %v3883_v10 = vpop.eup %3882  ;;  %v2805_v51 = vmin.f32 %v2789_v34, 0.0  ;;  %vm3170_vm12 = vcmp.le.f32.partialorder %v4098_v13, %v5963_v45  ;;  %vm3180_vm9 = vcmp.le.f32.partialorder %v4134_v26, %v5963_v45 }
 0xaac   :  { %3904 = vpow2.f32 %v3249_v56  ;;  %v3885_v57 = vpop.eup %3884  ;;  %v3254_v63 = vsel %vm3170_vm12, %v3883_v10, 0.0  ;;  %v2806_v40 = vmin.f32 %v2790_v3, 0.0  ;;  %vm3171_vm8 = vcmp.le.f32.partialorder %v6444_v46, %v5963_v45 }
 0xaad   :  { %3327 = vperm.xlu0 %3630, %v3261_v11   ;;  %v3264_v15 = vsel %vm3180_vm9, %v3885_v57, 0.0  ;;  %3906 = vpow2.f32 %v2829_v18  ;;  %v2831_v43 = vmul.f32 1.442695, %v2805_v51  ;;  %v2791_v11 = vsub.f32 %v6507_v55, %v5923_v29 }
 0xaae   :  { %v3887_v21 = vpop.eup %3886  ;;  %vm3181_vm11 = vcmp.le.f32.partialorder %v4139_v28, %v5963_v45  ;;  %v2833_v16 = vmul.f32 1.442695, %v2806_v40  ;;  %vm2772_vm12 = vcmp.le.f32.partialorder %v4144_v30, %v5956_v1  ;;  %vm3173_vm9 = vcmp.le.f32.partialorder %v4108_v17, %v5963_v45 }
 0xaaf   :  { %2912 = vperm.xlu1 %3629, %v2850_v61   ;;  %v3889_v59 = vpop.eup %3888  ;;  %v3255_v38 = vsel %vm3171_vm8, %v3887_v21, 0.0  ;;  %3908 = vpow2.f32 %v2831_v43  ;;  %v2807_v44 = vmin.f32 %v2791_v11, 0.0  ;;  %vm3182_vm8 = vcmp.le.f32.partialorder %v4144_v30, %v5963_v45 }
 0xab0   :  { %v3265_v37 = vsel %vm3181_vm11, %v3889_v59, 0.0  ;;  %3910 = vpow2.f32 %v2833_v16  ;;  %vm2774_vm11 = vcmp.le.f32.partialorder %v4152_v33, %v5956_v1 }
 0xab1   :  { %3332 = vperm.xlu0 %3630, %v3262_v27   ;;  %v2835_v14 = vmul.f32 1.442695, %v2807_v44  ;;  %v6560_v27 = vmov 6  }
 0xab2   :  { %v3891_v5 = vpop.eup %3890 }
 0xab3   :  { %2917 = vperm.xlu1 %3629, %v2851_v35   ;;  %v3893_v13 = vpop.eup %3892  ;;  %v3257_v22 = vsel %vm3173_vm9, %v3891_v5, 0.0  ;;  %3912 = vpow2.f32 %v2835_v14  ;;  %vm2768_vm9 = vcmp.le.f32.partialorder %v4126_v23, %v5956_v1 }
 0xab4   :  { %v3895_v8 = vpop.eup %3894  ;;  %v3266_v6 = vsel %vm3182_vm8, %v3893_v13, 0.0  ;;  %vm2770_vm8 = vcmp.le.f32.partialorder %v4134_v26, %v5956_v1 }
 0xab5   :  { %3337 = vperm.xlu0 %3630, %v3263_v52   ;;  %v3897_v58 = vpop.eup %3896 }
 0xab6   :  { %v3899_v55 = vpop.eup %3898  ;;  %v2856_v46 = vsel %vm2772_vm12, %v3897_v58, 0.0  ;;  %vm3175_vm12 = vcmp.le.f32.partialorder %v4114_v19, %v5963_v45 }
 0xab7   :  { %3631 = vset.pattern.permute.xlu1 %v6558_v62  ;;  %v3901_v29 = vpop.eup %3900  ;;  %v2857_v32 = vsel %vm2773_vm14, %v3899_v55, 0.0  ;;  %v3259_v34 = vsel %vm3175_vm12, %v3895_v8, 0.0  ;;  %vm3183_vm14 = vcmp.le.f32.partialorder %v4147_v31, %v5963_v45 }
 0xab8   :  { %3292 = vperm.xlu1 %3631, %v3254_v63   ;;  %v3903_v61 = vpop.eup %3902  ;;  %v2858_v0 = vsel %vm2774_vm11, %v3901_v29, 0.0  ;;  %vm2771_vm11 = vcmp.le.f32.partialorder %v4139_v28, %v5956_v1  ;;  %v6565_v29 = vld [vmem:[#allocation50_spill] sm:$0xff] }
 0xab9   :  { %3342 = vperm.xlu0 %3630, %v3264_v15   ;;  %v3905_v17 = vpop.eup %3904  ;;  %v3268_v30 = vsel %vm3184_vm5, %v3903_v61, 0.0  ;;  %vm2769_vm5 = vcmp.le.f32.partialorder %v4131_v25, %v5956_v1  ;;  %v6072_v25 = vpop.xlane.xlu1 %2595 }
 0xaba   :  { %v3267_v12 = vsel %vm3183_vm14, %v3905_v17, 0.0  ;;  %v3907_v7 = vpop.eup %3906 }
 0xabb   :  { %v2852_v33 = vsel %vm2768_vm9, %v3907_v7, 0.0 }
 0xabc   :  { %3297 = vperm.xlu1 %3631, %v3255_v38   ;;  %v3909_v56 = vpop.eup %3908 }
 0xabd   :  { %3347 = vperm.xlu0 %3630, %v3265_v37   ;;  %v3911_v19 = vpop.eup %3910  ;;  %v2853_v60 = vsel %vm2769_vm5, %v3909_v56, 0.0 }
 0xabe   :  { %v2854_v31 = vsel %vm2770_vm8, %v3911_v19, 0.0 }
 0xac0   :  { %3307 = vperm.xlu1 %3631, %v3257_v22   ;;  %v3913_v45 = vpop.eup %3912 }
 0xac1   :  { %3352 = vperm.xlu0 %3630, %v3266_v6   ;;  %v2855_v23 = vsel %vm2771_vm11, %v3913_v45, 0.0 }
 0xac4   :  { %3317 = vperm.xlu1 %3631, %v3259_v34  }
 0xac5   :  { %3357 = vperm.xlu0 %3630, %v3267_v12  }
 0xac8   :  { %3632 = vset.pattern.permute.xlu1 %v6560_v27  ;;  %v6573_v27 = vld [vmem:[#allocation46_spill] sm:$0xff] }
 0xac9   :  { %2922 = vperm.xlu1 %3632, %v2852_v33   ;;  %vm6574_vm14 = vcmp.ge.f32.partialorder %v6573_v27, %v5678_v48 }
 0xacd   :  { %2927 = vperm.xlu1 %3632, %v2853_v60   ;;  %v6575_v60 = vld [vmem:[#allocation66_spill] sm:$0xff] }
 0xace   :  { %vm6576_vm9 = vcmp.ge.f32.partialorder %v6575_v60, %v5678_v48 }
 0xad1   :  { %2932 = vperm.xlu1 %3632, %v2854_v31  }
 0xad5   :  { %2937 = vperm.xlu1 %3632, %v2855_v23   ;;  %v6577_v23 = vld [vmem:[#allocation48_spill] sm:$0xff] }
 0xad6   :  { %vm6578_vm5 = vcmp.ge.f32.partialorder %v6577_v23, %v5678_v48 }
 0xad9   :  { %2942 = vperm.xlu1 %3632, %v2856_v46  }
 0xadd   :  { %2947 = vperm.xlu1 %3632, %v2857_v32  }
 0xae1   :  { %2952 = vperm.xlu1 %3632, %v2858_v0   ;;  %v6569_v0 = vld [vmem:[#allocation44_spill] sm:$0xff] }
 0xae5   :  { %3633 = vset.pattern.permute.xlu1 %v6558_v62 }
 0xae6   :  { %3362 = vperm.xlu1 %3633, %v3268_v30   ;;  %v6571_v30 = vld [vmem:[#allocation65_spill] sm:$0xff] }
 0xae7   :  { %vm6572_vm12 = vcmp.ge.f32.partialorder %v6571_v30, %v5678_v48 }
 0xb12   :  { %v2883_v47 = vpop.permute.xlu1 %2882 }
 0xb13   :  { %v2956_v26 = vsel %vm2860_vm4, %v2883_v47, 0.0  ;;  %v2878_v20 = vpop.permute.xlu0 %2877  ;;  %vm6563_vm4 = vcmp.ge.f32.partialorder %v5684_v42, %v5678_v48 }
 0xb14   :  { %v2955_v28 = vsel %vm2859_vm0, %v2878_v20, 0.0  ;;  %vm6566_vm0 = vcmp.ge.f32.partialorder %v6565_v29, %v5678_v48 }
 0xb15   :  { %v2971_v1 = vadd.f32 %v2956_v26, %v2955_v28  ;;  %v6579_v28 = vld [vmem:[#allocation49_spill] sm:$0xff] }
 0xb16   :  { %v2888_v35 = vpop.permute.xlu1 %2887  ;;  %vm6580_vm8 = vcmp.ge.f32.partialorder %v6579_v28, %v5661_v39  ;;  %v6602_v28 = vld [vmem:[#allocation37_spill] sm:$0xff] }
 0xb17   :  { %v2957_v3 = vsel %vm2861_vm15, %v2888_v35, 0.0  ;;  %v6581_v35 = vld [vmem:[#allocation67_spill] sm:$0xff] }
 0xb18   :  { %v2972_v62 = vadd.f32 %v2971_v1, %v2957_v3  ;;  %v3288_v10 = vpop.permute.xlu0 %3287  ;;  %vm6582_vm11 = vcmp.ge.f32.partialorder %v6581_v35, %v5678_v48 }
 0xb19   :  { %v3365_v4 = vsel %vm6563_vm4, %v3288_v10, 0.0 }
 0xb1a   :  { %v2893_v52 = vpop.permute.xlu1 %2892 }
 0xb1b   :  { %v2958_v18 = vsel %vm2862_vm1, %v2893_v52, 0.0  ;;  %vm6570_vm1 = vcmp.ge.f32.partialorder %v6569_v0, %v5678_v48 }
 0xb1c   :  { %v2973_v2 = vadd.f32 %v2972_v62, %v2958_v18  ;;  %v3303_v51 = vpop.permute.xlu0 %3302  ;;  %v6583_v18 = vld [vmem:[#allocation68_spill] sm:$0xff] }
 0xb1e   :  { %v2898_v57 = vpop.permute.xlu1 %2897 }
 0xb1f   :  { %v2959_v24 = vsel %vm2863_vm10, %v2898_v57, 0.0  ;;  %vm6561_vm10 = vcmp.ge.f32.partialorder %v5739_v36, %v5661_v39 }
 0xb20   :  { %v2974_v21 = vadd.f32 %v2973_v2, %v2959_v24  ;;  %v3313_v63 = vpop.permute.xlu0 %3312  ;;  %v6585_v24 = vld [vmem:[#allocation51_spill] sm:$0xff] }
 0xb21   :  { %v3370_v34 = vsel %vm6572_vm12, %v3313_v63, 0.0  ;;  %v6587_v63 = vld [vmem:[#allocation52_spill] sm:$0xff]  ;;  %vm6607_vm12 = vcmask 1046534  }
 0xb22   :  { %v2903_v40 = vpop.permute.xlu1 %2902  ;;  %vm6588_vm4 = vcmp.ge.f32.partialorder %v6587_v63, %v5678_v48  ;;  %v3925_v63 = vld [vmem:[#allocation2] sm:$0xff] }
 0xb23   :  { %v2960_v49 = vsel %vm2864_vm7, %v2903_v40, 0.0  ;;  %vm6562_vm7 = vcmp.ge.f32.partialorder %v5758_v53, %v5661_v39  ;;  %v6567_v53 = vld [vmem:[#allocation45_spill] sm:$0xff] }
 0xb24   :  { %v2975_v59 = vadd.f32 %v2974_v21, %v2960_v49  ;;  %v3323_v15 = vpop.permute.xlu0 %3322  ;;  %vm6568_vm15 = vcmp.ge.f32.partialorder %v6567_v53, %v5678_v48 }
 0xb25   :  { %v3368_v61 = vsel %vm6568_vm15, %v3303_v51, 0.0  ;;  %v3372_v31 = vsel %vm6576_vm9, %v3323_v15, 0.0  ;;  %vm6608_vm9 = vcmask 1047559  }
 0xb26   :  { %v2908_v43 = vpop.permute.xlu1 %2907 }
 0xb27   :  { %v2961_v54 = vsel %vm2865_vm6, %v2908_v43, 0.0  ;;  %vm6564_vm6 = vcmp.ge.f32.partialorder %v5688_v9, %v5678_v48 }
 0xb28   :  { %v2976_v11 = vadd.f32 %v2975_v59, %v2961_v54  ;;  %v3328_v5 = vpop.permute.xlu0 %3327 }
 0xb29   :  { %v3373_v47 = vsel %vm6578_vm5, %v3328_v5, 0.0 }
 0xb2a   :  { %v2913_v13 = vpop.permute.xlu1 %2912 }
 0xb2b   :  { %v2962_v50 = vsel %vm6561_vm10, %v2913_v13, 0.0  ;;  %vm6584_vm10 = vcmp.ge.f32.partialorder %v6583_v18, %v5678_v48  ;;  %v6590_v13 = vld [vmem:[#allocation53_spill] sm:$0xff] }
 0xb2c   :  { %v2977_v38 = vadd.f32 %v2976_v11, %v2962_v50  ;;  %v3333_v8 = vpop.permute.xlu0 %3332 }
 0xb2d   :  { %v3374_v3 = vsel %vm6582_vm11, %v3333_v8, 0.0 }
 0xb2e   :  { %v2918_v16 = vpop.permute.xlu1 %2917 }
 0xb2f   :  { %v2963_v41 = vsel %vm6562_vm7, %v2918_v16, 0.0  ;;  %vm6586_vm7 = vcmp.ge.f32.partialorder %v6585_v24, %v5661_v39 }
 0xb30   :  { %v2978_v37 = vadd.f32 %v2977_v38, %v2963_v41  ;;  %v3338_v55 = vpop.permute.xlu0 %3337  ;;  %v6593_v41 = vld [vmem:[#allocation72_spill] sm:$0xff] }
 0xb31   :  { %v3375_v2 = vsel %vm6584_vm10, %v3338_v55, 0.0  ;;  %v6594_v55 = vld [vmem:[#allocation69_spill] sm:$0xff] }
 0xb33   :  { %v3293_v44 = vpop.permute.xlu1 %3292 }
 0xb34   :  { %v3366_v58 = vsel %vm6564_vm6, %v3293_v44, 0.0  ;;  %v3343_v6 = vpop.permute.xlu0 %3342  ;;  %vm6591_vm6 = vcmp.ge.f32.partialorder %v6590_v13, %v5661_v39 }
 0xb35   :  { %v3381_v36 = vadd.f32 %v3366_v58, %v3365_v4  ;;  %v3376_v40 = vsel %vm6588_vm4, %v3343_v6, 0.0  ;;  %v6598_v6 = vld [vmem:[#allocation71_spill] sm:$0xff] }
 0xb37   :  { %v3298_v46 = vpop.permute.xlu1 %3297 }
 0xb38   :  { %v3367_v22 = vsel %vm6566_vm0, %v3298_v46, 0.0  ;;  %v3348_v56 = vpop.permute.xlu0 %3347  ;;  %vm3283_vm0 = vcmp.ge.f32.partialorder %v6593_v41, %v5678_v48 }
 0xb39   :  { %v3382_v32 = vadd.f32 %v3381_v36, %v3367_v22  ;;  %v3377_v43 = vsel %vm3281_vm13, %v3348_v56, 0.0  ;;  %vm6595_vm13 = vcmp.ge.f32.partialorder %v6594_v55, %v5661_v39  ;;  %v6596_v22 = vld [vmem:[#allocation70_spill] sm:$0xff] }
 0xb3a   :  { %vm6597_vm15 = vcmp.ge.f32.partialorder %v6596_v22, %v5661_v39 }
 0xb3b   :  { %v3308_v14 = vpop.permute.xlu1 %3307  ;;  %v3383_v42 = vadd.f32 %v3382_v32, %v3368_v61 }
 0xb3c   :  { %v3369_v9 = vsel %vm6570_vm1, %v3308_v14, 0.0  ;;  %v3353_v10 = vpop.permute.xlu0 %3352 }
 0xb3d   :  { %v3384_v17 = vadd.f32 %v3383_v42, %v3369_v9  ;;  %v3378_v16 = vsel %vm3282_vm3, %v3353_v10, 0.0  ;;  %vm6599_vm3 = vcmp.ge.f32.partialorder %v6598_v6, %v5661_v39  ;;  %v2998_v39 = vmul.f32 -0.22314355, %v6602_v28 }
 0xb3f   :  { %v3318_v12 = vpop.permute.xlu1 %3317  ;;  %v3385_v7 = vadd.f32 %v3384_v17, %v3370_v34 }
 0xb40   :  { %v3371_v33 = vsel %vm6574_vm14, %v3318_v12, 0.0  ;;  %v3358_v5 = vpop.permute.xlu0 %3357  ;;  %v6601_v12 = vld [vmem:[#allocation57_spill] sm:$0xff] }
 0xb41   :  { %v3386_v19 = vadd.f32 %v3385_v7, %v3371_v33  ;;  %v3379_v44 = vsel %vm3283_vm0, %v3358_v5, 0.0  ;;  %vm3284_vm1 = vcmp.ge.f32.partialorder %v6601_v12, %v5678_v48  ;;  %v6603_v48 = vld [vmem:[#allocation58_spill] sm:$0xff] }
 0xb42   :  { %v3408_v10 = vmul.f32 -0.22314355, %v6603_v48 }
 0xb43   :  { %v3387_v45 = vadd.f32 %v3386_v19, %v3372_v31 }
 0xb44   :  { %v2923_v26 = vpop.permute.xlu1 %2922  ;;  %v3409_v18 = vmul.f32 1.442695, %v3408_v10 }
 0xb45   :  { %v3388_v20 = vadd.f32 %v3387_v45, %v3373_v47  ;;  %v2964_v1 = vsel %vm6580_vm8, %v2923_v26, 0.0 }
 0xb46   :  { %v2979_v62 = vadd.f32 %v2978_v37, %v2964_v1 }
 0xb47   :  { %v3389_v52 = vadd.f32 %v3388_v20, %v3374_v3 }
 0xb48   :  { %v2928_v51 = vpop.permute.xlu1 %2927 }
 0xb49   :  { %v3390_v57 = vadd.f32 %v3389_v52, %v3375_v2  ;;  %v2965_v21 = vsel %vm6586_vm7, %v2928_v51, 0.0 }
 0xb4a   :  { %v2980_v49 = vadd.f32 %v2979_v62, %v2965_v21  ;;  %v2999_v62 = vmul.f32 1.442695, %v2998_v39 }
 0xb4b   :  { %v3391_v59 = vadd.f32 %v3390_v57, %v3376_v40  ;;  %v6604_v57 = vld [vmem:[#allocation59_spill] sm:$0xff] }
 0xb4c   :  { %v2933_v54 = vpop.permute.xlu1 %2932 }
 0xb4d   :  { %v3392_v11 = vadd.f32 %v3391_v59, %v3377_v43  ;;  %v2966_v50 = vsel %vm6591_vm6, %v2933_v54, 0.0  ;;  %v6605_v43 = vld [vmem:[#allocation35_spill] sm:$0xff]  ;;  %v6606_v54 = vld [vmem:[#allocation38_spill] sm:$0xff] }
 0xb4e   :  { %v2981_v8 = vadd.f32 %v2980_v49, %v2966_v50  ;;  %vm3407_vm14 = vcmp.lt.f32.partialorder %v6603_v48, %v6605_v43 }
 0xb4f   :  { %v3393_v37 = vadd.f32 %v3392_v11, %v3378_v16 }
 0xb50   :  { %v2938_v4 = vpop.permute.xlu1 %2937 }
 0xb51   :  { %v3394_v58 = vadd.f32 %v3393_v37, %v3379_v44  ;;  %v2967_v36 = vsel %vm6595_vm13, %v2938_v4, 0.0 }
 0xb52   :  { %v2982_v46 = vadd.f32 %v2981_v8, %v2967_v36 }
 0xb54   :  { %v2943_v29 = vpop.permute.xlu1 %2942 }
 0xb55   :  { %v2968_v32 = vsel %vm6597_vm15, %v2943_v29, 0.0 }
 0xb56   :  { %v2983_v53 = vadd.f32 %v2982_v46, %v2968_v32 }
 0xb58   :  { %v2948_v61 = vpop.permute.xlu1 %2947 }
 0xb59   :  { %v2969_v14 = vsel %vm6599_vm3, %v2948_v61, 0.0 }
 0xb5a   :  { %v2984_v42 = vadd.f32 %v2983_v53, %v2969_v14 }
 0xb5c   :  { %v2953_v0 = vpop.permute.xlu1 %2952 }
 0xb5d   :  { %v2970_v17 = vsel %vm2874_vm2, %v2953_v0, 0.0  ;;  %vm2997_vm2 = vcmp.lt.f32.partialorder %v6602_v28, %v6605_v43 }
 0xb5e   :  { %v2985_v30 = vadd.f32 %v2984_v42, %v2970_v17 }
 0xb60   :  { %v2986_v34 = vrot.slane %v2985_v30, 4 }
 0xb61   :  { %v3363_v7 = vpop.permute.xlu1 %3362 }
 0xb62   :  { %v2987_v27 = vadd.f32 %v2986_v34, %v2985_v30  ;;  %v3380_v33 = vsel %vm3284_vm1, %v3363_v7, 0.0 }
 0xb63   :  { %v3395_v56 = vadd.f32 %v3394_v58, %v3380_v33 }
 0xb64   :  { %v2988_v19 = vrot.slane %v2987_v27, 2 }
 0xb65   :  { %v3396_v60 = vrot.slane %v3395_v56, 4 }
 0xb66   :  { %v2989_v31 = vadd.f32 %v2988_v19, %v2987_v27 }
 0xb67   :  { %v3397_v45 = vadd.f32 %v3396_v60, %v3395_v56 }
 0xb68   :  { %v2990_v23 = vrot.slane %v2989_v31, 1 }
 0xb69   :  { %v3398_v47 = vrot.slane %v3397_v45, 2 }
 0xb6a   :  { %v2991_v26 = vadd.f32 %v2990_v23, %v2989_v31 }
 0xb6b   :  { %v3399_v20 = vadd.f32 %v3398_v47, %v3397_v45 }
 0xb6c   :  { %v2993_v1 = vmax.f32 %v2991_v26, 1e-30 }
 0xb6d   :  { %v3400_v35 = vrot.slane %v3399_v20, 1 }
 0xb6e   :  { %3914 = vlog2.f32 %v2993_v1 }
 0xb6f   :  { %v3401_v3 = vadd.f32 %v3400_v35, %v3399_v20 }
 0xb71   :  { %v3403_v52 = vmax.f32 %v3401_v3, 1e-30 }
 0xb73   :  { %3916 = vlog2.f32 %v3403_v52 }
 0xb74   :  { %3918 = vpow2.f32 %v2999_v62 }
 0xb75   :  { %3920 = vpow2.f32 %v3409_v18 }
 0xb7b   :  { %v3915_v2 = vpop.eup %3914 }
 0xb7c   :  { %v2995_v51 = vmul.f32 0.6931472, %v3915_v2 }
 0xb7e   :  { %v2996_v24 = vadd.f32 %v2995_v51, %v6604_v57 }
 0xb80   :  { %v3917_v21 = vpop.eup %3916  ;;  %v3001_v40 = vsub.f32 %v3925_v63, %v2996_v24 }
 0xb81   :  { %v3919_v49 = vpop.eup %3918  ;;  %v3405_v59 = vmul.f32 0.6931472, %v3917_v21 }
 0xb82   :  { %v3002_v15 = vmul.f32 %v3919_v49, %v3001_v40  ;;  %v3921_v38 = vpop.eup %3920 }
 0xb83   :  { %v3406_v11 = vadd.f32 %v3405_v59, %v6606_v54 }
 0xb84   :  { %v3003_v5 = vsel %vm2997_vm2, %v3002_v15, 0.0 }
 0xb85   :  { %v3004_v13 = vsel %vm6607_vm12, %v3003_v5, 0.0  ;;  %v3411_v50 = vsub.f32 %v3925_v63, %v3406_v11 }
 0xb86   :  { %3005 = vadd.xlane.f32.xlu0 %v3004_v13 }
 0xb87   :  { %v3412_v16 = vmul.f32 %v3921_v38, %v3411_v50 }
 0xb89   :  { %v3413_v8 = vsel %vm3407_vm14, %v3412_v16, 0.0 }
 0xb8a   :  { %v3414_v41 = vsel %vm6608_vm9, %v3413_v8, 0.0 }
 0xb8b   :  { %3415 = vadd.xlane.f32.xlu1 %v3414_v41 }
 0xb8c   :  { %3997 = shalt.err (!%p3994_p5)
}
 0xb8d   :  { %3448 = dma.vmem_to_hbm [thread:$0]  %s3446_s2, 16, %s6210_s4, [#allocation10]   ;;  %v6609_v37 = vld [vmem:[#allocation42_spill] sm:$0xff]  ;;  %v6610_v4 = vld [vmem:[#allocation15_spill] sm:$0xff]  ;;  %v6618_v9 = vld [vmem:[#allocation32_spill] sm:$0xff]  ;;  %v2597_v12 = vsub.f32 0.0, %v6072_v25 }
 0xb8e   :  { %v550_v44 = vsub.f32 0.0, %v6609_v37  ;;  %vm6611_vm5 = vcmp.eq.s32.totalorder %v6610_v4, 0  ;;  %v6612_v36 = vld [vmem:[#allocation43_spill] sm:$0xff]  ;;  %vm6613_vm8 = vcmp.eq.s32.totalorder %v6610_v4, 1  ;;  %vm6615_vm11 = vcmp.eq.s32.totalorder %v6610_v4, 2  ;;  %s4047_s4 = smov [#allocation8]  }
 0xb8f   :  { %v957_v46 = vsub.f32 0.0, %v6612_v36  ;;  %v6614_v32 = vld [vmem:[#allocation47_spill] sm:$0xff]  ;;  %vm6617_vm10 = vcmp.eq.s32.totalorder %v6610_v4, 3  ;;  %v2187_v17 = vsub.f32 0.0, %v6618_v9  ;;  %vm6619_vm7 = vcmp.eq.s32.totalorder %v6610_v4, 4  ;;  %s3435_s7 = sshll.u32 %s4047_s4, 4  ;;  %s3436_s7 = int_to_ptr.vmem [resolvable:$true] %s3435_s7 }
 0xb90   :  { %v555_v58 = vsel %vm6611_vm5, %v550_v44, 0.0  ;;  %v1367_v53 = vsub.f32 0.0, %v6614_v32  ;;  %v6616_v6 = vld [vmem:[#allocation63_spill] sm:$0xff]  ;;  %vm6620_vm4 = vcmp.eq.s32.totalorder %v6610_v4, 5  ;;  %vm6621_vm6 = vcmp.eq.s32.totalorder %v6610_v4, 6  ;;  %s4006_s8 = scalar_lea.vmem %s3436_s7, 16  ;;  %p4011_p7 = scmp.lt.s32.totalorder %s3436_s7, %s3436_s7 }
 0xb91   :  { %v960_v55 = vrot.slane %v555_v58, 7  ;;  %v1777_v14 = vsub.f32 0.0, %v6616_v6  ;;  %vm6622_vm0 = vcmp.eq.s32.totalorder %v6610_v4, 7  ;;  %p4007_p6 = scmp.ne.s32.totalorder %s3436_s7, %s4006_s8  ;;  %s4010_s9 = scalar_lea.vmem %s3436_s7, 32 }
 0xb92   :  { %p4012_p8 = scmp.lt.s32.totalorder %s4010_s9, %s4006_s8 }
 0xb93   :  { %v962_v29 = vsel %vm6613_vm8, %v957_v46, %v960_v55 }
 0xb94   :  { %v1370_v22 = vrot.slane %v962_v29, 7  ;;  %p4013_p9 = por %p4012_p8, %p4011_p7 }
 0xb96   :  { %v1372_v61 = vsel %vm6615_vm11, %v1367_v53, %v1370_v22  ;;  %p4014_p10 = pnand %p4013_p9, %p4007_p6 }
 0xb97   :  { %v1780_v42 = vrot.slane %v1372_v61, 7 }
 0xb99   :  { %v1782_v0 = vsel %vm6617_vm10, %v1777_v14, %v1780_v42 }
 0xb9a   :  { %v2190_v30 = vrot.slane %v1782_v0, 7 }
 0xb9c   :  { %v2192_v34 = vsel %vm6619_vm7, %v2187_v17, %v2190_v30 }
 0xb9d   :  { %v2600_v7 = vrot.slane %v2192_v34, 7 }
 0xb9f   :  { %v2602_v27 = vsel %vm6620_vm4, %v2597_v12, %v2600_v7 }
 0xba0   :  { %v3010_v56 = vrot.slane %v2602_v27, 7 }
 0xc0f   :  { %v3006_v33 = vpop.xlane.xlu0 %3005 }
 0xc10   :  { %v3007_v19 = vsub.f32 0.0, %v3006_v33 }
 0xc12   :  { %v3012_v60 = vsel %vm6621_vm6, %v3007_v19, %v3010_v56 }
 0xc13   :  { %v3420_v45 = vrot.slane %v3012_v60, 7 }
 0xc14   :  { %v3416_v31 = vpop.xlane.xlu1 %3415 }
 0xc15   :  { %v3417_v23 = vsub.f32 0.0, %v3416_v31 }
 0xc17   :  { %v3422_v47 = vsel %vm6622_vm0, %v3417_v23, %v3420_v45 }
 0xc18   :  { %3427 = vst [vmem:[#allocation8 - $0x7] sm:$0x80] %v3422_v47 }
 0xc19   :  { %4017 = shalt.err (!%p4014_p10)
}
 0xc1a   :  { %3438 = dma.vmem_to_hbm [thread:$0]  %s3436_s7, 16, %s6209_s3, [#allocation4]  }
 0xc1b   :  { %4030 = dma.done.wait [#allocation4], 16  }
 0xc1c   :  { %4031 = vsyncadd [#allocation4], 4294967280 }
 0xc1d   :  { %4032 = dma.done.wait [#allocation10], 16  }
 0xc1e   :  { %4033 = vsyncadd [#allocation10], 4294967280 }
 0xc1f   :  { %3455 = vsyncpa [#allocation3], 1 }
 0xc20   :  { %3456 = vsyncpa [#allocation6], 1 }
 0xc21   :  { %3457 = vsyncpa [#allocation4], 1 }
 0xc22   :  { %3458 = vsyncpa [#allocation10], 1 }

</bundles_post_ra>
